<compile_context>
chip_gen: v7x
topology: tpu7x:2x2x1
jax: 0.10.0
libtpu: 0.0.40
codegen_flags: <defaults>
</compile_context>

<pallas_src>
import jax
import jax.numpy as jnp
from jax.experimental import pallas as pl
from jax.experimental.pallas import tpu as pltpu

VMEM = pl.BlockSpec(memory_space=pltpu.MemorySpace.VMEM)
_EPS = 1e-5


# --------------------------------- kernel ---------------------------------- #

def _fused_lstm_kernel(xc_ref, c1w_ref, c2w_ref, c3w_ref, w0p_ref, wrec_ref,
                       linw_ref, outw_ref, vec_ref, o_ref, gx0_ref):
    """Whole eval-mode forward pass in one kernel; everything stays in VMEM.

    vec_ref rows: 0:b0(ifog->ifog-reordered, combined)  1:b1  2:normLSTM scale
                  3:normLSTM shift  4:lin_b(+normLin)  5:out_b
                  6:conv1_b  7:conv2_b  8:conv3_b  (each zero-padded to 4H lanes)
    """
    f32 = jnp.float32
    B = o_ref.shape[0]
    K = c3w_ref.shape[0]
    C1 = c1w_ref.shape[1]
    C2 = c2w_ref.shape[1]
    C3 = c3w_ref.shape[2]
    H = wrec_ref.shape[0]
    G = 4 * H
    T = gx0_ref.shape[1]
    A = C3 // T

    def dot32(a, b):
        return jnp.dot(a, b, preferred_element_type=f32)

    # ---- conv1: im2col LHS pre-built in the wrapper -> ONE batch-merged matmul
    BL1 = xc_ref.shape[0]
    L1 = BL1 // B
    P1 = L1 // 2
    y = jnp.maximum(dot32(xc_ref[...], c1w_ref[...]) + vec_ref[6, :C1][None, :], 0.0)
    y = y.reshape(B * P1, 2, C1)                       # MaxPool1d(2); L1 is even
    h1m = jnp.maximum(y[:, 0, :], y[:, 1, :])          # (B*P1, C1), batch-major rows
    # Dropout(p=0.4) is identity in eval mode.

    # ---- conv2: per-batch im2col (128-lane-aligned concat) -> one matmul each
    L2 = P1 - K + 1
    P2 = L2 // 2
    c2w = c2w_ref[...]
    h2 = []
    for b in range(B):
        hb = h1m[b * P1:(b + 1) * P1, :]               # (P1, C1)
        cols = jnp.concatenate([hb[k:k + L2, :] for k in range(K)], axis=1)
        yb = jnp.maximum(dot32(cols, c2w) + vec_ref[7, :C2][None, :], 0.0)
        yb = yb.reshape(P2, 2, C2)
        h2.append(jnp.maximum(yb[:, 0, :], yb[:, 1, :]))   # (P2, C2)

    # ---- conv3: per-batch K-tap accumulation (pieces are 64 lanes wide, so the
    #      unaligned-concat im2col variant is avoided on purpose)
    L3 = P2 - K + 1
    pooled = []
    for b in range(B):
        acc = dot32(h2[b][0:L3, :], c3w_ref[0])
        for k in range(1, K):
            acc = acc + dot32(h2[b][k:k + L3, :], c3w_ref[k])
        yb = jnp.maximum(acc + vec_ref[8, :C3][None, :], 0.0)      # (L3, C3)
        yb = yb[:2 * T, :].reshape(T, 2, C3)
        pooled.append(jnp.maximum(yb[:, 0, :], yb[:, 1, :]))       # (T, C3)

    # ---- LSTM layer-0 input projection for the WHOLE sequence.
    # PyTorch's flat .view() between conv3 and the LSTM interleaves channel and
    # time; that interleave is folded into w0p so that a lane-broadcast
    # multiply-add over the T conv time positions plus a block-sum over channel
    # groups yields every step's gate pre-activation (no MXU issue, no
    # zero-padded weight).  b0 is the combined, gate-reordered layer-0 bias.
    b0 = vec_ref[0, :][None, :]
    for b in range(B):
        pt = jnp.transpose(pooled[b])                  # (C3, T)
        gsum = pt[:, 0:1] * w0p_ref[0]
        for l in range(1, T):
            gsum = gsum + pt[:, l:l + 1] * w0p_ref[l]  # (C3, G)
        gx0_ref[b] = jnp.sum(gsum.reshape(T, A, G), axis=1) + b0   # (T, G)

    # ---- 2-layer LSTM recurrence (gate blocks pre-permuted to i,f,o,g)
    whh0 = wrec_ref[:, 0:G]
    wih1 = wrec_ref[:, G:2 * G]
    whh1 = wrec_ref[:, 2 * G:3 * G]
    b1 = vec_ref[1, :][None, :]

    def cell(g, c):
        s = jax.nn.sigmoid(g[:, :3 * H])               # i | f | o in one slab
        gg = jnp.tanh(g[:, 3 * H:])
        c_new = s[:, H:2 * H] * c + s[:, :H] * gg
        return s[:, 2 * H:3 * H] * jnp.tanh(c_new), c_new

    h0 = jnp.zeros((B, H), f32)
    c0 = jnp.zeros((B, H), f32)
    h0_seq = []
    for t in range(T):                                 # static, short sequence
        h0, c0 = cell(gx0_ref[:, t, :] + dot32(h0, whh0), c0)
        h0_seq.append(h0)

    h1 = jnp.zeros((B, H), f32)
    c1 = jnp.zeros((B, H), f32)
    for t in range(T):
        g1 = dot32(h0_seq[t], wih1) + dot32(h1, whh1) + b1
        h1, c1 = cell(g1, c1)

    # ---- head: normLSTM -> ReLU -> Linear(+normLin folded) -> output -> log_softmax
    z = h1 * vec_ref[2, :H][None, :] + vec_ref[3, :H][None, :]
    z = jnp.maximum(z, 0.0)
    z = dot32(z, linw_ref[...]) + vec_ref[4, :linw_ref.shape[1]][None, :]
    z = dot32(z, outw_ref[...]) + vec_ref[5, :outw_ref.shape[1]][None, :]
    m = jnp.max(z, axis=1, keepdims=True)
    e = jnp.exp(z - m)
    o_ref[...] = (z - m) - jnp.log(jnp.sum(e, axis=1, keepdims=True))


# ------------------------------- call glue --------------------------------- #

def _conv_out_len(l, k):
    return (l - k + 1) // 2


@jax.jit
def forward(x, params):
    """x: (B, L, D), exactly the PyTorch module's forward input."""
    B, L, D = x.shape
    K = params['c1w'].shape[0] // D
    T = params['w0p'].shape[0]
    G = params['w0p'].shape[2]
    OUT = params['out_w'].shape[1]
    assert _conv_out_len(_conv_out_len(_conv_out_len(L, K), K), K) == T, \
        "params were built for a different sequence length"

    # PyTorch: X.view(B, D, L) is a flat reshape; the channels-last transpose and
    # the conv-1 im2col are pure layout plumbing, hoisted into the XLA wrapper.
    x_cl = x.reshape(B, D, L).transpose(0, 2, 1)       # (B, L, D) channels-last
    L1 = L - K + 1
    xcols = jnp.concatenate([x_cl[:, k:k + L1, :] for k in range(K)], axis=2)
    xcols = xcols.reshape(B * L1, K * D)               # batch-merged im2col LHS

    return pl.pallas_call(
        _fused_lstm_kernel,
        out_shape=jax.ShapeDtypeStruct((B, OUT), jnp.float32),
        in_specs=[VMEM] * 9,
        out_specs=VMEM,
        scratch_shapes=[pltpu.VMEM((B, T, G), jnp.float32)],
    )(xcols, params['c1w'], params['c2w'], params['c3w'], params['w0p'],
      params['wrec'], params['lin_w'], params['out_w'], params['vecs'])


# --------------------------- parameter handling ----------------------------- #

def _uniform(key, shape, fan_in):
    bound = 1.0 / (float(fan_in) ** 0.5)
    return jax.random.uniform(key, shape, jnp.float32, -bound, bound)


def init_raw_params(key, input_dim):
    """Parameters in PyTorch layouts (eval mode: BN running stats included)."""
    H1, H2, H3, LH, LIN, OUT, K = 128, 64, 32, 64, 64, 8, 5
    keys = iter(jax.random.split(key, 64))
    nk = lambda: next(keys)
    p = {}

    def conv(cin, cout):
        return (_uniform(nk(), (cout, cin, K), cin * K),
                _uniform(nk(), (cout,), cin * K))

    def bn(c):
        gamma = 1.0 + 0.1 * jax.random.uniform(nk(), (c,), jnp.float32, -1.0, 1.0)
        beta = 0.1 * jax.random.uniform(nk(), (c,), jnp.float32, -1.0, 1.0)
        mean = 0.1 * jax.random.uniform(nk(), (c,), jnp.float32, -1.0, 1.0)
        var = 1.0 + 0.1 * jax.random.uniform(nk(), (c,), jnp.float32, 0.0, 1.0)
        return (gamma, beta, mean, var)

    p['conv1_w'], p['conv1_b'] = conv(input_dim, H1); p['bn1'] = bn(H1)
    p['conv2_w'], p['conv2_b'] = conv(H1, H2);        p['bn2'] = bn(H2)
    p['conv3_w'], p['conv3_b'] = conv(H2, H3);        p['bn3'] = bn(H3)

    def lstm(cin):
        return (_uniform(nk(), (4 * LH, cin), LH), _uniform(nk(), (4 * LH, LH), LH),
                _uniform(nk(), (4 * LH,), LH), _uniform(nk(), (4 * LH,), LH))

    p['wih_l0'], p['whh_l0'], p['bih_l0'], p['bhh_l0'] = lstm(H3)
    p['wih_l1'], p['whh_l1'], p['bih_l1'], p['bhh_l1'] = lstm(LH)
    p['normLSTM'] = bn(LH)
    p['lin_w'] = _uniform(nk(), (LIN, LH), LH)
    p['lin_b'] = _uniform(nk(), (LIN,), LH)
    p['normLin'] = bn(LIN)
    p['out_w'] = _uniform(nk(), (OUT, LIN), LIN)
    p['out_b'] = _uniform(nk(), (OUT,), LIN)
    return p


def _bn_fold(gamma, beta, mean, var, eps=_EPS):
    scale = gamma * jax.lax.rsqrt(var + eps)
    return scale, beta - mean * scale


def prepare_params(raw, seq_len):
    """Compile-time refactor: fold eval-mode BN into conv / linear weights, build
    matmul-friendly (im2col / combined / gate-reordered) layouts, fold PyTorch's
    flat .view() into the layer-0 broadcast weight, pack 1-D vectors into one slab."""
    K = raw['conv1_w'].shape[2]
    T = _conv_out_len(_conv_out_len(_conv_out_len(seq_len, K), K), K)
    C3 = raw['conv3_w'].shape[0]
    H = raw['whh_l0'].shape[1]
    G = 4 * H
    assert C3 % T == 0, "layer-0 view fold requires conv3 channels % seq_len == 0"
    A = C3 // T

    p = {}
    conv_b = {}
    for i in (1, 2, 3):
        s, t = _bn_fold(*raw[f'bn{i}'])
        w = jnp.transpose(raw[f'conv{i}_w'], (2, 1, 0)) * s[None, None, :]  # (K,Cin,Cout)
        conv_b[i] = raw[f'conv{i}_b'] * s + t
        if i == 3:
            p['c3w'] = w                                   # tap-accumulation layout
        else:
            p[f'c{i}w'] = w.reshape(-1, w.shape[2])        # im2col layout (K*Cin, Cout)

    def reorder(v, axis):
        i_, f_, g_, o_ = jnp.split(v, 4, axis=axis)        # PyTorch (i,f,g,o)
        return jnp.concatenate([i_, f_, o_, g_], axis=axis)  # -> (i,f,o,g)

    # layer-0 input weight with the channel/time-interleaving .view() folded in:
    # w0p[l, c, :] = Wih0^T[(c % A) * T + l, :]
    wih0T = reorder(raw['wih_l0'].T, 1)                    # (C3, G)
    c_idx = jnp.arange(C3)
    p['w0p'] = jnp.stack([wih0T[(c_idx % A) * T + l, :] for l in range(T)], axis=0)

    p['wrec'] = jnp.concatenate([reorder(raw['whh_l0'].T, 1),
                                 reorder(raw['wih_l1'].T, 1),
                                 reorder(raw['whh_l1'].T, 1)], axis=1)      # (H, 3G)

    b0 = reorder(raw['bih_l0'] + raw['bhh_l0'], 0)
    b1 = reorder(raw['bih_l1'] + raw['bhh_l1'], 0)

    sL, tL = _bn_fold(*raw['normLSTM'])
    s2, t2 = _bn_fold(*raw['normLin'])
    p['lin_w'] = raw['lin_w'].T * s2[None, :]              # normLin folded into Linear
    lin_b = raw['lin_b'] * s2 + t2
    p['out_w'] = raw['out_w'].T

    pad = lambda v: jnp.pad(v, (0, G - v.shape[0]))
    p['vecs'] = jnp.stack([pad(b0), pad(b1), pad(sL), pad(tL), pad(lin_b),
                           pad(raw['out_b']), pad(conv_b[1]), pad(conv_b[2]),
                           pad(conv_b[3])], axis=0)        # (9, G) lane-dense slab
    return p


# ----------------------- pure-XLA reference (for checking) ------------------ #

def reference_forward(x, raw):
    """Eval-mode forward with plain jnp ops, mirroring the PyTorch module."""
    B, L, D = x.shape
    h = x.reshape(B, D, L)                                 # X.view(B, D, L)

    def bn_ncl(y, gamma, beta, mean, var):
        inv = jax.lax.rsqrt(var + _EPS)
        return (y - mean[None, :, None]) * (gamma * inv)[None, :, None] + beta[None, :, None]

    for i in (1, 2, 3):
        w, b = raw[f'conv{i}_w'], raw[f'conv{i}_b']
        K = w.shape[2]
        Lout = h.shape[2] - K + 1
        y = jnp.zeros((B, w.shape[0], Lout), jnp.float32)
        for k in range(K):
            y = y + jnp.einsum('bcl,oc->bol', h[:, :, k:k + Lout], w[:, :, k])
        y = y + b[None, :, None]
        y = jnp.maximum(bn_ncl(y, *raw[f'bn{i}']), 0.0)
        Lp = y.shape[2] // 2
        h = jnp.max(y[:, :, :2 * Lp].reshape(B, y.shape[1], Lp, 2), axis=3)

    lstm_in = h.reshape(B, h.shape[2], h.shape[1])         # PyTorch flat .view on NCL
    Hh = raw['whh_l0'].shape[1]

    def cell(xt, h_, c_, wih, whh, bih, bhh):
        g = xt @ wih.T + h_ @ whh.T + bih + bhh
        i = jax.nn.sigmoid(g[:, :Hh]); f = jax.nn.sigmoid(g[:, Hh:2 * Hh])
        gg = jnp.tanh(g[:, 2 * Hh:3 * Hh]); o = jax.nn.sigmoid(g[:, 3 * Hh:])
        c_ = f * c_ + i * gg
        return o * jnp.tanh(c_), c_

    h0 = c0 = h1 = c1 = jnp.zeros((B, Hh), jnp.float32)
    for t in range(lstm_in.shape[1]):
        h0, c0 = cell(lstm_in[:, t], h0, c0, raw['wih_l0'], raw['whh_l0'],
                      raw['bih_l0'], raw['bhh_l0'])
        h1, c1 = cell(h0, h1, c1, raw['wih_l1'], raw['whh_l1'],
                      raw['bih_l1'], raw['bhh_l1'])

    def bn_vec(v, gamma, beta, mean, var):
        return (v - mean) * (gamma * jax.lax.rsqrt(var + _EPS)) + beta

    z = jnp.maximum(bn_vec(h1, *raw['normLSTM']), 0.0)
    z = z @ raw['lin_w'].T + raw['lin_b']
    z = bn_vec(z, *raw['normLin'])
    z = z @ raw['out_w'].T + raw['out_b']
    return jax.nn.log_softmax(z, axis=1)


# ----------------------------------- main ----------------------------------- #

if __name__ == "__main__":
    B, L, D = 2, 64, 4          # seq length 64 -> conv/pool stack -> T=4 LSTM steps
    key = jax.random.PRNGKey(0)
    kx, kp = jax.random.split(key)
    x = jax.random.normal(kx, (B, L, D), dtype=jnp.float32)

    raw = init_raw_params(kp, D)
    params = prepare_params(raw, L)

    out = jax.block_until_ready(forward(x, params))

    assert out.shape == (B, 8)
    row_sums = jnp.exp(out).sum(axis=1)                    # log_softmax rows sum to 1
    assert bool(jnp.all(jnp.abs(row_sums - 1.0) < 1e-4))

    with jax.default_matmul_precision('highest'):          # accurate f32 reference
        ref = reference_forward(x, raw)
    err = float(jnp.max(jnp.abs(out - ref)))
    assert err < 1e-3, err                                  # tightened vs. 5e-2

    print("KERNEL_OK")
</pallas_src>

<mosaic_0001>
module attributes {stable_mosaic.version = 11 : i64} {
  func.func @_fused_lstm_kernel(%arg0: memref<120x20xf32, #tpu.memory_space<vmem>>, %arg1: memref<20x128xf32, #tpu.memory_space<vmem>>, %arg2: memref<640x64xf32, #tpu.memory_space<vmem>>, %arg3: memref<5x64x32xf32, #tpu.memory_space<vmem>>, %arg4: memref<4x32x256xf32, #tpu.memory_space<vmem>>, %arg5: memref<64x768xf32, #tpu.memory_space<vmem>>, %arg6: memref<64x64xf32, #tpu.memory_space<vmem>>, %arg7: memref<64x8xf32, #tpu.memory_space<vmem>>, %arg8: memref<9x256xf32, #tpu.memory_space<vmem>>, %arg9: memref<2x8xf32, #tpu.memory_space<vmem>>, %arg10: memref<2x4x256xf32, #tpu.memory_space<vmem>>) attributes {dimension_semantics = [], scalar_prefetch = 0 : i64, scratch_operands = 1 : i64, tpu.core_type = #tpu.core_type<tc>} {
    %c0 = arith.constant 0 : index
    %c0_0 = arith.constant 0 : index
    %0 = vector.load %arg0[%c0, %c0_0] : memref<120x20xf32, #tpu.memory_space<vmem>>, vector<120x20xf32>
    %c0_1 = arith.constant 0 : index
    %c0_2 = arith.constant 0 : index
    %1 = vector.load %arg1[%c0_1, %c0_2] : memref<20x128xf32, #tpu.memory_space<vmem>>, vector<20x128xf32>
    %cst = arith.constant dense<0.000000e+00> : vector<120x128xf32>
    %2 = tpu.matmul %0, %1, %cst {dimension_numbers = #tpu.dot_dimension_numbers<[1], [0], [0], [1], [0, 0, 1, 1], [], []>} : vector<120x20xf32>, vector<20x128xf32>, vector<120x128xf32> -> vector<120x128xf32>
    %c6 = arith.constant 6 : index
    %c0_3 = arith.constant 0 : index
    %3 = vector.load %arg8[%c6, %c0_3] : memref<9x256xf32, #tpu.memory_space<vmem>>, vector<1x128xf32>
    %4 = vector.shape_cast %3 : vector<1x128xf32> to vector<128xf32>
    %5 = vector.shape_cast %4 : vector<128xf32> to vector<1x128xf32>
    %6 = vector.broadcast %5 : vector<1x128xf32> to vector<120x128xf32>
    %7 = arith.addf %2, %6 : vector<120x128xf32>
    %cst_4 = arith.constant 0.000000e+00 : f32
    %8 = vector.broadcast %cst_4 : f32 to vector<120x128xf32>
    %9 = arith.maximumf %7, %8 : vector<120x128xf32>
    %10 = vector.shape_cast %9 : vector<120x128xf32> to vector<60x2x128xf32>
    %11 = vector.extract_strided_slice %10 {offsets = [0, 0, 0], sizes = [60, 1, 128], strides = [1, 1, 1]} : vector<60x2x128xf32> to vector<60x1x128xf32>
    %12 = vector.shape_cast %11 : vector<60x1x128xf32> to vector<60x128xf32>
    %13 = vector.extract_strided_slice %10 {offsets = [0, 1, 0], sizes = [60, 1, 128], strides = [1, 1, 1]} : vector<60x2x128xf32> to vector<60x1x128xf32>
    %14 = vector.shape_cast %13 : vector<60x1x128xf32> to vector<60x128xf32>
    %15 = arith.maximumf %12, %14 : vector<60x128xf32>
    %c0_5 = arith.constant 0 : index
    %c0_6 = arith.constant 0 : index
    %16 = vector.load %arg2[%c0_5, %c0_6] : memref<640x64xf32, #tpu.memory_space<vmem>>, vector<640x64xf32>
    %17 = vector.extract_strided_slice %15 {offsets = [0, 0], sizes = [30, 128], strides = [1, 1]} : vector<60x128xf32> to vector<30x128xf32>
    %18 = vector.extract_strided_slice %17 {offsets = [0, 0], sizes = [26, 128], strides = [1, 1]} : vector<30x128xf32> to vector<26x128xf32>
    %19 = vector.extract_strided_slice %17 {offsets = [1, 0], sizes = [26, 128], strides = [1, 1]} : vector<30x128xf32> to vector<26x128xf32>
    %20 = vector.extract_strided_slice %17 {offsets = [2, 0], sizes = [26, 128], strides = [1, 1]} : vector<30x128xf32> to vector<26x128xf32>
    %21 = vector.extract_strided_slice %17 {offsets = [3, 0], sizes = [26, 128], strides = [1, 1]} : vector<30x128xf32> to vector<26x128xf32>
    %22 = vector.extract_strided_slice %17 {offsets = [4, 0], sizes = [26, 128], strides = [1, 1]} : vector<30x128xf32> to vector<26x128xf32>
    %23 = tpu.concatenate %18, %19, %20, %21, %22 in 1 : vector<26x128xf32>, vector<26x128xf32>, vector<26x128xf32>, vector<26x128xf32>, vector<26x128xf32> -> vector<26x640xf32>
    %cst_7 = arith.constant dense<0.000000e+00> : vector<26x64xf32>
    %24 = tpu.matmul %23, %16, %cst_7 {dimension_numbers = #tpu.dot_dimension_numbers<[1], [0], [0], [1], [0, 0, 1, 1], [], []>} : vector<26x640xf32>, vector<640x64xf32>, vector<26x64xf32> -> vector<26x64xf32>
    %c7 = arith.constant 7 : index
    %c0_8 = arith.constant 0 : index
    %25 = vector.load %arg8[%c7, %c0_8] : memref<9x256xf32, #tpu.memory_space<vmem>>, vector<1x64xf32>
    %26 = vector.shape_cast %25 : vector<1x64xf32> to vector<64xf32>
    %27 = vector.shape_cast %26 : vector<64xf32> to vector<1x64xf32>
    %28 = vector.broadcast %27 : vector<1x64xf32> to vector<26x64xf32>
    %29 = arith.addf %24, %28 : vector<26x64xf32>
    %cst_9 = arith.constant 0.000000e+00 : f32
    %30 = vector.broadcast %cst_9 : f32 to vector<26x64xf32>
    %31 = arith.maximumf %29, %30 : vector<26x64xf32>
    %32 = vector.shape_cast %31 : vector<26x64xf32> to vector<13x2x64xf32>
    %33 = vector.extract_strided_slice %32 {offsets = [0, 0, 0], sizes = [13, 1, 64], strides = [1, 1, 1]} : vector<13x2x64xf32> to vector<13x1x64xf32>
    %34 = vector.shape_cast %33 : vector<13x1x64xf32> to vector<13x64xf32>
    %35 = vector.extract_strided_slice %32 {offsets = [0, 1, 0], sizes = [13, 1, 64], strides = [1, 1, 1]} : vector<13x2x64xf32> to vector<13x1x64xf32>
    %36 = vector.shape_cast %35 : vector<13x1x64xf32> to vector<13x64xf32>
    %37 = arith.maximumf %34, %36 : vector<13x64xf32>
    %38 = vector.extract_strided_slice %15 {offsets = [30, 0], sizes = [30, 128], strides = [1, 1]} : vector<60x128xf32> to vector<30x128xf32>
    %39 = vector.extract_strided_slice %38 {offsets = [0, 0], sizes = [26, 128], strides = [1, 1]} : vector<30x128xf32> to vector<26x128xf32>
    %40 = vector.extract_strided_slice %38 {offsets = [1, 0], sizes = [26, 128], strides = [1, 1]} : vector<30x128xf32> to vector<26x128xf32>
    %41 = vector.extract_strided_slice %38 {offsets = [2, 0], sizes = [26, 128], strides = [1, 1]} : vector<30x128xf32> to vector<26x128xf32>
    %42 = vector.extract_strided_slice %38 {offsets = [3, 0], sizes = [26, 128], strides = [1, 1]} : vector<30x128xf32> to vector<26x128xf32>
    %43 = vector.extract_strided_slice %38 {offsets = [4, 0], sizes = [26, 128], strides = [1, 1]} : vector<30x128xf32> to vector<26x128xf32>
    %44 = tpu.concatenate %39, %40, %41, %42, %43 in 1 : vector<26x128xf32>, vector<26x128xf32>, vector<26x128xf32>, vector<26x128xf32>, vector<26x128xf32> -> vector<26x640xf32>
    %cst_10 = arith.constant dense<0.000000e+00> : vector<26x64xf32>
    %45 = tpu.matmul %44, %16, %cst_10 {dimension_numbers = #tpu.dot_dimension_numbers<[1], [0], [0], [1], [0, 0, 1, 1], [], []>} : vector<26x640xf32>, vector<640x64xf32>, vector<26x64xf32> -> vector<26x64xf32>
    %c7_11 = arith.constant 7 : index
    %c0_12 = arith.constant 0 : index
    %46 = vector.load %arg8[%c7_11, %c0_12] : memref<9x256xf32, #tpu.memory_space<vmem>>, vector<1x64xf32>
    %47 = vector.shape_cast %46 : vector<1x64xf32> to vector<64xf32>
    %48 = vector.shape_cast %47 : vector<64xf32> to vector<1x64xf32>
    %49 = vector.broadcast %48 : vector<1x64xf32> to vector<26x64xf32>
    %50 = arith.addf %45, %49 : vector<26x64xf32>
    %cst_13 = arith.constant 0.000000e+00 : f32
    %51 = vector.broadcast %cst_13 : f32 to vector<26x64xf32>
    %52 = arith.maximumf %50, %51 : vector<26x64xf32>
    %53 = vector.shape_cast %52 : vector<26x64xf32> to vector<13x2x64xf32>
    %54 = vector.extract_strided_slice %53 {offsets = [0, 0, 0], sizes = [13, 1, 64], strides = [1, 1, 1]} : vector<13x2x64xf32> to vector<13x1x64xf32>
    %55 = vector.shape_cast %54 : vector<13x1x64xf32> to vector<13x64xf32>
    %56 = vector.extract_strided_slice %53 {offsets = [0, 1, 0], sizes = [13, 1, 64], strides = [1, 1, 1]} : vector<13x2x64xf32> to vector<13x1x64xf32>
    %57 = vector.shape_cast %56 : vector<13x1x64xf32> to vector<13x64xf32>
    %58 = arith.maximumf %55, %57 : vector<13x64xf32>
    %59 = vector.extract_strided_slice %37 {offsets = [0, 0], sizes = [9, 64], strides = [1, 1]} : vector<13x64xf32> to vector<9x64xf32>
    %c0_14 = arith.constant 0 : index
    %c0_15 = arith.constant 0 : index
    %c0_16 = arith.constant 0 : index
    %60 = vector.load %arg3[%c0_14, %c0_15, %c0_16] : memref<5x64x32xf32, #tpu.memory_space<vmem>>, vector<1x64x32xf32>
    %61 = vector.shape_cast %60 : vector<1x64x32xf32> to vector<64x32xf32>
    %cst_17 = arith.constant dense<0.000000e+00> : vector<9x32xf32>
    %62 = tpu.matmul %59, %61, %cst_17 {dimension_numbers = #tpu.dot_dimension_numbers<[1], [0], [0], [1], [0, 0, 1, 1], [], []>} : vector<9x64xf32>, vector<64x32xf32>, vector<9x32xf32> -> vector<9x32xf32>
    %63 = vector.extract_strided_slice %37 {offsets = [1, 0], sizes = [9, 64], strides = [1, 1]} : vector<13x64xf32> to vector<9x64xf32>
    %c1 = arith.constant 1 : index
    %c0_18 = arith.constant 0 : index
    %c0_19 = arith.constant 0 : index
    %64 = vector.load %arg3[%c1, %c0_18, %c0_19] : memref<5x64x32xf32, #tpu.memory_space<vmem>>, vector<1x64x32xf32>
    %65 = vector.shape_cast %64 : vector<1x64x32xf32> to vector<64x32xf32>
    %cst_20 = arith.constant dense<0.000000e+00> : vector<9x32xf32>
    %66 = tpu.matmul %63, %65, %cst_20 {dimension_numbers = #tpu.dot_dimension_numbers<[1], [0], [0], [1], [0, 0, 1, 1], [], []>} : vector<9x64xf32>, vector<64x32xf32>, vector<9x32xf32> -> vector<9x32xf32>
    %67 = arith.addf %62, %66 : vector<9x32xf32>
    %68 = vector.extract_strided_slice %37 {offsets = [2, 0], sizes = [9, 64], strides = [1, 1]} : vector<13x64xf32> to vector<9x64xf32>
    %c2 = arith.constant 2 : index
    %c0_21 = arith.constant 0 : index
    %c0_22 = arith.constant 0 : index
    %69 = vector.load %arg3[%c2, %c0_21, %c0_22] : memref<5x64x32xf32, #tpu.memory_space<vmem>>, vector<1x64x32xf32>
    %70 = vector.shape_cast %69 : vector<1x64x32xf32> to vector<64x32xf32>
    %cst_23 = arith.constant dense<0.000000e+00> : vector<9x32xf32>
    %71 = tpu.matmul %68, %70, %cst_23 {dimension_numbers = #tpu.dot_dimension_numbers<[1], [0], [0], [1], [0, 0, 1, 1], [], []>} : vector<9x64xf32>, vector<64x32xf32>, vector<9x32xf32> -> vector<9x32xf32>
    %72 = arith.addf %67, %71 : vector<9x32xf32>
    %73 = vector.extract_strided_slice %37 {offsets = [3, 0], sizes = [9, 64], strides = [1, 1]} : vector<13x64xf32> to vector<9x64xf32>
    %c3 = arith.constant 3 : index
    %c0_24 = arith.constant 0 : index
    %c0_25 = arith.constant 0 : index
    %74 = vector.load %arg3[%c3, %c0_24, %c0_25] : memref<5x64x32xf32, #tpu.memory_space<vmem>>, vector<1x64x32xf32>
    %75 = vector.shape_cast %74 : vector<1x64x32xf32> to vector<64x32xf32>
    %cst_26 = arith.constant dense<0.000000e+00> : vector<9x32xf32>
    %76 = tpu.matmul %73, %75, %cst_26 {dimension_numbers = #tpu.dot_dimension_numbers<[1], [0], [0], [1], [0, 0, 1, 1], [], []>} : vector<9x64xf32>, vector<64x32xf32>, vector<9x32xf32> -> vector<9x32xf32>
    %77 = arith.addf %72, %76 : vector<9x32xf32>
    %78 = vector.extract_strided_slice %37 {offsets = [4, 0], sizes = [9, 64], strides = [1, 1]} : vector<13x64xf32> to vector<9x64xf32>
    %c4 = arith.constant 4 : index
    %c0_27 = arith.constant 0 : index
    %c0_28 = arith.constant 0 : index
    %79 = vector.load %arg3[%c4, %c0_27, %c0_28] : memref<5x64x32xf32, #tpu.memory_space<vmem>>, vector<1x64x32xf32>
    %80 = vector.shape_cast %79 : vector<1x64x32xf32> to vector<64x32xf32>
    %cst_29 = arith.constant dense<0.000000e+00> : vector<9x32xf32>
    %81 = tpu.matmul %78, %80, %cst_29 {dimension_numbers = #tpu.dot_dimension_numbers<[1], [0], [0], [1], [0, 0, 1, 1], [], []>} : vector<9x64xf32>, vector<64x32xf32>, vector<9x32xf32> -> vector<9x32xf32>
    %82 = arith.addf %77, %81 : vector<9x32xf32>
    %c8 = arith.constant 8 : index
    %c0_30 = arith.constant 0 : index
    %83 = vector.load %arg8[%c8, %c0_30] : memref<9x256xf32, #tpu.memory_space<vmem>>, vector<1x32xf32>
    %84 = vector.shape_cast %83 : vector<1x32xf32> to vector<32xf32>
    %85 = vector.shape_cast %84 : vector<32xf32> to vector<1x32xf32>
    %86 = vector.broadcast %85 : vector<1x32xf32> to vector<9x32xf32>
    %87 = arith.addf %82, %86 : vector<9x32xf32>
    %cst_31 = arith.constant 0.000000e+00 : f32
    %88 = vector.broadcast %cst_31 : f32 to vector<9x32xf32>
    %89 = arith.maximumf %87, %88 : vector<9x32xf32>
    %90 = vector.extract_strided_slice %89 {offsets = [0, 0], sizes = [8, 32], strides = [1, 1]} : vector<9x32xf32> to vector<8x32xf32>
    %91 = vector.shape_cast %90 : vector<8x32xf32> to vector<4x2x32xf32>
    %92 = vector.extract_strided_slice %91 {offsets = [0, 0, 0], sizes = [4, 1, 32], strides = [1, 1, 1]} : vector<4x2x32xf32> to vector<4x1x32xf32>
    %93 = vector.shape_cast %92 : vector<4x1x32xf32> to vector<4x32xf32>
    %94 = vector.extract_strided_slice %91 {offsets = [0, 1, 0], sizes = [4, 1, 32], strides = [1, 1, 1]} : vector<4x2x32xf32> to vector<4x1x32xf32>
    %95 = vector.shape_cast %94 : vector<4x1x32xf32> to vector<4x32xf32>
    %96 = arith.maximumf %93, %95 : vector<4x32xf32>
    %97 = vector.extract_strided_slice %58 {offsets = [0, 0], sizes = [9, 64], strides = [1, 1]} : vector<13x64xf32> to vector<9x64xf32>
    %c0_32 = arith.constant 0 : index
    %c0_33 = arith.constant 0 : index
    %c0_34 = arith.constant 0 : index
    %98 = vector.load %arg3[%c0_32, %c0_33, %c0_34] : memref<5x64x32xf32, #tpu.memory_space<vmem>>, vector<1x64x32xf32>
    %99 = vector.shape_cast %98 : vector<1x64x32xf32> to vector<64x32xf32>
    %cst_35 = arith.constant dense<0.000000e+00> : vector<9x32xf32>
    %100 = tpu.matmul %97, %99, %cst_35 {dimension_numbers = #tpu.dot_dimension_numbers<[1], [0], [0], [1], [0, 0, 1, 1], [], []>} : vector<9x64xf32>, vector<64x32xf32>, vector<9x32xf32> -> vector<9x32xf32>
    %101 = vector.extract_strided_slice %58 {offsets = [1, 0], sizes = [9, 64], strides = [1, 1]} : vector<13x64xf32> to vector<9x64xf32>
    %c1_36 = arith.constant 1 : index
    %c0_37 = arith.constant 0 : index
    %c0_38 = arith.constant 0 : index
    %102 = vector.load %arg3[%c1_36, %c0_37, %c0_38] : memref<5x64x32xf32, #tpu.memory_space<vmem>>, vector<1x64x32xf32>
    %103 = vector.shape_cast %102 : vector<1x64x32xf32> to vector<64x32xf32>
    %cst_39 = arith.constant dense<0.000000e+00> : vector<9x32xf32>
    %104 = tpu.matmul %101, %103, %cst_39 {dimension_numbers = #tpu.dot_dimension_numbers<[1], [0], [0], [1], [0, 0, 1, 1], [], []>} : vector<9x64xf32>, vector<64x32xf32>, vector<9x32xf32> -> vector<9x32xf32>
    %105 = arith.addf %100, %104 : vector<9x32xf32>
    %106 = vector.extract_strided_slice %58 {offsets = [2, 0], sizes = [9, 64], strides = [1, 1]} : vector<13x64xf32> to vector<9x64xf32>
    %c2_40 = arith.constant 2 : index
    %c0_41 = arith.constant 0 : index
    %c0_42 = arith.constant 0 : index
    %107 = vector.load %arg3[%c2_40, %c0_41, %c0_42] : memref<5x64x32xf32, #tpu.memory_space<vmem>>, vector<1x64x32xf32>
    %108 = vector.shape_cast %107 : vector<1x64x32xf32> to vector<64x32xf32>
    %cst_43 = arith.constant dense<0.000000e+00> : vector<9x32xf32>
    %109 = tpu.matmul %106, %108, %cst_43 {dimension_numbers = #tpu.dot_dimension_numbers<[1], [0], [0], [1], [0, 0, 1, 1], [], []>} : vector<9x64xf32>, vector<64x32xf32>, vector<9x32xf32> -> vector<9x32xf32>
    %110 = arith.addf %105, %109 : vector<9x32xf32>
    %111 = vector.extract_strided_slice %58 {offsets = [3, 0], sizes = [9, 64], strides = [1, 1]} : vector<13x64xf32> to vector<9x64xf32>
    %c3_44 = arith.constant 3 : index
    %c0_45 = arith.constant 0 : index
    %c0_46 = arith.constant 0 : index
    %112 = vector.load %arg3[%c3_44, %c0_45, %c0_46] : memref<5x64x32xf32, #tpu.memory_space<vmem>>, vector<1x64x32xf32>
    %113 = vector.shape_cast %112 : vector<1x64x32xf32> to vector<64x32xf32>
    %cst_47 = arith.constant dense<0.000000e+00> : vector<9x32xf32>
    %114 = tpu.matmul %111, %113, %cst_47 {dimension_numbers = #tpu.dot_dimension_numbers<[1], [0], [0], [1], [0, 0, 1, 1], [], []>} : vector<9x64xf32>, vector<64x32xf32>, vector<9x32xf32> -> vector<9x32xf32>
    %115 = arith.addf %110, %114 : vector<9x32xf32>
    %116 = vector.extract_strided_slice %58 {offsets = [4, 0], sizes = [9, 64], strides = [1, 1]} : vector<13x64xf32> to vector<9x64xf32>
    %c4_48 = arith.constant 4 : index
    %c0_49 = arith.constant 0 : index
    %c0_50 = arith.constant 0 : index
    %117 = vector.load %arg3[%c4_48, %c0_49, %c0_50] : memref<5x64x32xf32, #tpu.memory_space<vmem>>, vector<1x64x32xf32>
    %118 = vector.shape_cast %117 : vector<1x64x32xf32> to vector<64x32xf32>
    %cst_51 = arith.constant dense<0.000000e+00> : vector<9x32xf32>
    %119 = tpu.matmul %116, %118, %cst_51 {dimension_numbers = #tpu.dot_dimension_numbers<[1], [0], [0], [1], [0, 0, 1, 1], [], []>} : vector<9x64xf32>, vector<64x32xf32>, vector<9x32xf32> -> vector<9x32xf32>
    %120 = arith.addf %115, %119 : vector<9x32xf32>
    %c8_52 = arith.constant 8 : index
    %c0_53 = arith.constant 0 : index
    %121 = vector.load %arg8[%c8_52, %c0_53] : memref<9x256xf32, #tpu.memory_space<vmem>>, vector<1x32xf32>
    %122 = vector.shape_cast %121 : vector<1x32xf32> to vector<32xf32>
    %123 = vector.shape_cast %122 : vector<32xf32> to vector<1x32xf32>
    %124 = vector.broadcast %123 : vector<1x32xf32> to vector<9x32xf32>
    %125 = arith.addf %120, %124 : vector<9x32xf32>
    %cst_54 = arith.constant 0.000000e+00 : f32
    %126 = vector.broadcast %cst_54 : f32 to vector<9x32xf32>
    %127 = arith.maximumf %125, %126 : vector<9x32xf32>
    %128 = vector.extract_strided_slice %127 {offsets = [0, 0], sizes = [8, 32], strides = [1, 1]} : vector<9x32xf32> to vector<8x32xf32>
    %129 = vector.shape_cast %128 : vector<8x32xf32> to vector<4x2x32xf32>
    %130 = vector.extract_strided_slice %129 {offsets = [0, 0, 0], sizes = [4, 1, 32], strides = [1, 1, 1]} : vector<4x2x32xf32> to vector<4x1x32xf32>
    %131 = vector.shape_cast %130 : vector<4x1x32xf32> to vector<4x32xf32>
    %132 = vector.extract_strided_slice %129 {offsets = [0, 1, 0], sizes = [4, 1, 32], strides = [1, 1, 1]} : vector<4x2x32xf32> to vector<4x1x32xf32>
    %133 = vector.shape_cast %132 : vector<4x1x32xf32> to vector<4x32xf32>
    %134 = arith.maximumf %131, %133 : vector<4x32xf32>
    %c0_55 = arith.constant 0 : index
    %c0_56 = arith.constant 0 : index
    %135 = vector.load %arg8[%c0_55, %c0_56] : memref<9x256xf32, #tpu.memory_space<vmem>>, vector<1x256xf32>
    %136 = vector.shape_cast %135 : vector<1x256xf32> to vector<256xf32>
    %137 = vector.shape_cast %136 : vector<256xf32> to vector<1x256xf32>
    %138 = tpu.transpose %96, [1, 0] : vector<4x32xf32> -> vector<32x4xf32>
    %139 = vector.extract_strided_slice %138 {offsets = [0, 0], sizes = [32, 1], strides = [1, 1]} : vector<32x4xf32> to vector<32x1xf32>
    %c0_57 = arith.constant 0 : index
    %c0_58 = arith.constant 0 : index
    %c0_59 = arith.constant 0 : index
    %140 = vector.load %arg4[%c0_57, %c0_58, %c0_59] : memref<4x32x256xf32, #tpu.memory_space<vmem>>, vector<1x32x256xf32>
    %141 = vector.shape_cast %140 : vector<1x32x256xf32> to vector<32x256xf32>
    %142 = vector.broadcast %139 : vector<32x1xf32> to vector<32x256xf32>
    %143 = arith.mulf %142, %141 : vector<32x256xf32>
    %144 = vector.extract_strided_slice %138 {offsets = [0, 1], sizes = [32, 1], strides = [1, 1]} : vector<32x4xf32> to vector<32x1xf32>
    %c1_60 = arith.constant 1 : index
    %c0_61 = arith.constant 0 : index
    %c0_62 = arith.constant 0 : index
    %145 = vector.load %arg4[%c1_60, %c0_61, %c0_62] : memref<4x32x256xf32, #tpu.memory_space<vmem>>, vector<1x32x256xf32>
    %146 = vector.shape_cast %145 : vector<1x32x256xf32> to vector<32x256xf32>
    %147 = vector.broadcast %144 : vector<32x1xf32> to vector<32x256xf32>
    %148 = arith.mulf %147, %146 : vector<32x256xf32>
    %149 = arith.addf %143, %148 : vector<32x256xf32>
    %150 = vector.extract_strided_slice %138 {offsets = [0, 2], sizes = [32, 1], strides = [1, 1]} : vector<32x4xf32> to vector<32x1xf32>
    %c2_63 = arith.constant 2 : index
    %c0_64 = arith.constant 0 : index
    %c0_65 = arith.constant 0 : index
    %151 = vector.load %arg4[%c2_63, %c0_64, %c0_65] : memref<4x32x256xf32, #tpu.memory_space<vmem>>, vector<1x32x256xf32>
    %152 = vector.shape_cast %151 : vector<1x32x256xf32> to vector<32x256xf32>
    %153 = vector.broadcast %150 : vector<32x1xf32> to vector<32x256xf32>
    %154 = arith.mulf %153, %152 : vector<32x256xf32>
    %155 = arith.addf %149, %154 : vector<32x256xf32>
    %156 = vector.extract_strided_slice %138 {offsets = [0, 3], sizes = [32, 1], strides = [1, 1]} : vector<32x4xf32> to vector<32x1xf32>
    %c3_66 = arith.constant 3 : index
    %c0_67 = arith.constant 0 : index
    %c0_68 = arith.constant 0 : index
    %157 = vector.load %arg4[%c3_66, %c0_67, %c0_68] : memref<4x32x256xf32, #tpu.memory_space<vmem>>, vector<1x32x256xf32>
    %158 = vector.shape_cast %157 : vector<1x32x256xf32> to vector<32x256xf32>
    %159 = vector.broadcast %156 : vector<32x1xf32> to vector<32x256xf32>
    %160 = arith.mulf %159, %158 : vector<32x256xf32>
    %161 = arith.addf %155, %160 : vector<32x256xf32>
    %162 = vector.shape_cast %161 : vector<32x256xf32> to vector<4x8x256xf32>
    %cst_69 = arith.constant dense<0.000000e+00> : vector<4x256xf32>
    %163 = vector.multi_reduction <add>, %162, %cst_69 [1] : vector<4x8x256xf32> to vector<4x256xf32>
    %164 = vector.broadcast %137 : vector<1x256xf32> to vector<4x256xf32>
    %165 = arith.addf %163, %164 : vector<4x256xf32>
    %c0_70 = arith.constant 0 : index
    %c0_71 = arith.constant 0 : index
    %c0_72 = arith.constant 0 : index
    %166 = vector.load %arg10[%c0_70, %c0_71, %c0_72] : memref<2x4x256xf32, #tpu.memory_space<vmem>>, vector<1x4x256xf32>
    %167 = vector.shape_cast %166 : vector<1x4x256xf32> to vector<4x256xf32>
    %168 = vector.shape_cast %165 : vector<4x256xf32> to vector<1x4x256xf32>
    tpu.vector_store %arg10[%c0_70, %c0_71, %c0_72], %168 {strides = array<i32>} : memref<2x4x256xf32, #tpu.memory_space<vmem>>, vector<1x4x256xf32>,
    %169 = tpu.transpose %134, [1, 0] : vector<4x32xf32> -> vector<32x4xf32>
    %170 = vector.extract_strided_slice %169 {offsets = [0, 0], sizes = [32, 1], strides = [1, 1]} : vector<32x4xf32> to vector<32x1xf32>
    %c0_73 = arith.constant 0 : index
    %c0_74 = arith.constant 0 : index
    %c0_75 = arith.constant 0 : index
    %171 = vector.load %arg4[%c0_73, %c0_74, %c0_75] : memref<4x32x256xf32, #tpu.memory_space<vmem>>, vector<1x32x256xf32>
    %172 = vector.shape_cast %171 : vector<1x32x256xf32> to vector<32x256xf32>
    %173 = vector.broadcast %170 : vector<32x1xf32> to vector<32x256xf32>
    %174 = arith.mulf %173, %172 : vector<32x256xf32>
    %175 = vector.extract_strided_slice %169 {offsets = [0, 1], sizes = [32, 1], strides = [1, 1]} : vector<32x4xf32> to vector<32x1xf32>
    %c1_76 = arith.constant 1 : index
    %c0_77 = arith.constant 0 : index
    %c0_78 = arith.constant 0 : index
    %176 = vector.load %arg4[%c1_76, %c0_77, %c0_78] : memref<4x32x256xf32, #tpu.memory_space<vmem>>, vector<1x32x256xf32>
    %177 = vector.shape_cast %176 : vector<1x32x256xf32> to vector<32x256xf32>
    %178 = vector.broadcast %175 : vector<32x1xf32> to vector<32x256xf32>
    %179 = arith.mulf %178, %177 : vector<32x256xf32>
    %180 = arith.addf %174, %179 : vector<32x256xf32>
    %181 = vector.extract_strided_slice %169 {offsets = [0, 2], sizes = [32, 1], strides = [1, 1]} : vector<32x4xf32> to vector<32x1xf32>
    %c2_79 = arith.constant 2 : index
    %c0_80 = arith.constant 0 : index
    %c0_81 = arith.constant 0 : index
    %182 = vector.load %arg4[%c2_79, %c0_80, %c0_81] : memref<4x32x256xf32, #tpu.memory_space<vmem>>, vector<1x32x256xf32>
    %183 = vector.shape_cast %182 : vector<1x32x256xf32> to vector<32x256xf32>
    %184 = vector.broadcast %181 : vector<32x1xf32> to vector<32x256xf32>
    %185 = arith.mulf %184, %183 : vector<32x256xf32>
    %186 = arith.addf %180, %185 : vector<32x256xf32>
    %187 = vector.extract_strided_slice %169 {offsets = [0, 3], sizes = [32, 1], strides = [1, 1]} : vector<32x4xf32> to vector<32x1xf32>
    %c3_82 = arith.constant 3 : index
    %c0_83 = arith.constant 0 : index
    %c0_84 = arith.constant 0 : index
    %188 = vector.load %arg4[%c3_82, %c0_83, %c0_84] : memref<4x32x256xf32, #tpu.memory_space<vmem>>, vector<1x32x256xf32>
    %189 = vector.shape_cast %188 : vector<1x32x256xf32> to vector<32x256xf32>
    %190 = vector.broadcast %187 : vector<32x1xf32> to vector<32x256xf32>
    %191 = arith.mulf %190, %189 : vector<32x256xf32>
    %192 = arith.addf %186, %191 : vector<32x256xf32>
    %193 = vector.shape_cast %192 : vector<32x256xf32> to vector<4x8x256xf32>
    %cst_85 = arith.constant dense<0.000000e+00> : vector<4x256xf32>
    %194 = vector.multi_reduction <add>, %193, %cst_85 [1] : vector<4x8x256xf32> to vector<4x256xf32>
    %195 = vector.broadcast %137 : vector<1x256xf32> to vector<4x256xf32>
    %196 = arith.addf %194, %195 : vector<4x256xf32>
    %c1_86 = arith.constant 1 : index
    %c0_87 = arith.constant 0 : index
    %c0_88 = arith.constant 0 : index
    %197 = vector.load %arg10[%c1_86, %c0_87, %c0_88] : memref<2x4x256xf32, #tpu.memory_space<vmem>>, vector<1x4x256xf32>
    %198 = vector.shape_cast %197 : vector<1x4x256xf32> to vector<4x256xf32>
    %199 = vector.shape_cast %196 : vector<4x256xf32> to vector<1x4x256xf32>
    tpu.vector_store %arg10[%c1_86, %c0_87, %c0_88], %199 {strides = array<i32>} : memref<2x4x256xf32, #tpu.memory_space<vmem>>, vector<1x4x256xf32>,
    %c0_89 = arith.constant 0 : index
    %c0_90 = arith.constant 0 : index
    %200 = vector.load %arg5[%c0_89, %c0_90] : memref<64x768xf32, #tpu.memory_space<vmem>>, vector<64x256xf32>
    %c0_91 = arith.constant 0 : index
    %c256 = arith.constant 256 : index
    %201 = vector.load %arg5[%c0_91, %c256] : memref<64x768xf32, #tpu.memory_space<vmem>>, vector<64x256xf32>
    %c0_92 = arith.constant 0 : index
    %c512 = arith.constant 512 : index
    %202 = vector.load %arg5[%c0_92, %c512] : memref<64x768xf32, #tpu.memory_space<vmem>>, vector<64x256xf32>
    %c1_93 = arith.constant 1 : index
    %c0_94 = arith.constant 0 : index
    %203 = vector.load %arg8[%c1_93, %c0_94] : memref<9x256xf32, #tpu.memory_space<vmem>>, vector<1x256xf32>
    %204 = vector.shape_cast %203 : vector<1x256xf32> to vector<256xf32>
    %205 = vector.shape_cast %204 : vector<256xf32> to vector<1x256xf32>
    %cst_95 = arith.constant 0.000000e+00 : f32
    %206 = vector.broadcast %cst_95 : f32 to vector<2x64xf32>
    %cst_96 = arith.constant 0.000000e+00 : f32
    %207 = vector.broadcast %cst_96 : f32 to vector<2x64xf32>
    %c0_97 = arith.constant 0 : index
    %c0_98 = arith.constant 0 : index
    %c0_99 = arith.constant 0 : index
    %208 = vector.load %arg10[%c0_97, %c0_98, %c0_99] : memref<2x4x256xf32, #tpu.memory_space<vmem>>, vector<2x1x256xf32>
    %209 = vector.shape_cast %208 : vector<2x1x256xf32> to vector<2x256xf32>
    %cst_100 = arith.constant dense<0.000000e+00> : vector<2x256xf32>
    %210 = tpu.matmul %206, %200, %cst_100 {dimension_numbers = #tpu.dot_dimension_numbers<[1], [0], [0], [1], [0, 0, 1, 1], [], []>} : vector<2x64xf32>, vector<64x256xf32>, vector<2x256xf32> -> vector<2x256xf32>
    %211 = arith.addf %209, %210 : vector<2x256xf32>
    %212 = vector.extract_strided_slice %211 {offsets = [0, 0], sizes = [2, 192], strides = [1, 1]} : vector<2x256xf32> to vector<2x192xf32>
    %213 = arith.negf %212 : vector<2x192xf32>
    %214 = math.exp %213 : vector<2x192xf32>
    %cst_101 = arith.constant 1.000000e+00 : f32
    %215 = vector.broadcast %cst_101 : f32 to vector<2x192xf32>
    %216 = arith.addf %215, %214 : vector<2x192xf32>
    %217 = arith.divf %215, %216 : vector<2x192xf32>
    %218 = vector.extract_strided_slice %211 {offsets = [0, 192], sizes = [2, 64], strides = [1, 1]} : vector<2x256xf32> to vector<2x64xf32>
    %219 = math.tanh %218 : vector<2x64xf32>
    %220 = vector.extract_strided_slice %217 {offsets = [0, 64], sizes = [2, 64], strides = [1, 1]} : vector<2x192xf32> to vector<2x64xf32>
    %221 = arith.mulf %220, %207 : vector<2x64xf32>
    %222 = vector.extract_strided_slice %217 {offsets = [0, 0], sizes = [2, 64], strides = [1, 1]} : vector<2x192xf32> to vector<2x64xf32>
    %223 = arith.mulf %222, %219 : vector<2x64xf32>
    %224 = arith.addf %221, %223 : vector<2x64xf32>
    %225 = vector.extract_strided_slice %217 {offsets = [0, 128], sizes = [2, 64], strides = [1, 1]} : vector<2x192xf32> to vector<2x64xf32>
    %226 = math.tanh %224 : vector<2x64xf32>
    %227 = arith.mulf %225, %226 : vector<2x64xf32>
    %c0_102 = arith.constant 0 : index
    %c1_103 = arith.constant 1 : index
    %c0_104 = arith.constant 0 : index
    %228 = vector.load %arg10[%c0_102, %c1_103, %c0_104] : memref<2x4x256xf32, #tpu.memory_space<vmem>>, vector<2x1x256xf32>
    %229 = vector.shape_cast %228 : vector<2x1x256xf32> to vector<2x256xf32>
    %cst_105 = arith.constant dense<0.000000e+00> : vector<2x256xf32>
    %230 = tpu.matmul %227, %200, %cst_105 {dimension_numbers = #tpu.dot_dimension_numbers<[1], [0], [0], [1], [0, 0, 1, 1], [], []>} : vector<2x64xf32>, vector<64x256xf32>, vector<2x256xf32> -> vector<2x256xf32>
    %231 = arith.addf %229, %230 : vector<2x256xf32>
    %232 = vector.extract_strided_slice %231 {offsets = [0, 0], sizes = [2, 192], strides = [1, 1]} : vector<2x256xf32> to vector<2x192xf32>
    %233 = arith.negf %232 : vector<2x192xf32>
    %234 = math.exp %233 : vector<2x192xf32>
    %cst_106 = arith.constant 1.000000e+00 : f32
    %235 = vector.broadcast %cst_106 : f32 to vector<2x192xf32>
    %236 = arith.addf %235, %234 : vector<2x192xf32>
    %237 = arith.divf %235, %236 : vector<2x192xf32>
    %238 = vector.extract_strided_slice %231 {offsets = [0, 192], sizes = [2, 64], strides = [1, 1]} : vector<2x256xf32> to vector<2x64xf32>
    %239 = math.tanh %238 : vector<2x64xf32>
    %240 = vector.extract_strided_slice %237 {offsets = [0, 64], sizes = [2, 64], strides = [1, 1]} : vector<2x192xf32> to vector<2x64xf32>
    %241 = arith.mulf %240, %224 : vector<2x64xf32>
    %242 = vector.extract_strided_slice %237 {offsets = [0, 0], sizes = [2, 64], strides = [1, 1]} : vector<2x192xf32> to vector<2x64xf32>
    %243 = arith.mulf %242, %239 : vector<2x64xf32>
    %244 = arith.addf %241, %243 : vector<2x64xf32>
    %245 = vector.extract_strided_slice %237 {offsets = [0, 128], sizes = [2, 64], strides = [1, 1]} : vector<2x192xf32> to vector<2x64xf32>
    %246 = math.tanh %244 : vector<2x64xf32>
    %247 = arith.mulf %245, %246 : vector<2x64xf32>
    %c0_107 = arith.constant 0 : index
    %c2_108 = arith.constant 2 : index
    %c0_109 = arith.constant 0 : index
    %248 = vector.load %arg10[%c0_107, %c2_108, %c0_109] : memref<2x4x256xf32, #tpu.memory_space<vmem>>, vector<2x1x256xf32>
    %249 = vector.shape_cast %248 : vector<2x1x256xf32> to vector<2x256xf32>
    %cst_110 = arith.constant dense<0.000000e+00> : vector<2x256xf32>
    %250 = tpu.matmul %247, %200, %cst_110 {dimension_numbers = #tpu.dot_dimension_numbers<[1], [0], [0], [1], [0, 0, 1, 1], [], []>} : vector<2x64xf32>, vector<64x256xf32>, vector<2x256xf32> -> vector<2x256xf32>
    %251 = arith.addf %249, %250 : vector<2x256xf32>
    %252 = vector.extract_strided_slice %251 {offsets = [0, 0], sizes = [2, 192], strides = [1, 1]} : vector<2x256xf32> to vector<2x192xf32>
    %253 = arith.negf %252 : vector<2x192xf32>
    %254 = math.exp %253 : vector<2x192xf32>
    %cst_111 = arith.constant 1.000000e+00 : f32
    %255 = vector.broadcast %cst_111 : f32 to vector<2x192xf32>
    %256 = arith.addf %255, %254 : vector<2x192xf32>
    %257 = arith.divf %255, %256 : vector<2x192xf32>
    %258 = vector.extract_strided_slice %251 {offsets = [0, 192], sizes = [2, 64], strides = [1, 1]} : vector<2x256xf32> to vector<2x64xf32>
    %259 = math.tanh %258 : vector<2x64xf32>
    %260 = vector.extract_strided_slice %257 {offsets = [0, 64], sizes = [2, 64], strides = [1, 1]} : vector<2x192xf32> to vector<2x64xf32>
    %261 = arith.mulf %260, %244 : vector<2x64xf32>
    %262 = vector.extract_strided_slice %257 {offsets = [0, 0], sizes = [2, 64], strides = [1, 1]} : vector<2x192xf32> to vector<2x64xf32>
    %263 = arith.mulf %262, %259 : vector<2x64xf32>
    %264 = arith.addf %261, %263 : vector<2x64xf32>
    %265 = vector.extract_strided_slice %257 {offsets = [0, 128], sizes = [2, 64], strides = [1, 1]} : vector<2x192xf32> to vector<2x64xf32>
    %266 = math.tanh %264 : vector<2x64xf32>
    %267 = arith.mulf %265, %266 : vector<2x64xf32>
    %c0_112 = arith.constant 0 : index
    %c3_113 = arith.constant 3 : index
    %c0_114 = arith.constant 0 : index
    %268 = vector.load %arg10[%c0_112, %c3_113, %c0_114] : memref<2x4x256xf32, #tpu.memory_space<vmem>>, vector<2x1x256xf32>
    %269 = vector.shape_cast %268 : vector<2x1x256xf32> to vector<2x256xf32>
    %cst_115 = arith.constant dense<0.000000e+00> : vector<2x256xf32>
    %270 = tpu.matmul %267, %200, %cst_115 {dimension_numbers = #tpu.dot_dimension_numbers<[1], [0], [0], [1], [0, 0, 1, 1], [], []>} : vector<2x64xf32>, vector<64x256xf32>, vector<2x256xf32> -> vector<2x256xf32>
    %271 = arith.addf %269, %270 : vector<2x256xf32>
    %272 = vector.extract_strided_slice %271 {offsets = [0, 0], sizes = [2, 192], strides = [1, 1]} : vector<2x256xf32> to vector<2x192xf32>
    %273 = arith.negf %272 : vector<2x192xf32>
    %274 = math.exp %273 : vector<2x192xf32>
    %cst_116 = arith.constant 1.000000e+00 : f32
    %275 = vector.broadcast %cst_116 : f32 to vector<2x192xf32>
    %276 = arith.addf %275, %274 : vector<2x192xf32>
    %277 = arith.divf %275, %276 : vector<2x192xf32>
    %278 = vector.extract_strided_slice %271 {offsets = [0, 192], sizes = [2, 64], strides = [1, 1]} : vector<2x256xf32> to vector<2x64xf32>
    %279 = math.tanh %278 : vector<2x64xf32>
    %280 = vector.extract_strided_slice %277 {offsets = [0, 64], sizes = [2, 64], strides = [1, 1]} : vector<2x192xf32> to vector<2x64xf32>
    %281 = arith.mulf %280, %264 : vector<2x64xf32>
    %282 = vector.extract_strided_slice %277 {offsets = [0, 0], sizes = [2, 64], strides = [1, 1]} : vector<2x192xf32> to vector<2x64xf32>
    %283 = arith.mulf %282, %279 : vector<2x64xf32>
    %284 = arith.addf %281, %283 : vector<2x64xf32>
    %285 = vector.extract_strided_slice %277 {offsets = [0, 128], sizes = [2, 64], strides = [1, 1]} : vector<2x192xf32> to vector<2x64xf32>
    %286 = math.tanh %284 : vector<2x64xf32>
    %287 = arith.mulf %285, %286 : vector<2x64xf32>
    %cst_117 = arith.constant 0.000000e+00 : f32
    %288 = vector.broadcast %cst_117 : f32 to vector<2x64xf32>
    %cst_118 = arith.constant 0.000000e+00 : f32
    %289 = vector.broadcast %cst_118 : f32 to vector<2x64xf32>
    %cst_119 = arith.constant dense<0.000000e+00> : vector<2x256xf32>
    %290 = tpu.matmul %227, %201, %cst_119 {dimension_numbers = #tpu.dot_dimension_numbers<[1], [0], [0], [1], [0, 0, 1, 1], [], []>} : vector<2x64xf32>, vector<64x256xf32>, vector<2x256xf32> -> vector<2x256xf32>
    %cst_120 = arith.constant dense<0.000000e+00> : vector<2x256xf32>
    %291 = tpu.matmul %288, %202, %cst_120 {dimension_numbers = #tpu.dot_dimension_numbers<[1], [0], [0], [1], [0, 0, 1, 1], [], []>} : vector<2x64xf32>, vector<64x256xf32>, vector<2x256xf32> -> vector<2x256xf32>
    %292 = arith.addf %290, %291 : vector<2x256xf32>
    %293 = vector.broadcast %205 : vector<1x256xf32> to vector<2x256xf32>
    %294 = arith.addf %292, %293 : vector<2x256xf32>
    %295 = vector.extract_strided_slice %294 {offsets = [0, 0], sizes = [2, 192], strides = [1, 1]} : vector<2x256xf32> to vector<2x192xf32>
    %296 = arith.negf %295 : vector<2x192xf32>
    %297 = math.exp %296 : vector<2x192xf32>
    %cst_121 = arith.constant 1.000000e+00 : f32
    %298 = vector.broadcast %cst_121 : f32 to vector<2x192xf32>
    %299 = arith.addf %298, %297 : vector<2x192xf32>
    %300 = arith.divf %298, %299 : vector<2x192xf32>
    %301 = vector.extract_strided_slice %294 {offsets = [0, 192], sizes = [2, 64], strides = [1, 1]} : vector<2x256xf32> to vector<2x64xf32>
    %302 = math.tanh %301 : vector<2x64xf32>
    %303 = vector.extract_strided_slice %300 {offsets = [0, 64], sizes = [2, 64], strides = [1, 1]} : vector<2x192xf32> to vector<2x64xf32>
    %304 = arith.mulf %303, %289 : vector<2x64xf32>
    %305 = vector.extract_strided_slice %300 {offsets = [0, 0], sizes = [2, 64], strides = [1, 1]} : vector<2x192xf32> to vector<2x64xf32>
    %306 = arith.mulf %305, %302 : vector<2x64xf32>
    %307 = arith.addf %304, %306 : vector<2x64xf32>
    %308 = vector.extract_strided_slice %300 {offsets = [0, 128], sizes = [2, 64], strides = [1, 1]} : vector<2x192xf32> to vector<2x64xf32>
    %309 = math.tanh %307 : vector<2x64xf32>
    %310 = arith.mulf %308, %309 : vector<2x64xf32>
    %cst_122 = arith.constant dense<0.000000e+00> : vector<2x256xf32>
    %311 = tpu.matmul %247, %201, %cst_122 {dimension_numbers = #tpu.dot_dimension_numbers<[1], [0], [0], [1], [0, 0, 1, 1], [], []>} : vector<2x64xf32>, vector<64x256xf32>, vector<2x256xf32> -> vector<2x256xf32>
    %cst_123 = arith.constant dense<0.000000e+00> : vector<2x256xf32>
    %312 = tpu.matmul %310, %202, %cst_123 {dimension_numbers = #tpu.dot_dimension_numbers<[1], [0], [0], [1], [0, 0, 1, 1], [], []>} : vector<2x64xf32>, vector<64x256xf32>, vector<2x256xf32> -> vector<2x256xf32>
    %313 = arith.addf %311, %312 : vector<2x256xf32>
    %314 = vector.broadcast %205 : vector<1x256xf32> to vector<2x256xf32>
    %315 = arith.addf %313, %314 : vector<2x256xf32>
    %316 = vector.extract_strided_slice %315 {offsets = [0, 0], sizes = [2, 192], strides = [1, 1]} : vector<2x256xf32> to vector<2x192xf32>
    %317 = arith.negf %316 : vector<2x192xf32>
    %318 = math.exp %317 : vector<2x192xf32>
    %cst_124 = arith.constant 1.000000e+00 : f32
    %319 = vector.broadcast %cst_124 : f32 to vector<2x192xf32>
    %320 = arith.addf %319, %318 : vector<2x192xf32>
    %321 = arith.divf %319, %320 : vector<2x192xf32>
    %322 = vector.extract_strided_slice %315 {offsets = [0, 192], sizes = [2, 64], strides = [1, 1]} : vector<2x256xf32> to vector<2x64xf32>
    %323 = math.tanh %322 : vector<2x64xf32>
    %324 = vector.extract_strided_slice %321 {offsets = [0, 64], sizes = [2, 64], strides = [1, 1]} : vector<2x192xf32> to vector<2x64xf32>
    %325 = arith.mulf %324, %307 : vector<2x64xf32>
    %326 = vector.extract_strided_slice %321 {offsets = [0, 0], sizes = [2, 64], strides = [1, 1]} : vector<2x192xf32> to vector<2x64xf32>
    %327 = arith.mulf %326, %323 : vector<2x64xf32>
    %328 = arith.addf %325, %327 : vector<2x64xf32>
    %329 = vector.extract_strided_slice %321 {offsets = [0, 128], sizes = [2, 64], strides = [1, 1]} : vector<2x192xf32> to vector<2x64xf32>
    %330 = math.tanh %328 : vector<2x64xf32>
    %331 = arith.mulf %329, %330 : vector<2x64xf32>
    %cst_125 = arith.constant dense<0.000000e+00> : vector<2x256xf32>
    %332 = tpu.matmul %267, %201, %cst_125 {dimension_numbers = #tpu.dot_dimension_numbers<[1], [0], [0], [1], [0, 0, 1, 1], [], []>} : vector<2x64xf32>, vector<64x256xf32>, vector<2x256xf32> -> vector<2x256xf32>
    %cst_126 = arith.constant dense<0.000000e+00> : vector<2x256xf32>
    %333 = tpu.matmul %331, %202, %cst_126 {dimension_numbers = #tpu.dot_dimension_numbers<[1], [0], [0], [1], [0, 0, 1, 1], [], []>} : vector<2x64xf32>, vector<64x256xf32>, vector<2x256xf32> -> vector<2x256xf32>
    %334 = arith.addf %332, %333 : vector<2x256xf32>
    %335 = vector.broadcast %205 : vector<1x256xf32> to vector<2x256xf32>
    %336 = arith.addf %334, %335 : vector<2x256xf32>
    %337 = vector.extract_strided_slice %336 {offsets = [0, 0], sizes = [2, 192], strides = [1, 1]} : vector<2x256xf32> to vector<2x192xf32>
    %338 = arith.negf %337 : vector<2x192xf32>
    %339 = math.exp %338 : vector<2x192xf32>
    %cst_127 = arith.constant 1.000000e+00 : f32
    %340 = vector.broadcast %cst_127 : f32 to vector<2x192xf32>
    %341 = arith.addf %340, %339 : vector<2x192xf32>
    %342 = arith.divf %340, %341 : vector<2x192xf32>
    %343 = vector.extract_strided_slice %336 {offsets = [0, 192], sizes = [2, 64], strides = [1, 1]} : vector<2x256xf32> to vector<2x64xf32>
    %344 = math.tanh %343 : vector<2x64xf32>
    %345 = vector.extract_strided_slice %342 {offsets = [0, 64], sizes = [2, 64], strides = [1, 1]} : vector<2x192xf32> to vector<2x64xf32>
    %346 = arith.mulf %345, %328 : vector<2x64xf32>
    %347 = vector.extract_strided_slice %342 {offsets = [0, 0], sizes = [2, 64], strides = [1, 1]} : vector<2x192xf32> to vector<2x64xf32>
    %348 = arith.mulf %347, %344 : vector<2x64xf32>
    %349 = arith.addf %346, %348 : vector<2x64xf32>
    %350 = vector.extract_strided_slice %342 {offsets = [0, 128], sizes = [2, 64], strides = [1, 1]} : vector<2x192xf32> to vector<2x64xf32>
    %351 = math.tanh %349 : vector<2x64xf32>
    %352 = arith.mulf %350, %351 : vector<2x64xf32>
    %cst_128 = arith.constant dense<0.000000e+00> : vector<2x256xf32>
    %353 = tpu.matmul %287, %201, %cst_128 {dimension_numbers = #tpu.dot_dimension_numbers<[1], [0], [0], [1], [0, 0, 1, 1], [], []>} : vector<2x64xf32>, vector<64x256xf32>, vector<2x256xf32> -> vector<2x256xf32>
    %cst_129 = arith.constant dense<0.000000e+00> : vector<2x256xf32>
    %354 = tpu.matmul %352, %202, %cst_129 {dimension_numbers = #tpu.dot_dimension_numbers<[1], [0], [0], [1], [0, 0, 1, 1], [], []>} : vector<2x64xf32>, vector<64x256xf32>, vector<2x256xf32> -> vector<2x256xf32>
    %355 = arith.addf %353, %354 : vector<2x256xf32>
    %356 = vector.broadcast %205 : vector<1x256xf32> to vector<2x256xf32>
    %357 = arith.addf %355, %356 : vector<2x256xf32>
    %358 = vector.extract_strided_slice %357 {offsets = [0, 0], sizes = [2, 192], strides = [1, 1]} : vector<2x256xf32> to vector<2x192xf32>
    %359 = arith.negf %358 : vector<2x192xf32>
    %360 = math.exp %359 : vector<2x192xf32>
    %cst_130 = arith.constant 1.000000e+00 : f32
    %361 = vector.broadcast %cst_130 : f32 to vector<2x192xf32>
    %362 = arith.addf %361, %360 : vector<2x192xf32>
    %363 = arith.divf %361, %362 : vector<2x192xf32>
    %364 = vector.extract_strided_slice %357 {offsets = [0, 192], sizes = [2, 64], strides = [1, 1]} : vector<2x256xf32> to vector<2x64xf32>
    %365 = math.tanh %364 : vector<2x64xf32>
    %366 = vector.extract_strided_slice %363 {offsets = [0, 64], sizes = [2, 64], strides = [1, 1]} : vector<2x192xf32> to vector<2x64xf32>
    %367 = arith.mulf %366, %349 : vector<2x64xf32>
    %368 = vector.extract_strided_slice %363 {offsets = [0, 0], sizes = [2, 64], strides = [1, 1]} : vector<2x192xf32> to vector<2x64xf32>
    %369 = arith.mulf %368, %365 : vector<2x64xf32>
    %370 = arith.addf %367, %369 : vector<2x64xf32>
    %371 = vector.extract_strided_slice %363 {offsets = [0, 128], sizes = [2, 64], strides = [1, 1]} : vector<2x192xf32> to vector<2x64xf32>
    %372 = math.tanh %370 : vector<2x64xf32>
    %373 = arith.mulf %371, %372 : vector<2x64xf32>
    %c2_131 = arith.constant 2 : index
    %c0_132 = arith.constant 0 : index
    %374 = vector.load %arg8[%c2_131, %c0_132] : memref<9x256xf32, #tpu.memory_space<vmem>>, vector<1x64xf32>
    %375 = vector.shape_cast %374 : vector<1x64xf32> to vector<64xf32>
    %376 = vector.shape_cast %375 : vector<64xf32> to vector<1x64xf32>
    %377 = vector.broadcast %376 : vector<1x64xf32> to vector<2x64xf32>
    %378 = arith.mulf %373, %377 : vector<2x64xf32>
    %c3_133 = arith.constant 3 : index
    %c0_134 = arith.constant 0 : index
    %379 = vector.load %arg8[%c3_133, %c0_134] : memref<9x256xf32, #tpu.memory_space<vmem>>, vector<1x64xf32>
    %380 = vector.shape_cast %379 : vector<1x64xf32> to vector<64xf32>
    %381 = vector.shape_cast %380 : vector<64xf32> to vector<1x64xf32>
    %382 = vector.broadcast %381 : vector<1x64xf32> to vector<2x64xf32>
    %383 = arith.addf %378, %382 : vector<2x64xf32>
    %cst_135 = arith.constant 0.000000e+00 : f32
    %384 = vector.broadcast %cst_135 : f32 to vector<2x64xf32>
    %385 = arith.maximumf %383, %384 : vector<2x64xf32>
    %c0_136 = arith.constant 0 : index
    %c0_137 = arith.constant 0 : index
    %386 = vector.load %arg6[%c0_136, %c0_137] : memref<64x64xf32, #tpu.memory_space<vmem>>, vector<64x64xf32>
    %cst_138 = arith.constant dense<0.000000e+00> : vector<2x64xf32>
    %387 = tpu.matmul %385, %386, %cst_138 {dimension_numbers = #tpu.dot_dimension_numbers<[1], [0], [0], [1], [0, 0, 1, 1], [], []>} : vector<2x64xf32>, vector<64x64xf32>, vector<2x64xf32> -> vector<2x64xf32>
    %c4_139 = arith.constant 4 : index
    %c0_140 = arith.constant 0 : index
    %388 = vector.load %arg8[%c4_139, %c0_140] : memref<9x256xf32, #tpu.memory_space<vmem>>, vector<1x64xf32>
    %389 = vector.shape_cast %388 : vector<1x64xf32> to vector<64xf32>
    %390 = vector.shape_cast %389 : vector<64xf32> to vector<1x64xf32>
    %391 = vector.broadcast %390 : vector<1x64xf32> to vector<2x64xf32>
    %392 = arith.addf %387, %391 : vector<2x64xf32>
    %c0_141 = arith.constant 0 : index
    %c0_142 = arith.constant 0 : index
    %393 = vector.load %arg7[%c0_141, %c0_142] : memref<64x8xf32, #tpu.memory_space<vmem>>, vector<64x8xf32>
    %cst_143 = arith.constant dense<0.000000e+00> : vector<2x8xf32>
    %394 = tpu.matmul %392, %393, %cst_143 {dimension_numbers = #tpu.dot_dimension_numbers<[1], [0], [0], [1], [0, 0, 1, 1], [], []>} : vector<2x64xf32>, vector<64x8xf32>, vector<2x8xf32> -> vector<2x8xf32>
    %c5 = arith.constant 5 : index
    %c0_144 = arith.constant 0 : index
    %395 = vector.load %arg8[%c5, %c0_144] : memref<9x256xf32, #tpu.memory_space<vmem>>, vector<1x8xf32>
    %396 = vector.shape_cast %395 : vector<1x8xf32> to vector<8xf32>
    %397 = vector.shape_cast %396 : vector<8xf32> to vector<1x8xf32>
    %398 = vector.broadcast %397 : vector<1x8xf32> to vector<2x8xf32>
    %399 = arith.addf %394, %398 : vector<2x8xf32>
    %cst_145 = arith.constant dense<0xFF800000> : vector<2xf32>
    %400 = vector.multi_reduction <maximumf>, %399, %cst_145 [1] : vector<2x8xf32> to vector<2xf32>
    %401 = vector.shape_cast %400 : vector<2xf32> to vector<2x1xf32>
    %402 = vector.broadcast %401 : vector<2x1xf32> to vector<2x8xf32>
    %403 = arith.subf %399, %402 : vector<2x8xf32>
    %404 = math.exp %403 : vector<2x8xf32>
    %405 = vector.broadcast %401 : vector<2x1xf32> to vector<2x8xf32>
    %406 = arith.subf %399, %405 : vector<2x8xf32>
    %cst_146 = arith.constant dense<0.000000e+00> : vector<2xf32>
    %407 = vector.multi_reduction <add>, %404, %cst_146 [1] : vector<2x8xf32> to vector<2xf32>
    %408 = vector.shape_cast %407 : vector<2xf32> to vector<2x1xf32>
    %409 = math.log %408 : vector<2x1xf32>
    %410 = vector.broadcast %409 : vector<2x1xf32> to vector<2x8xf32>
    %411 = arith.subf %406, %410 : vector<2x8xf32>
    %c0_147 = arith.constant 0 : index
    %c0_148 = arith.constant 0 : index
    %412 = vector.load %arg9[%c0_147, %c0_148] : memref<2x8xf32, #tpu.memory_space<vmem>>, vector<2x8xf32>
    tpu.vector_store %arg9[%c0_147, %c0_148], %411 {strides = array<i32>} : memref<2x8xf32, #tpu.memory_space<vmem>>, vector<2x8xf32>,
    return
  }
}

</mosaic_0001>

<bundles_post_ra>
// kernel: forward.1
= control target key start
LH: loop header
LB: loop body
LE: loop exit
PB: predicated region body
PF: predicated region fallthrough
CT: control target
= control target key end

     0   :  { %v9903_v2 = vmov 0.0|0.0   ;;  %vm7346_vm0 = vmmov 0   ;;  %v9905_v4 = vmov 0.0   ;;  %vm98_vm1 = vcmask 1043456   ;;  %s9893_s0 = inlined_call_operand.vmem [shape: f32[120,20], index: 0, kind: input, shape index: {}]   ;;  %s9894_s1 = inlined_call_operand.vmem [shape: f32[20,128], index: 1, kind: input, shape index: {}]   ;;  %s9895_s2 = inlined_call_operand.vmem [shape: f32[640,64], index: 2, kind: input, shape index: {}]   ;;  %s9896_s3 = inlined_call_operand.vmem [shape: f32[5,64,32], index: 3, kind: input, shape index: {}]   ;;  %s9897_s4 = inlined_call_operand.vmem [shape: f32[4,32,256], index: 4, kind: input, shape index: {}]   ;;  %s9898_s5 = inlined_call_operand.vmem [shape: f32[64,768], index: 5, kind: input, shape index: {}]   ;;  %s9899_s6 = inlined_call_operand.vmem [shape: f32[64,64], index: 6, kind: input, shape index: {}]   ;;  %s9900_s7 = inlined_call_operand.vmem [shape: f32[64,8], index: 7, kind: input, shape index: {}]   ;;  %s9901_s8 = inlined_call_operand.vmem [shape: f32[9,256], index: 8, kind: input, shape index: {}]   ;;  %s9902_s9 = inlined_call_operand.hbm [shape: f32[2,8], index: 9, kind: output, shape index: {}]  }
   0x1   :  { %v48_v0 = vld [vmem:[%s9894_s1] sm:$0xff]  ;;  %v49_v1 = vld [vmem:[%s9894_s1 + $0x8] sm:$0xff]  ;;  %6584 = vmatprep.subr.bf16.mxu0 %v9903_v2  ;;  %6235 = vmatprep.mubr.msk.f32.mxu0 %vm7346_vm0, %v9905_v4  ;;  %v50_v5 = vld [vmem:[%s9894_s1 + $0x10] sm:$0xf]  ;;  %vm52_vm2 = vcmask 162816  }
   0x2   :  { %v6585_v3 = vpack.c.bf16 %v49_v1, %v48_v0  ;;  %v33_v6 = vld [vmem:[%s9893_s0] sm:$0xff]  ;;  %v844_v8 = vld [vmem:[%s9895_s2 + $0x88] sm:$0xff]  ;;  %v845_v13 = vld [vmem:[%s9895_s2 + $0x90] sm:$0xff] }
   0x3   :  { %v843_v7 = vld [vmem:[%s9895_s2 + $0x80] sm:$0xff]  ;;  %v34_v10 = vld [vmem:[%s9893_s0 + $0x8] sm:$0xff]  ;;  %v846_v14 = vld [vmem:[%s9895_s2 + $0x98] sm:$0xff] }
   0x4   :  { %6586 = vmatpush3.bf16.msra.mxu0 %v6585_v3  ;;  %v827_v9 = vld [vmem:[%s9895_s2] sm:$0xff]  ;;  %v7434_v11 = vpack.c.bf16 %v844_v8, %v843_v7  ;;  %v828_v12 = vld [vmem:[%s9895_s2 + $0x8] sm:$0xff]  ;;  %v7448_v16 = vpack.c.bf16 %v846_v14, %v845_v13  ;;  %v829_v17 = vld [vmem:[%s9895_s2 + $0x10] sm:$0xff] }
   0x5   :  { %6233 = vmatprep.subr.mxu0 %v9905_v4  ;;  %v7446_v15 = vpack.c.bf16 %v828_v12, %v827_v9  ;;  %v830_v18 = vld [vmem:[%s9895_s2 + $0x18] sm:$0xff]  ;;  %v891_v19 = vld [vmem:[%s9895_s2 + $0x200] sm:$0xff]  ;;  %v892_v20 = vld [vmem:[%s9895_s2 + $0x208] sm:$0xff] }
   0x6   :  { %9944 = vst [vmem:[#allocation7_spill] sm:$0xff] %v7448_v16  ;;  %6588 = vmatprep.subr.bf16.mxu1 %v7434_v11  ;;  %v847_v21 = vld [vmem:[%s9895_s2 + $0xa0] sm:$0xff]  ;;  %v848_v22 = vld [vmem:[%s9895_s2 + $0xa8] sm:$0xff]  ;;  %v7472_v23 = vpack.c.bf16 %v830_v18, %v829_v17  ;;  %v7474_v24 = vpack.c.bf16 %v892_v20, %v891_v19 }
   0x7   :  { %9943 = vst [vmem:[#allocation6_spill] sm:$0xff] %v7446_v15  ;;  %6590 = vmatpush3.bf16.msra.mxu1 %v7446_v15 }
   0x8   :  { %6234 = vmatpush3.msk.msra.mxu0 %vm98_vm1, %v50_v5  ;;  %9945 = vst [vmem:[#allocation8_spill] sm:$0xff] %v7472_v23  ;;  %9946 = vst [vmem:[#allocation9_spill] sm:$0xff] %v7474_v24 }
   0x9   :  { %6236 = vmatmul.mubr.msk.f32.vlgmr.msra.gmra.mrb[0].mxu0 %vm52_vm2, %v33_v6 }
   0xa   :  { %6238 = vmatprep.mubr.msk.f32.mxu0 %vm7346_vm0, %v9905_v4 }
   0xb   :  { %14 = vsyncpa [#allocation4], 0  ;;  %6592 = vmatprep.subr.bf16.mxu1 %v7448_v16  ;;  %v7477_v25 = vpack.c.bf16 %v848_v22, %v847_v21  ;;  %6652 = vmatprep.subr.bf16.mxu0 %v7474_v24  ;;  %v35_v26 = vld [vmem:[%s9893_s0 + $0x10] sm:$0xff]  ;;  %v36_v27 = vld [vmem:[%s9893_s0 + $0x18] sm:$0xff]  ;;  %vm1037_vm3 = vcmask 1041409   ;;  %vm1039_vm4 = vcmask 1042434  }
   0xc   :  { %6654 = vmatpush3.bf16.msra.mxu0 %v7474_v24  ;;  %6594 = vmatpush3.bf16.msra.mxu1 %v7472_v23  ;;  %v37_v28 = vld [vmem:[%s9893_s0 + $0x20] sm:$0xff]  ;;  %v38_v29 = vld [vmem:[%s9893_s0 + $0x28] sm:$0xff]  ;;  %v39_v30 = vld [vmem:[%s9893_s0 + $0x30] sm:$0xff]  ;;  %vm1041_vm5 = vcmask 1043459   ;;  %vm1043_vm6 = vcmask 1044484   ;;  %vm1045_vm7 = vcmask 1045509  }
   0xd   :  { %9947 = vst [vmem:[#allocation10_spill] sm:$0xff] %v7477_v25  ;;  %6239 = vmatmul.mubr.msk.f32.gmra.mrb[2].mxu0 %vm52_vm2, %v34_v10  ;;  %6596 = vmatprep.subr.bf16.mxu1 %v7477_v25  ;;  %v40_v31 = vld [vmem:[%s9893_s0 + $0x38] sm:$0xff]  ;;  %v41_v32 = vld [vmem:[%s9893_s0 + $0x40] sm:$0xff]  ;;  %v42_v33 = vld [vmem:[%s9893_s0 + $0x48] sm:$0xff]  ;;  %vm1047_vm8 = vcmask 1046534   ;;  %vm1049_vm9 = vcmask 1047559  }
   0xe   :  { %6241 = vmatprep.mubr.msk.f32.mxu0 %vm7346_vm0, %v9905_v4  ;;  %v43_v34 = vld [vmem:[%s9893_s0 + $0x50] sm:$0xff]  ;;  %v44_v35 = vld [vmem:[%s9893_s0 + $0x58] sm:$0xff]  ;;  %v45_v36 = vld [vmem:[%s9893_s0 + $0x60] sm:$0xff]  ;;  %vm2316_vm10 = vcmask 523264   ;;  %vm5610_vm11 = vcmask 58368  }
   0xf   :  { %v46_v37 = vld [vmem:[%s9893_s0 + $0x68] sm:$0xff]  ;;  %v47_v38 = vld [vmem:[%s9893_s0 + $0x70] sm:$0xff]  ;;  %v831_v39 = vld [vmem:[%s9895_s2 + $0x20] sm:$0xff] }
  0x10   :  { %v832_v40 = vld [vmem:[%s9895_s2 + $0x28] sm:$0xff]  ;;  %v849_v42 = vld [vmem:[%s9895_s2 + $0xb0] sm:$0xff]  ;;  %v850_v43 = vld [vmem:[%s9895_s2 + $0xb8] sm:$0xff] }
  0x11   :  { %6242 = vmatmul.mubr.msk.f32.gmra.mrb[4].mxu0 %vm52_vm2, %v35_v26  ;;  %v7568_v41 = vpack.c.bf16 %v832_v40, %v831_v39  ;;  %v7577_v44 = vpack.c.bf16 %v850_v43, %v849_v42  ;;  %v833_v45 = vld [vmem:[%s9895_s2 + $0x30] sm:$0xff]  ;;  %v834_v46 = vld [vmem:[%s9895_s2 + $0x38] sm:$0xff]  ;;  %v851_v48 = vld [vmem:[%s9895_s2 + $0xc0] sm:$0xff]  ;;  %v7348_v40 = vmov 1983009808   ;;  %v276_v43 = vlaneseq }
  0x12   :  { %6244 = vmatprep.mubr.msk.f32.mxu0 %vm7346_vm0, %v9905_v4  ;;  %v7586_v47 = vpack.c.bf16 %v834_v46, %v833_v45  ;;  %v852_v49 = vld [vmem:[%s9895_s2 + $0xc8] sm:$0xff]  ;;  %v893_v50 = vld [vmem:[%s9895_s2 + $0x210] sm:$0xff]  ;;  %v894_v51 = vld [vmem:[%s9895_s2 + $0x218] sm:$0xff]  ;;  %v274_v42 = vunpack.c.l.s4 %v7348_v40 }
  0x13   :  { %9948 = vst [vmem:[#allocation11_spill] sm:$0xff] %v7568_v41  ;;  %6598 = vmatpush3.bf16.msra.mxu1 %v7568_v41  ;;  %9949 = vst [vmem:[#allocation12_spill] sm:$0xff] %v7577_v44  ;;  %v7601_v52 = vpack.c.bf16 %v852_v49, %v851_v48  ;;  %v7603_v53 = vpack.c.bf16 %v894_v51, %v893_v50  ;;  %v835_v54 = vld [vmem:[%s9895_s2 + $0x40] sm:$0xff]  ;;  %v836_v55 = vld [vmem:[%s9895_s2 + $0x48] sm:$0xff]  ;;  %v7737_v46 = vshrl.u32 %v276_v43, 7 }
  0x14   :  { %6600 = vmatprep.subr.bf16.mxu1 %v7577_v44  ;;  %9950 = vst [vmem:[#allocation13_spill] sm:$0xff] %v7586_v47  ;;  %v7612_v56 = vpack.c.bf16 %v836_v55, %v835_v54  ;;  %v853_v57 = vld [vmem:[%s9895_s2 + $0xd0] sm:$0xff]  ;;  %v854_v58 = vld [vmem:[%s9895_s2 + $0xd8] sm:$0xff]  ;;  %v895_v62 = vld [vmem:[%s9895_s2 + $0x220] sm:$0xff]  ;;  %v275_v45 = vunpack.c.0.s8 %v274_v42 }
  0x15   :  { %6245 = vmatmul.mubr.msk.f32.gmra.mrb[6].mxu0 %vm52_vm2, %v36_v27  ;;  %9951 = vst [vmem:[#allocation14_spill] sm:$0xff] %v7601_v52  ;;  %9952 = vst [vmem:[#allocation15_spill] sm:$0xff] %v7603_v53  ;;  %6656 = vmatprep.subr.bf16.mxu0 %v7603_v53  ;;  %v7623_v59 = vpack.c.bf16 %v854_v58, %v853_v57  ;;  %v837_v60 = vld [vmem:[%s9895_s2 + $0x50] sm:$0xff]  ;;  %v838_v61 = vld [vmem:[%s9895_s2 + $0x58] sm:$0xff] }
  0x16   :  { %6247 = vmatprep.mubr.msk.f32.mxu0 %vm7346_vm0, %v9905_v4  ;;  %9953 = vst [vmem:[#allocation16_spill] sm:$0xff] %v7612_v56  ;;  %6658 = vmatpush3.bf16.msra.mxu0 %v7603_v53  ;;  %v7635_v63 = vpack.c.bf16 %v838_v61, %v837_v60  ;;  %v896_v0 = vld [vmem:[%s9895_s2 + $0x228] sm:$0xff]  ;;  %v855_v3 = vld [vmem:[%s9895_s2 + $0xe0] sm:$0xff]  ;;  %v897_v9 = vld [vmem:[%s9895_s2 + $0x230] sm:$0xff] }
  0x17   :  { %6602 = vmatpush3.bf16.msra.mxu1 %v7586_v47  ;;  %9954 = vst [vmem:[#allocation17_spill] sm:$0xff] %v7623_v59  ;;  %v7640_v1 = vpack.c.bf16 %v896_v0, %v895_v62  ;;  %v856_v5 = vld [vmem:[%s9895_s2 + $0xe8] sm:$0xff]  ;;  %v839_v7 = vld [vmem:[%s9895_s2 + $0x60] sm:$0xff]  ;;  %v898_v12 = vld [vmem:[%s9895_s2 + $0x238] sm:$0xff]  ;;  %v7770_v0 = vsub.s32 %v275_v45, %v7737_v46 }
  0x18   :  { %6604 = vmatprep.subr.bf16.mxu1 %v7601_v52  ;;  %9955 = vst [vmem:[#allocation18_spill] sm:$0xff] %v7635_v63  ;;  %v7650_v6 = vpack.c.bf16 %v856_v5, %v855_v3  ;;  %v840_v8 = vld [vmem:[%s9895_s2 + $0x68] sm:$0xff]  ;;  %v7668_v13 = vpack.c.bf16 %v898_v12, %v897_v9  ;;  %v857_v14 = vld [vmem:[%s9895_s2 + $0xf0] sm:$0xff]  ;;  %v858_v17 = vld [vmem:[%s9895_s2 + $0xf8] sm:$0xff] }
  0x19   :  { %6248 = vmatmul.mubr.msk.f32.gmra.mrb[8].mxu0 %vm52_vm2, %v37_v28  ;;  %9956 = vst [vmem:[#allocation19_spill] sm:$0xff] %v7640_v1  ;;  %6660 = vmatprep.subr.bf16.mxu0 %v7640_v1  ;;  %v7663_v10 = vpack.c.bf16 %v840_v8, %v839_v7  ;;  %v7678_v18 = vpack.c.bf16 %v858_v17, %v857_v14  ;;  %v841_v19 = vld [vmem:[%s9895_s2 + $0x70] sm:$0xff]  ;;  %v842_v20 = vld [vmem:[%s9895_s2 + $0x78] sm:$0xff]  ;;  %v899_v21 = vld [vmem:[%s9895_s2 + $0x240] sm:$0xff] }
  0x1a   :  { %6250 = vmatprep.mubr.msk.f32.mxu0 %vm7346_vm0, %v9905_v4  ;;  %9957 = vst [vmem:[#allocation20_spill] sm:$0xff] %v7650_v6  ;;  %6662 = vmatpush3.bf16.msra.mxu0 %v7640_v1  ;;  %9959 = vst [vmem:[#allocation22_spill] sm:$0xff] %v7668_v13  ;;  %v7690_v22 = vpack.c.bf16 %v842_v20, %v841_v19  ;;  %v900_v26 = vld [vmem:[%s9895_s2 + $0x248] sm:$0xff]  ;;  %v875_v28 = vld [vmem:[%s9895_s2 + $0x180] sm:$0xff] }
  0x1b   :  { %6606 = vmatpush3.bf16.msra.mxu1 %v7612_v56  ;;  %9958 = vst [vmem:[#allocation21_spill] sm:$0xff] %v7663_v10  ;;  %6664 = vmatprep.subr.bf16.mxu0 %v7668_v13  ;;  %9960 = vst [vmem:[#allocation23_spill] sm:$0xff] %v7678_v18  ;;  %v7696_v27 = vpack.c.bf16 %v900_v26, %v899_v21  ;;  %v7742_v48 = vld [vmem:[%s9901_s8 + $0x6] ss:$0 sm:$0xff]  ;;  %v860_v50 = vld [vmem:[%s9895_s2 + $0x108] sm:$0xff] }
  0x1c   :  { %6608 = vmatprep.subr.bf16.mxu1 %v7623_v59  ;;  %9961 = vst [vmem:[#allocation24_spill] sm:$0xff] %v7690_v22  ;;  %9966 = vst [vmem:[#allocation29_spill] sm:$0xff] %v7737_v46  ;;  %v859_v49 = vld [vmem:[%s9895_s2 + $0x100] sm:$0xff]  ;;  %v877_v51 = vld [vmem:[%s9895_s2 + $0x190] sm:$0xff] }
  0x1d   :  { %6251 = vmatmul.mubr.msk.f32.gmra.mrb[10].mxu0 %vm52_vm2, %v38_v29  ;;  %9962 = vst [vmem:[#allocation25_spill] sm:$0xff] %v7696_v27  ;;  %v876_v29 = vld [vmem:[%s9895_s2 + $0x188] sm:$0xff]  ;;  %v878_v54 = vld [vmem:[%s9895_s2 + $0x198] sm:$0xff]  ;;  %v861_v55 = vld [vmem:[%s9895_s2 + $0x110] sm:$0xff] }
  0x1e   :  { %6253 = vmatprep.mubr.msk.f32.mxu0 %vm7346_vm0, %v9905_v4  ;;  %6666 = vmatpush3.bf16.msra.mxu0 %v7668_v13  ;;  %v862_v58 = vld [vmem:[%s9895_s2 + $0x118] sm:$0xff]  ;;  %v879_v60 = vld [vmem:[%s9895_s2 + $0x1a0] sm:$0xff]  ;;  %v880_v61 = vld [vmem:[%s9895_s2 + $0x1a8] sm:$0xff] }
  0x1f   :  { %6610 = vmatpush3.bf16.msra.mxu1 %v7635_v63  ;;  %6668 = vmatprep.subr.bf16.mxu0 %v7696_v27  ;;  %v863_v5 = vld [vmem:[%s9895_s2 + $0x120] sm:$0xff]  ;;  %v864_v7 = vld [vmem:[%s9895_s2 + $0x128] sm:$0xff]  ;;  %v881_v8 = vld [vmem:[%s9895_s2 + $0x1b0] sm:$0xff]  ;;  %v7822_v45 = vpack.c.bf16 %v880_v61, %v879_v60 }
  0x20   :  { %6612 = vmatprep.subr.bf16.mxu1 %v7650_v6  ;;  %v882_v9 = vld [vmem:[%s9895_s2 + $0x1b8] sm:$0xff]  ;;  %v865_v12 = vld [vmem:[%s9895_s2 + $0x130] sm:$0xff]  ;;  %v883_v17 = vld [vmem:[%s9895_s2 + $0x1c0] sm:$0xff] }
  0x21   :  { %6254 = vmatmul.mubr.msk.f32.gmra.mrb[12].mxu0 %vm52_vm2, %v39_v30  ;;  %v6619_v30 = vpack.c.bf16 %v876_v29, %v875_v28  ;;  %v866_v14 = vld [vmem:[%s9895_s2 + $0x138] sm:$0xff]  ;;  %v884_v20 = vld [vmem:[%s9895_s2 + $0x1c8] sm:$0xff]  ;;  %v867_v21 = vld [vmem:[%s9895_s2 + $0x140] sm:$0xff]  ;;  %v7803_v28 = vsub.s32 0, %v7737_v46 }
  0x22   :  { %6256 = vmatprep.mubr.msk.f32.mxu0 %vm7346_vm0, %v9905_v4  ;;  %6670 = vmatpush3.bf16.msra.mxu0 %v7696_v27  ;;  %v868_v26 = vld [vmem:[%s9895_s2 + $0x148] sm:$0xff] }
  0x23   :  { %6614 = vmatpush3.bf16.msra.mxu1 %v7663_v10 }
  0x24   :  { %6616 = vmatprep.subr.bf16.mxu1 %v7678_v18 }
  0x25   :  { %6257 = vmatmul.mubr.msk.f32.gmra.mrb[14].mxu0 %vm52_vm2, %v40_v31  ;;  %v901_v31 = vld [vmem:[%s9895_s2 + $0x250] sm:$0xff] }
  0x26   :  { %6259 = vmatprep.mubr.msk.f32.mxu0 %vm7346_vm0, %v9905_v4 }
  0x27   :  { %6618 = vmatpush3.bf16.msra.mxu1 %v7690_v22 }
  0x28   :  { %6620 = vmatprep.subr.bf16.mxu1 %v6619_v30 }
  0x29   :  { %6260 = vmatmul.mubr.msk.f32.gmra.mrb[16].mxu0 %vm52_vm2, %v41_v32  ;;  %v902_v32 = vld [vmem:[%s9895_s2 + $0x258] sm:$0xff] }
  0x2a   :  { %6262 = vmatprep.mubr.msk.f32.mxu0 %vm7346_vm0, %v9905_v4 }
  0x2d   :  { %6263 = vmatmul.mubr.msk.f32.gmra.mrb[18].mxu0 %vm52_vm2, %v42_v33  ;;  %v7713_v33 = vpack.c.bf16 %v902_v32, %v901_v31  ;;  %v7807_v31 = vpack.c.bf16 %v878_v54, %v877_v51  ;;  %v7809_v32 = vpack.c.bf16 %v862_v58, %v861_v55  ;;  %v888_v51 = vld [vmem:[%s9895_s2 + $0x1e8] sm:$0xff]  ;;  %v7833_v54 = vpack.c.bf16 %v864_v7, %v863_v5 }
  0x2e   :  { %6265 = vmatprep.mubr.msk.f32.mxu0 %vm7346_vm0, %v9905_v4  ;;  %v7835_v55 = vpack.c.bf16 %v882_v9, %v881_v8  ;;  %v7839_v58 = vpack.c.bf16 %v884_v20, %v883_v17  ;;  %v872_v5 = vld [vmem:[%s9895_s2 + $0x168] sm:$0xff]  ;;  %v7848_v8 = vpack.c.bf16 %v868_v26, %v867_v21  ;;  %v889_v17 = vld [vmem:[%s9895_s2 + $0x1f0] sm:$0xff]  ;;  %v890_v20 = vld [vmem:[%s9895_s2 + $0x1f8] sm:$0xff] }
  0x2f   :  { %9963 = vst [vmem:[#allocation26_spill] sm:$0xff] %v7713_v33  ;;  %6672 = vmatprep.subr.bf16.mxu0 %v7713_v33  ;;  %v7866_v2 = vpack.c.bf16 %v890_v20, %v889_v17 }
  0x30   :  { %6674 = vmatpush3.bf16.msra.mxu0 %v7713_v33 }
  0x31   :  { %6266 = vmatmul.mubr.msk.f32.gmra.mrb[20].mxu0 %vm52_vm2, %v43_v34  ;;  %v903_v34 = vld [vmem:[%s9895_s2 + $0x260] sm:$0xff] }
  0x32   :  { %6268 = vmatprep.mubr.msk.f32.mxu0 %vm7346_vm0, %v9905_v4 }
  0x35   :  { %6269 = vmatmul.mubr.msk.f32.gmra.mrb[22].mxu0 %vm52_vm2, %v44_v35  ;;  %v904_v35 = vld [vmem:[%s9895_s2 + $0x268] sm:$0xff] }
  0x36   :  { %6271 = vmatprep.mubr.msk.f32.mxu0 %vm7346_vm0, %v9905_v4 }
  0x39   :  { %6272 = vmatmul.mubr.msk.f32.gmra.mrb[24].mxu0 %vm52_vm2, %v45_v36  ;;  %v7723_v36 = vpack.c.bf16 %v904_v35, %v903_v34  ;;  %v885_v34 = vld [vmem:[%s9895_s2 + $0x1d0] sm:$0xff]  ;;  %v886_v35 = vld [vmem:[%s9895_s2 + $0x1d8] sm:$0xff] }
  0x3a   :  { %6274 = vmatprep.mubr.msk.f32.mxu0 %vm7346_vm0, %v9905_v4  ;;  %v7850_v9 = vpack.c.bf16 %v886_v35, %v885_v34 }
  0x3b   :  { %9964 = vst [vmem:[#allocation27_spill] sm:$0xff] %v7723_v36  ;;  %6676 = vmatprep.subr.bf16.mxu0 %v7723_v36 }
  0x3c   :  { %6678 = vmatpush3.bf16.msra.mxu0 %v7723_v36 }
  0x3d   :  { %6275 = vmatmul.mubr.msk.f32.gmra.mrb[26].mxu0 %vm52_vm2, %v46_v37  ;;  %v905_v37 = vld [vmem:[%s9895_s2 + $0x270] sm:$0xff] }
  0x3e   :  { %6277 = vmatprep.mubr.msk.f32.mxu0 %vm7346_vm0, %v9905_v4 }
  0x41   :  { %6278 = vmatmul.mubr.msk.f32.gmra.mrb[28].mxu0 %vm52_vm2, %v47_v38  ;;  %v906_v38 = vld [vmem:[%s9895_s2 + $0x278] sm:$0xff] }
  0x42   :  { %v7733_v39 = vpack.c.bf16 %v906_v38, %v905_v37  ;;  %v869_v37 = vld [vmem:[%s9895_s2 + $0x150] sm:$0xff] }
  0x44   :  { %9965 = vst [vmem:[#allocation28_spill] sm:$0xff] %v7733_v39  ;;  %6680 = vmatprep.subr.bf16.mxu0 %v7733_v39 }
  0x45   :  { %6682 = vmatpush3.bf16.msra.mxu0 %v7733_v39 }
  0x46   :  { %6716 = vmatprep.subr.bf16.mxu0 %v6619_v30  ;;  %v7805_v30 = vpack.c.bf16 %v860_v50, %v859_v49  ;;  %v870_v49 = vld [vmem:[%s9895_s2 + $0x158] sm:$0xff]  ;;  %v887_v50 = vld [vmem:[%s9895_s2 + $0x1e0] sm:$0xff] }
  0xdc   :  { %v168_v57 = vpop.f32.mrb[0].mxu0 }
  0xdd   :  { %v169_v62 = vadd.f32 %v168_v57, %v7742_v48  ;;  %v6237_v3 = vpop.f32.mrb[1].mxu0  ;;  %v7837_v57 = vpack.c.bf16 %v866_v14, %v865_v12  ;;  %v7852_v12 = vpack.c.bf16 %v870_v49, %v869_v37  ;;  %v7854_v14 = vpack.c.bf16 %v888_v51, %v887_v50 }
  0xdf   :  { %v242_v19 = vmax.f32 %v169_v62, 0.0 }
  0xe0   :  { %v173_v29 = vpop.f32.mrb[2].mxu0 }
  0xe1   :  { %v272_v38 = vcombine.high %v242_v19, %v242_v19  ;;  %v279_v40 = vrot.slane %v242_v19, %v7770_v0  ;;  %v174_v42 = vadd.f32 %v173_v29, %v7742_v48  ;;  %v6240_v43 = vpop.f32.mrb[3].mxu0  ;;  %v871_v19 = vld [vmem:[%s9895_s2 + $0x160] sm:$0xff] }
  0xe2   :  { %v7864_v37 = vpack.c.bf16 %v872_v5, %v871_v19 }
  0xe3   :  { %v286_v60 = vrot.slane %v272_v38, %v7770_v0  ;;  %v287_v61 = vcombine.high %v279_v40, %v279_v40  ;;  %v5654_v62 = vrot.slane %v279_v40, 9  ;;  %v243_v3 = vmax.f32 %v174_v42, 0.0 }
  0xe4   :  { %v178_v7 = vpop.f32.mrb[4].mxu0 }
  0xe5   :  { %v288_v29 = vcombine.high %v286_v60, %v286_v60  ;;  %v5655_v38 = vrot.slane %v287_v61, 9  ;;  %v5656_v42 = vrot.slane %v286_v60, 9  ;;  %v767_v43 = vmax.f32 %v279_v40, %v5654_v62  ;;  %v6243_v21 = vpop.f32.mrb[5].mxu0  ;;  %v873_v40 = vld [vmem:[%s9895_s2 + $0x170] sm:$0xff]  ;;  %v874_v62 = vld [vmem:[%s9895_s2 + $0x178] sm:$0xff] }
  0xe6   :  { %v289_v26 = vcombine.high %v243_v3, %v243_v3  ;;  %v296_v34 = vrot.slane %v243_v3, %v7770_v0  ;;  %v179_v35 = vadd.f32 %v178_v7, %v7742_v48 }
  0xe7   :  { %v5657_v49 = vrot.slane %v288_v29, 9  ;;  %v768_v50 = vmax.f32 %v287_v61, %v5655_v38  ;;  %v769_v51 = vmax.f32 %v286_v60, %v5656_v42  ;;  %v936_v61 = vrot.slane %v767_v43, %v7803_v28 }
  0xe8   :  { %v303_v4 = vrot.slane %v289_v26, %v7770_v0  ;;  %v304_v46 = vcombine.high %v296_v34, %v296_v34  ;;  %v5658_v39 = vrot.slane %v296_v34, 9  ;;  %v244_v36 = vmax.f32 %v179_v35, 0.0  ;;  %v183_v33 = vpop.f32.mrb[6].mxu0 }
  0xe9   :  { %v770_v3 = vmax.f32 %v288_v29, %v5657_v49  ;;  %v7877_v60 = vrot.slane %v768_v50, %v7803_v28  ;;  %v184_v19 = vadd.f32 %v183_v33, %v7742_v48  ;;  %v6246_v5 = vpop.f32.mrb[7].mxu0  ;;  %v7884_v35 = vpack.c.bf16 %v874_v62, %v873_v40 }
  0xea   :  { %v305_v7 = vcombine.high %v303_v4, %v303_v4  ;;  %v5659_v17 = vrot.slane %v304_v46, 9  ;;  %v5660_v20 = vrot.slane %v303_v4, 9  ;;  %v771_v38 = vmax.f32 %v296_v34, %v5658_v39 }
  0xeb   :  { %v7881_v42 = vrot.slane %v770_v3, %v7803_v28  ;;  %v306_v21 = vcombine.high %v244_v36, %v244_v36  ;;  %v313_v26 = vrot.slane %v244_v36, %v7770_v0  ;;  %v7887_v29 = vrot.slane %v769_v51, %v7803_v28 }
  0xec   :  { %v7891_v43 = vsel %vm1037_vm3, %v7877_v60, %v936_v61  ;;  %v5661_v33 = vrot.slane %v305_v7, 9  ;;  %v772_v49 = vmax.f32 %v304_v46, %v5659_v17  ;;  %v188_v50 = vpop.f32.mrb[8].mxu0  ;;  %v773_v5 = vmax.f32 %v303_v4, %v5660_v20 }
  0xed   :  { %v320_v39 = vrot.slane %v306_v21, %v7770_v0  ;;  %v321_v34 = vcombine.high %v313_v26, %v313_v26  ;;  %v5662_v3 = vrot.slane %v313_v26, 9  ;;  %v6249_v27 = vpop.f32.mrb[9].mxu0  ;;  %v7897_v36 = vsel %vm1037_vm3, %v7881_v42, %v7887_v29 }
  0xee   :  { %v774_v51 = vmax.f32 %v305_v7, %v5661_v33  ;;  %v7900_v40 = vrot.slane %v771_v38, %v7803_v28  ;;  %v245_v62 = vmax.f32 %v184_v19, 0.0  ;;  %v7903_v4 = vrot.slane %v772_v49, %v7803_v28 }
  0xef   :  { %v322_v61 = vcombine.high %v320_v39, %v320_v39  ;;  %v5663_v13 = vrot.slane %v321_v34, 9  ;;  %v5664_v46 = vrot.slane %v320_v39, 9  ;;  %v775_v17 = vmax.f32 %v313_v26, %v5662_v3 }
  0xf0   :  { %v323_v20 = vcombine.high %v245_v62, %v245_v62  ;;  %v330_v27 = vrot.slane %v245_v62, %v7770_v0  ;;  %v189_v21 = vadd.f32 %v188_v50, %v7742_v48  ;;  %v193_v1 = vpop.f32.mrb[10].mxu0  ;;  %v7908_v53 = vrot.slane %v773_v5, %v7803_v28 }
  0xf1   :  { %v5665_v7 = vrot.slane %v322_v61, 9  ;;  %v776_v38 = vmax.f32 %v321_v34, %v5663_v13  ;;  %v777_v33 = vmax.f32 %v320_v39, %v5664_v46  ;;  %v6252_v19 = vpop.f32.mrb[11].mxu0  ;;  %v7912_v49 = vrot.slane %v774_v51, %v7803_v28 }
  0xf2   :  { %v337_v24 = vrot.slane %v323_v20, %v7770_v0  ;;  %v338_v22 = vcombine.high %v330_v27, %v330_v27  ;;  %v5666_v26 = vrot.slane %v330_v27, 9  ;;  %v246_v3 = vmax.f32 %v189_v21, 0.0 }
  0xf3   :  { %v778_v18 = vmax.f32 %v322_v61, %v5665_v7  ;;  %v7915_v62 = vrot.slane %v775_v17, %v7803_v28  ;;  %v194_v50 = vadd.f32 %v193_v1, %v7742_v48  ;;  %v7919_v34 = vrot.slane %v776_v38, %v7803_v28 }
  0xf4   :  { %v339_v5 = vcombine.high %v337_v24, %v337_v24  ;;  %v5667_v10 = vrot.slane %v338_v22, 9  ;;  %v5668_v6 = vrot.slane %v337_v24, 9  ;;  %v779_v13 = vmax.f32 %v330_v27, %v5666_v26  ;;  %v198_v39 = vpop.f32.mrb[12].mxu0 }
  0xf5   :  { %v340_v46 = vcombine.high %v246_v3, %v246_v3  ;;  %v347_v20 = vrot.slane %v246_v3, %v7770_v0  ;;  %v247_v51 = vmax.f32 %v194_v50, 0.0  ;;  %v6255_v61 = vpop.f32.mrb[13].mxu0  ;;  %v7923_v17 = vrot.slane %v777_v33, %v7803_v28 }
  0xf6   :  { %v5669_v21 = vrot.slane %v339_v5, 9  ;;  %v780_v1 = vmax.f32 %v338_v22, %v5667_v10  ;;  %v781_v7 = vmax.f32 %v337_v24, %v5668_v6  ;;  %v7927_v38 = vrot.slane %v778_v18, %v7803_v28 }
  0xf7   :  { %v354_v27 = vrot.slane %v340_v46, %v7770_v0  ;;  %v355_v19 = vcombine.high %v347_v20, %v347_v20  ;;  %v5670_v26 = vrot.slane %v347_v20, 9  ;;  %v357_v63 = vcombine.high %v247_v51, %v247_v51 }
  0xf8   :  { %v782_v3 = vmax.f32 %v339_v5, %v5669_v21  ;;  %v7930_v50 = vrot.slane %v779_v13, %v7803_v28  ;;  %v364_v33 = vrot.slane %v247_v51, %v7770_v0  ;;  %v7933_v61 = vpop.f32.mrb[14].mxu0  ;;  %v7936_v59 = vrot.slane %v780_v1, %v7803_v28 }
  0xf9   :  { %v356_v24 = vcombine.high %v354_v27, %v354_v27  ;;  %v5671_v6 = vrot.slane %v355_v19, 9  ;;  %v5672_v10 = vrot.slane %v354_v27, 9  ;;  %v783_v22 = vmax.f32 %v347_v20, %v5670_v26  ;;  %v6258_v46 = vpop.f32.mrb[15].mxu0 }
  0xfa   :  { %v371_v18 = vrot.slane %v357_v63, %v7770_v0  ;;  %v372_v5 = vcombine.high %v364_v33, %v364_v33  ;;  %v5674_v21 = vrot.slane %v364_v33, 9  ;;  %v7940_v13 = vrot.slane %v781_v7, %v7803_v28 }
  0xfb   :  { %v5673_v51 = vrot.slane %v356_v24, 9  ;;  %v784_v56 = vmax.f32 %v355_v19, %v5671_v6  ;;  %v785_v52 = vmax.f32 %v354_v27, %v5672_v10  ;;  %v7945_v26 = vrot.slane %v782_v3, %v7803_v28 }
  0xfc   :  { %9967 = vst [vmem:[#allocation30_spill] sm:$0xff] %v7940_v13  ;;  %v373_v47 = vcombine.high %v371_v18, %v371_v18  ;;  %v5675_v44 = vrot.slane %v372_v5, 9  ;;  %v5676_v41 = vrot.slane %v371_v18, 9  ;;  %v787_v25 = vmax.f32 %v364_v33, %v5674_v21  ;;  %v7942_v20 = vpop.f32.mrb[16].mxu0 }
  0xfd   :  { %v786_v1 = vmax.f32 %v356_v24, %v5673_v51  ;;  %v7948_v63 = vrot.slane %v783_v22, %v7803_v28  ;;  %v1075_v7 = vsel %vm1037_vm3, %v7887_v29, %v7877_v60  ;;  %v6261_v46 = vpop.f32.mrb[17].mxu0  ;;  %v7954_v27 = vrot.slane %v784_v56, %v7803_v28 }
  0xfe   :  { %v7957_v19 = vrot.slane %v785_v52, %v7803_v28  ;;  %v5677_v33 = vrot.slane %v373_v47, 9  ;;  %v788_v6 = vmax.f32 %v372_v5, %v5675_v44  ;;  %v789_v10 = vmax.f32 %v371_v18, %v5676_v41 }
  0xff   :  { %v1076_v3 = vsel %vm1039_vm4, %v7881_v42, %v1075_v7  ;;  %v1040_v24 = vsel %vm1039_vm4, %v7887_v29, %v7891_v43  ;;  %v199_v22 = vadd.f32 %v198_v39, %v7742_v48  ;;  %v7966_v60 = vrot.slane %v786_v1, %v7803_v28 }
 0x100   :  { %v790_v56 = vmax.f32 %v373_v47, %v5677_v33  ;;  %v7969_v21 = vrot.slane %v787_v25, %v7803_v28  ;;  %v1077_v44 = vsel %vm1041_vm5, %v7900_v40, %v1076_v3  ;;  %v7973_v41 = vpop.f32.mrb[18].mxu0  ;;  %v1042_v29 = vsel %vm1041_vm5, %v7881_v42, %v1040_v24 }
 0x101   :  { %v1078_v52 = vsel %vm1043_vm6, %v7903_v4, %v1077_v44  ;;  %v248_v43 = vmax.f32 %v199_v22, 0.0  ;;  %v1168_v39 = vsel %vm1037_vm3, %v7903_v4, %v7900_v40  ;;  %v6264_v47 = vpop.f32.mrb[19].mxu0  ;;  %v7983_v25 = vrot.slane %v788_v6, %v7803_v28 }
 0x102   :  { %v1079_v18 = vsel %vm1045_vm7, %v7908_v53, %v1078_v52  ;;  %v1044_v5 = vsel %vm1043_vm6, %v7900_v40, %v1042_v29  ;;  %v1169_v51 = vsel %vm1039_vm4, %v7908_v53, %v1168_v39  ;;  %v1082_v22 = vsel %vm1037_vm3, %v7923_v17, %v7919_v34 }
 0x103   :  { %v1080_v1 = vsel %vm1047_vm8, %v7912_v49, %v1079_v18  ;;  %v1046_v7 = vsel %vm1045_vm7, %v7903_v4, %v1044_v5  ;;  %v374_v46 = vcombine.high %v248_v43, %v248_v43  ;;  %v381_v33 = vrot.slane %v248_v43, %v7770_v0 }
 0x104   :  { %v1081_v6 = vsel %vm1049_vm9, %v7915_v62, %v1080_v1  ;;  %v1048_v3 = vsel %vm1047_vm8, %v7908_v53, %v1046_v7  ;;  %v1170_v24 = vsel %vm1041_vm5, %v7912_v49, %v1169_v51  ;;  %v8005_v44 = vpop.f32.mrb[20].mxu0  ;;  %v1083_v5 = vsel %vm1039_vm4, %v7927_v38, %v1082_v22 }
 0x105   :  { %9968 = vst [vmem:[#allocation31_spill] sm:$0xff] %v8005_v44  ;;  %1259 = vmatprep.mubr.f32.mxu1 %v1081_v6  ;;  %v1050_v52 = vsel %vm1049_vm9, %v7912_v49, %v1048_v3  ;;  %v388_v29 = vrot.slane %v374_v46, %v7770_v0  ;;  %v389_v43 = vcombine.high %v381_v33, %v381_v33  ;;  %v5678_v39 = vrot.slane %v381_v33, 9  ;;  %v6267_v47 = vpop.f32.mrb[21].mxu0 }
 0x106   :  { %1260 = vmatmul.mubr.f32.vlgmr.msra.gmra.mrb[0].mxu1 %v1050_v52  ;;  %v1171_v18 = vsel %vm1043_vm6, %v7915_v62, %v1170_v24  ;;  %v1051_v51 = vsel %vm1037_vm3, %v7919_v34, %v7915_v62  ;;  %v204_v1 = vadd.f32 %v7933_v61, %v7742_v48  ;;  %v8020_v7 = vrot.slane %v789_v10, %v7803_v28 }
 0x107   :  { %6622 = vmatpush3.bf16.msra.mxu1 %v7805_v30  ;;  %v5679_v46 = vrot.slane %v389_v43, 9  ;;  %v5680_v6 = vrot.slane %v388_v29, 9  ;;  %v791_v3 = vmax.f32 %v381_v33, %v5678_v39  ;;  %v1172_v24 = vsel %vm1045_vm7, %v7919_v34, %v1171_v18 }
 0x108   :  { %6624 = vmatprep.subr.bf16.mxu1 %v7807_v31  ;;  %v1084_v22 = vsel %vm1041_vm5, %v7930_v50, %v1083_v5  ;;  %v1052_v52 = vsel %vm1039_vm4, %v7923_v17, %v1051_v51  ;;  %v249_v61 = vmax.f32 %v204_v1, 0.0  ;;  %v8030_v47 = vpop.f32.mrb[22].mxu0  ;;  %v8033_v10 = vrot.slane %v790_v56, %v7803_v28 }
 0x109   :  { %9969 = vst [vmem:[#allocation32_spill] sm:$0xff] %v8030_v47  ;;  %v8035_v44 = vcombine.high %v388_v29, %v388_v29  ;;  %v792_v33 = vmax.f32 %v389_v43, %v5679_v46  ;;  %v1173_v39 = vsel %vm1047_vm8, %v7923_v17, %v1172_v24  ;;  %v6270_v18 = vpop.f32.mrb[23].mxu0  ;;  %v1085_v5 = vsel %vm1043_vm6, %v7936_v59, %v1084_v22 }
 0x10a   :  { %v1174_v23 = vsel %vm1049_vm9, %v7927_v38, %v1173_v39  ;;  %v1053_v51 = vsel %vm1041_vm5, %v7927_v38, %v1052_v52  ;;  %v391_v1 = vcombine.high %v249_v61, %v249_v61  ;;  %v793_v47 = vmax.f32 %v388_v29, %v5680_v6 }
 0x10b   :  { %6312 = vmatprep.mubr.f32.mxu0 %v1174_v23  ;;  %6626 = vmatpush3.bf16.msra.mxu1 %v7809_v32  ;;  %v1086_v56 = vsel %vm1045_vm7, %v7940_v13, %v1085_v5  ;;  %v1054_v43 = vsel %vm1043_vm6, %v7930_v50, %v1053_v51  ;;  %v8051_v46 = vrot.slane %v791_v3, %v7803_v28 }
 0x10c   :  { %v1087_v24 = vsel %vm1047_vm8, %v7945_v26, %v1086_v56  ;;  %6628 = vmatprep.subr.bf16.mxu1 %v7822_v45  ;;  %v1055_v29 = vsel %vm1045_vm7, %v7936_v59, %v1054_v43  ;;  %v405_v23 = vrot.slane %v391_v1, %v7770_v0  ;;  %v8059_v6 = vpop.f32.mrb[24].mxu0  ;;  %v1175_v3 = vsel %vm1037_vm3, %v7936_v59, %v7930_v50 }
 0x10d   :  { %9970 = vst [vmem:[#allocation33_spill] sm:$0xff] %v8059_v6  ;;  %v1088_v22 = vsel %vm1049_vm9, %v7948_v63, %v1087_v24  ;;  %v1056_v52 = vsel %vm1047_vm8, %v7940_v13, %v1055_v29  ;;  %v1089_v39 = vsel %vm1037_vm3, %v7957_v19, %v7954_v27  ;;  %v6273_v18 = vpop.f32.mrb[25].mxu0  ;;  %v8072_v5 = vrot.slane %v792_v33, %v7803_v28 }
 0x10e   :  { %1264 = vmatprep.mubr.f32.mxu1 %v1088_v22  ;;  %v1057_v51 = vsel %vm1049_vm9, %v7945_v26, %v1056_v52  ;;  %v8077_v1 = vrot.slane %v249_v61, %v7770_v0  ;;  %v407_v56 = vcombine.high %v405_v23, %v405_v23  ;;  %v5684_v43 = vrot.slane %v405_v23, 9 }
 0x10f   :  { %1265 = vmatmul.mubr.f32.gmra.mrb[2].mxu1 %v1057_v51  ;;  %v1176_v24 = vsel %vm1039_vm4, %v7940_v13, %v1175_v3  ;;  %v1090_v29 = vsel %vm1039_vm4, %v7966_v60, %v1089_v39  ;;  %v1058_v33 = vsel %vm1037_vm3, %v7954_v27, %v7948_v63  ;;  %v5681_v18 = vrot.slane %v8035_v44, 9 }
 0x110   :  { %6630 = vmatpush3.bf16.msra.mxu1 %v7833_v54  ;;  %v8089_v22 = vcombine.high %v8077_v1, %v8077_v1  ;;  %v5685_v61 = vrot.slane %v407_v56, 9  ;;  %v1177_v52 = vsel %vm1041_vm5, %v7945_v26, %v1176_v24  ;;  %v8094_v3 = vpop.f32.mrb[26].mxu0  ;;  %v797_v51 = vmax.f32 %v405_v23, %v5684_v43 }
 0x111   :  { %9971 = vst [vmem:[#allocation34_spill] sm:$0xff] %v8094_v3  ;;  %6632 = vmatprep.subr.bf16.mxu1 %v7835_v55  ;;  %v1178_v39 = vsel %vm1043_vm6, %v7948_v63, %v1177_v52  ;;  %v1091_v6 = vsel %vm1041_vm5, %v7969_v21, %v1090_v29  ;;  %v1059_v16 = vsel %vm1039_vm4, %v7957_v19, %v1058_v33  ;;  %v6276_v15 = vpop.f32.mrb[27].mxu0 }
 0x112   :  { %v798_v13 = vmax.f32 %v407_v56, %v5685_v61  ;;  %v1179_v24 = vsel %vm1045_vm7, %v7954_v27, %v1178_v39  ;;  %v1092_v3 = vsel %vm1043_vm6, %v7983_v25, %v1091_v6  ;;  %v1060_v23 = vsel %vm1041_vm5, %v7966_v60, %v1059_v16 }
 0x113   :  { %v1610_v43 = vrot.slane %v797_v51, %v7803_v28  ;;  %v1180_v52 = vsel %vm1047_vm8, %v7957_v19, %v1179_v24  ;;  %v1093_v29 = vsel %vm1045_vm7, %v8020_v7, %v1092_v3  ;;  %v1061_v15 = vsel %vm1043_vm6, %v7969_v21, %v1060_v23 }
 0x114   :  { %v8117_v56 = vrot.slane %v798_v13, %v7803_v28  ;;  %6634 = vmatpush3.bf16.msra.mxu1 %v7837_v57  ;;  %v1181_v6 = vsel %vm1049_vm9, %v7966_v60, %v1180_v52  ;;  %v1094_v16 = vsel %vm1047_vm8, %v8033_v10, %v1093_v29  ;;  %v1062_v33 = vsel %vm1045_vm7, %v7983_v25, %v1061_v15  ;;  %v8126_v61 = vpop.f32.mrb[28].mxu0 }
 0x115   :  { %6313 = vmatmul.mubr.f32.vlgmr.msra.gmra.mrb[30].mxu0 %v1181_v6  ;;  %v1095_v3 = vsel %vm1049_vm9, %v8051_v46, %v1094_v16  ;;  %6636 = vmatprep.subr.bf16.mxu1 %v7839_v58  ;;  %v1063_v13 = vsel %vm1047_vm8, %v8020_v7, %v1062_v33  ;;  %v8134_v51 = vrot.slane %v793_v47, %v7803_v28  ;;  %v6279_v39 = vpop.f32.mrb[29].mxu0 }
 0x116   :  { %v8138_v24 = vsel %vm1037_vm3, %v8117_v56, %v1610_v43  ;;  %1269 = vmatprep.mubr.f32.mxu1 %v1095_v3  ;;  %v1064_v23 = vsel %vm1049_vm9, %v8033_v10, %v1063_v13  ;;  %v1065_v52 = vsel %vm1037_vm3, %v8072_v5, %v8051_v46  ;;  %v1137_v29 = vsel %vm1037_vm3, %v7900_v40, %v7881_v42 }
 0x117   :  { %1270 = vmatmul.mubr.f32.gmra.mrb[4].mxu1 %v1064_v23  ;;  %v1096_v47 = vsel %vm1037_vm3, %v8134_v51, %v8072_v5  ;;  %v1138_v43 = vsel %vm1039_vm4, %v7903_v4, %v1137_v29  ;;  %v794_v15 = vmax.f32 %v8035_v44, %v5681_v18  ;;  %v1182_v6 = vsel %vm1037_vm3, %v7983_v25, %v7969_v21 }
 0x118   :  { %6638 = vmatpush3.bf16.msra.mxu1 %v7848_v8  ;;  %1274 = vmatprep.mubr.f32.mxu1 %v1096_v47  ;;  %v1139_v42 = vsel %vm1041_vm5, %v7908_v53, %v1138_v43  ;;  %v1183_v16 = vsel %vm1039_vm4, %v8020_v7, %v1182_v6  ;;  %v209_v33 = vadd.f32 %v7942_v20, %v7742_v48  ;;  %v5682_v3 = vrot.slane %v8077_v1, 9 }
 0x119   :  { %6640 = vmatprep.subr.bf16.mxu1 %v7850_v9  ;;  %v1140_v44 = vsel %vm1043_vm6, %v7912_v49, %v1139_v42  ;;  %v8169_v18 = vrot.slane %v794_v15, %v7803_v28  ;;  %v1184_v13 = vsel %vm1041_vm5, %v8033_v10, %v1183_v16  ;;  %6718 = vmatpush3.bf16.msra.mxu0 %v7805_v30 }
 0x11a   :  { %v1141_v39 = vsel %vm1045_vm7, %v7915_v62, %v1140_v44  ;;  %v1185_v20 = vsel %vm1043_vm6, %v8051_v46, %v1184_v13  ;;  %v250_v23 = vmax.f32 %v209_v33, 0.0  ;;  %v1107_v29 = vsel %vm1039_vm4, %v7900_v40, %v7897_v36  ;;  %6720 = vmatprep.subr.bf16.mxu0 %v7807_v31 }
 0x11b   :  { %1275 = vmatmul.mubr.f32.gmra.mrb[6].mxu1 %v1065_v52  ;;  %v1142_v47 = vsel %vm1047_vm8, %v7919_v34, %v1141_v39  ;;  %v1186_v30 = vsel %vm1045_vm7, %v8072_v5, %v1185_v20  ;;  %v1108_v43 = vsel %vm1041_vm5, %v7903_v4, %v1107_v29  ;;  %v214_v15 = vadd.f32 %v7973_v41, %v7742_v48 }
 0x11c   :  { %6642 = vmatpush3.bf16.msra.mxu1 %v7852_v12  ;;  %v1143_v36 = vsel %vm1049_vm9, %v7923_v17, %v1142_v47  ;;  %v1187_v31 = vsel %vm1047_vm8, %v8134_v51, %v1186_v30  ;;  %v408_v40 = vcombine.high %v250_v23, %v250_v23  ;;  %v415_v52 = vrot.slane %v250_v23, %v7770_v0 }
 0x11d   :  { %1344 = vmatprep.mubr.f32.mxu1 %v1143_v36  ;;  %v1188_v6 = vsel %vm1049_vm9, %v8169_v18, %v1187_v31  ;;  %6644 = vmatprep.subr.bf16.mxu1 %v7854_v14  ;;  %v1109_v4 = vsel %vm1043_vm6, %v7908_v53, %v1108_v43  ;;  %v251_v41 = vmax.f32 %v214_v15, 0.0  ;;  %v1144_v42 = vsel %vm1037_vm3, %v7930_v50, %v7927_v38 }
 0x11e   :  { %6315 = vmatprep.mubr.f32.mxu0 %v1188_v6  ;;  %v422_v16 = vrot.slane %v408_v40, %v7770_v0  ;;  %v423_v33 = vcombine.high %v415_v52, %v415_v52  ;;  %v5686_v44 = vrot.slane %v415_v52, 9  ;;  %v1110_v13 = vsel %vm1045_vm7, %v7912_v49, %v1109_v4  ;;  %6722 = vmatpush3.bf16.msra.mxu0 %v7809_v32 }
 0x11f   :  { %v1111_v39 = vsel %vm1047_vm8, %v7915_v62, %v1110_v13  ;;  %v425_v20 = vcombine.high %v251_v41, %v251_v41  ;;  %v432_v53 = vrot.slane %v251_v41, %v7770_v0  ;;  %v1145_v23 = vsel %vm1039_vm4, %v7936_v59, %v1144_v42  ;;  %6724 = vmatprep.subr.bf16.mxu0 %v7822_v45 }
 0x120   :  { %6646 = vmatpush3.bf16.msra.mxu1 %v7864_v37  ;;  %v424_v29 = vcombine.high %v422_v16, %v422_v16  ;;  %v5687_v47 = vrot.slane %v423_v33, 9  ;;  %v5688_v30 = vrot.slane %v422_v16, 9  ;;  %v799_v43 = vmax.f32 %v415_v52, %v5686_v44 }
 0x121   :  { %6648 = vmatprep.subr.bf16.mxu1 %v7866_v2  ;;  %v1112_v32 = vsel %vm1049_vm9, %v7919_v34, %v1111_v39  ;;  %v439_v49 = vrot.slane %v425_v20, %v7770_v0  ;;  %v440_v62 = vcombine.high %v432_v53, %v432_v53  ;;  %v5690_v15 = vrot.slane %v432_v53, 9 }
 0x122   :  { %v5689_v36 = vrot.slane %v424_v29, 9  ;;  %v800_v31 = vmax.f32 %v423_v33, %v5687_v47  ;;  %v801_v40 = vmax.f32 %v422_v16, %v5688_v30  ;;  %v1618_v45 = vrot.slane %v799_v43, %v7803_v28  ;;  %6726 = vmatpush3.bf16.msra.mxu0 %v7833_v54  ;;  %v9973_v30 = vld [vmem:[#allocation6_spill] sm:$0xff] }
 0x123   :  { %v441_v6 = vcombine.high %v439_v49, %v439_v49  ;;  %v5691_v4 = vrot.slane %v440_v62, 9  ;;  %v5692_v41 = vrot.slane %v439_v49, 9  ;;  %v803_v52 = vmax.f32 %v432_v53, %v5690_v15  ;;  %6728 = vmatprep.subr.bf16.mxu0 %v7835_v55  ;;  %v9972_v53 = vld [vmem:[#allocation30_spill] sm:$0xff]  ;;  %v9974_v15 = vld [vmem:[#allocation7_spill] sm:$0xff] }
 0x124   :  { %v5683_v42 = vrot.slane %v8089_v22, 9  ;;  %v802_v34 = vmax.f32 %v424_v29, %v5689_v36  ;;  %v8224_v44 = vrot.slane %v800_v31, %v7803_v28  ;;  %v8228_v33 = vsel %vm1039_vm4, %v1618_v45, %v8138_v24  ;;  %6650 = vmatpush3.bf16.msra.mxu1 %v7884_v35 }
 0x125   :  { %v8232_v54 = vrot.slane %v801_v40, %v7803_v28  ;;  %v8236_v16 = vsel %vm1037_vm3, %v1618_v45, %v8117_v56  ;;  %6684 = vmatprep.subr.bf16.mxu1 %v7434_v11  ;;  %v5693_v55 = vrot.slane %v441_v6, 9  ;;  %v804_v13 = vmax.f32 %v440_v62, %v5691_v4 }
 0x126   :  { %v795_v39 = vmax.f32 %v8077_v1, %v5682_v3  ;;  %v1773_v24 = vsel %vm1037_vm3, %v8224_v44, %v1618_v45  ;;  %v805_v20 = vmax.f32 %v439_v49, %v5692_v41  ;;  %v1146_v29 = vsel %vm1041_vm5, %v9972_v53, %v1145_v23  ;;  %6730 = vmatpush3.bf16.msra.mxu0 %v7837_v57 }
 0x127   :  { %v8248_v56 = vrot.slane %v802_v34, %v7803_v28  ;;  %v8252_v11 = vsel %vm1039_vm4, %v8232_v54, %v1773_v24  ;;  %1345 = vmatmul.mubr.f32.vlgmr.msra.gmra.mrb[8].mxu1 %v1112_v32  ;;  %v8254_v47 = vmax.f32 %v441_v6, %v5693_v55  ;;  %v8257_v1 = vrot.slane %v803_v52, %v7803_v28  ;;  %v9975_v6 = vld [vmem:[#allocation8_spill] sm:$0xff]  ;;  %v9980_v24 = vld [vmem:[#allocation33_spill] sm:$0xff] }
 0x128   :  { %v1147_v3 = vsel %vm1043_vm6, %v7945_v26, %v1146_v29  ;;  %6686 = vmatpush3.bf16.msra.mxu1 %v9973_v30  ;;  %v1113_v57 = vsel %vm1037_vm3, %v7927_v38, %v7923_v17  ;;  %v1151_v23 = vsel %vm1037_vm3, %v7969_v21, %v7966_v60  ;;  %v1120_v43 = vsel %vm1037_vm3, %v7966_v60, %v7957_v19  ;;  %v9981_v29 = vld [vmem:[#allocation12_spill] sm:$0xff] }
 0x129   :  { %v8272_v32 = vrot.slane %v804_v13, %v7803_v28  ;;  %v1148_v49 = vsel %vm1045_vm7, %v7948_v63, %v1147_v3  ;;  %v1114_v62 = vsel %vm1039_vm4, %v7930_v50, %v1113_v57  ;;  %6688 = vmatprep.subr.bf16.mxu1 %v9974_v15  ;;  %v1152_v17 = vsel %vm1039_vm4, %v7983_v25, %v1151_v23  ;;  %v9978_v13 = vld [vmem:[#allocation11_spill] sm:$0xff]  ;;  %v9983_v15 = vld [vmem:[#allocation13_spill] sm:$0xff] }
 0x12a   :  { %v1149_v38 = vsel %vm1047_vm8, %v7954_v27, %v1148_v49  ;;  %v1115_v60 = vsel %vm1041_vm5, %v7936_v59, %v1114_v62  ;;  %v1153_v36 = vsel %vm1041_vm5, %v8020_v7, %v1152_v17  ;;  %v1121_v31 = vsel %vm1039_vm4, %v7969_v21, %v1120_v43  ;;  %6732 = vmatprep.subr.bf16.mxu0 %v7839_v58  ;;  %v9982_v49 = vld [vmem:[#allocation34_spill] sm:$0xff] }
 0x12b   :  { %v1150_v50 = vsel %vm1049_vm9, %v7957_v19, %v1149_v38  ;;  %v1116_v40 = vsel %vm1043_vm6, %v9972_v53, %v1115_v60  ;;  %v1154_v45 = vsel %vm1043_vm6, %v8033_v10, %v1153_v36  ;;  %v1122_v59 = vsel %vm1041_vm5, %v7983_v25, %v1121_v31  ;;  %6734 = vmatpush3.bf16.msra.mxu0 %v7848_v8 }
 0x12c   :  { %1349 = vmatprep.mubr.f32.mxu1 %v1150_v50  ;;  %v1117_v21 = vsel %vm1045_vm7, %v7945_v26, %v1116_v40  ;;  %v1155_v58 = vsel %vm1045_vm7, %v8051_v46, %v1154_v45  ;;  %6690 = vmatpush3.bf16.msra.mxu1 %v9975_v6  ;;  %v1123_v19 = vsel %vm1043_vm6, %v8020_v7, %v1122_v59  ;;  %v9976_v26 = vld [vmem:[#allocation10_spill] sm:$0xff] }
 0x12d   :  { %v1118_v4 = vsel %vm1047_vm8, %v7948_v63, %v1117_v21  ;;  %v1156_v25 = vsel %vm1047_vm8, %v8072_v5, %v1155_v58  ;;  %v1124_v8 = vsel %vm1045_vm7, %v8033_v10, %v1123_v19  ;;  %v796_v41 = vmax.f32 %v8089_v22, %v5683_v42  ;;  %6692 = vmatprep.subr.bf16.mxu1 %v9976_v26  ;;  %v9984_v50 = vld [vmem:[#allocation14_spill] sm:$0xff]  ;;  %v9985_v26 = vld [vmem:[#allocation16_spill] sm:$0xff] }
 0x12e   :  { %v1119_v52 = vsel %vm1049_vm9, %v7954_v27, %v1118_v4  ;;  %v1157_v34 = vsel %vm1049_vm9, %v8134_v51, %v1156_v25  ;;  %v1125_v7 = vsel %vm1047_vm8, %v8051_v46, %v1124_v8  ;;  %v1136_v63 = vrot.slane %v795_v39, %v7803_v28  ;;  %6736 = vmatprep.subr.bf16.mxu0 %v7850_v9  ;;  %v9977_v27 = vld [vmem:[#allocation31_spill] sm:$0xff]  ;;  %v9979_v9 = vld [vmem:[#allocation32_spill] sm:$0xff] }
 0x12f   :  { %v8323_v55 = vrot.slane %v805_v20, %v7803_v28  ;;  %1350 = vmatmul.mubr.f32.gmra.mrb[10].mxu1 %v1119_v52  ;;  %v1126_v10 = vsel %vm1049_vm9, %v8072_v5, %v1125_v7  ;;  %v1167_v22 = vrot.slane %v796_v41, %v7803_v28  ;;  %v219_v42 = vadd.f32 %v9977_v27, %v7742_v48 }
 0x130   :  { %1354 = vmatprep.mubr.f32.mxu1 %v1157_v34  ;;  %v1158_v46 = vsel %vm1037_vm3, %v1136_v63, %v8169_v18  ;;  %6694 = vmatpush3.bf16.msra.mxu1 %v9978_v13  ;;  %v224_v39 = vadd.f32 %v9979_v9, %v7742_v48  ;;  %v229_v20 = vadd.f32 %v9980_v24, %v7742_v48 }
 0x131   :  { %v1189_v53 = vsel %vm1037_vm3, %v1167_v22, %v1136_v63  ;;  %v1127_v5 = vsel %vm1037_vm3, %v8169_v18, %v8134_v51  ;;  %6696 = vmatprep.subr.bf16.mxu1 %v9981_v29  ;;  %v252_v3 = vmax.f32 %v219_v42, 0.0  ;;  %v1743_v30 = vsel %vm1039_vm4, %v8224_v44, %v8236_v16  ;;  %6738 = vmatpush3.bf16.msra.mxu0 %v7852_v12  ;;  %v9986_v63 = vld [vmem:[#allocation17_spill] sm:$0xff] }
 0x132   :  { %6316 = vmatmul.mubr.f32.gmra.mrb[32].mxu0 %v1189_v53  ;;  %v253_v57 = vmax.f32 %v224_v39, 0.0  ;;  %v254_v23 = vmax.f32 %v229_v20, 0.0  ;;  %v1744_v43 = vsel %vm1041_vm5, %v8232_v54, %v1743_v30  ;;  %v234_v62 = vadd.f32 %v9982_v49, %v7742_v48  ;;  %6740 = vmatprep.subr.bf16.mxu0 %v7854_v14  ;;  %v9987_v53 = vld [vmem:[#allocation18_spill] sm:$0xff]  ;;  %v9988_v30 = vld [vmem:[#allocation20_spill] sm:$0xff] }
 0x133   :  { %1355 = vmatmul.mubr.f32.gmra.mrb[12].mxu1 %v1126_v10  ;;  %v442_v51 = vcombine.high %v252_v3, %v252_v3  ;;  %v449_v18 = vrot.slane %v252_v3, %v7770_v0  ;;  %v1745_v16 = vsel %vm1043_vm6, %v8248_v56, %v1744_v43  ;;  %v239_v12 = vadd.f32 %v8126_v61, %v7742_v48 }
 0x134   :  { %1359 = vmatprep.mubr.f32.mxu1 %v1158_v46  ;;  %6698 = vmatpush3.bf16.msra.mxu1 %v9983_v15  ;;  %v459_v17 = vcombine.high %v253_v57, %v253_v57  ;;  %v466_v38 = vrot.slane %v253_v57, %v7770_v0  ;;  %v476_v60 = vcombine.high %v254_v23, %v254_v23  ;;  %v255_v22 = vmax.f32 %v234_v62, 0.0 }
 0x135   :  { %v456_v36 = vrot.slane %v442_v51, %v7770_v0  ;;  %v457_v14 = vcombine.high %v449_v18, %v449_v18  ;;  %v5694_v31 = vrot.slane %v449_v18, 9  ;;  %6700 = vmatprep.subr.bf16.mxu1 %v9984_v50  ;;  %v483_v40 = vrot.slane %v254_v23, %v7770_v0  ;;  %6742 = vmatpush3.bf16.msra.mxu0 %v7864_v37  ;;  %v9990_v50 = vld [vmem:[#allocation23_spill] sm:$0xff] }
 0x136   :  { %v473_v45 = vrot.slane %v459_v17, %v7770_v0  ;;  %v474_v48 = vcombine.high %v466_v38, %v466_v38  ;;  %v5698_v61 = vrot.slane %v466_v38, 9  ;;  %v490_v59 = vrot.slane %v476_v60, %v7770_v0  ;;  %6744 = vmatprep.subr.bf16.mxu0 %v7866_v2  ;;  %v9989_v60 = vld [vmem:[#allocation21_spill] sm:$0xff] }
 0x137   :  { %1360 = vmatmul.mubr.f32.gmra.mrb[14].mxu1 %v1127_v5  ;;  %v458_v21 = vcombine.high %v456_v36, %v456_v36  ;;  %v5695_v58 = vrot.slane %v457_v14, 9  ;;  %v5696_v6 = vrot.slane %v456_v36, 9  ;;  %v807_v19 = vmax.f32 %v449_v18, %v5694_v31 }
 0x138   :  { %v475_v4 = vcombine.high %v473_v45, %v473_v45  ;;  %v5699_v25 = vrot.slane %v474_v48, 9  ;;  %v5700_v8 = vrot.slane %v473_v45, 9  ;;  %v811_v41 = vmax.f32 %v466_v38, %v5698_v61  ;;  %6702 = vmatpush3.bf16.msra.mxu1 %v9985_v26 }
 0x139   :  { %v8368_v37 = vrot.slane %v8254_v47, %v7803_v28  ;;  %v5697_v52 = vrot.slane %v458_v21, 9  ;;  %v808_v34 = vmax.f32 %v457_v14, %v5695_v58  ;;  %v809_v7 = vmax.f32 %v456_v36, %v5696_v6  ;;  %6704 = vmatprep.subr.bf16.mxu1 %v9986_v63  ;;  %6746 = vmatpush3.bf16.msra.mxu0 %v7884_v35  ;;  %v9992_v63 = vld [vmem:[#allocation9_spill] sm:$0xff] }
 0x13a   :  { %v5701_v2 = vrot.slane %v475_v4, 9  ;;  %v812_v10 = vmax.f32 %v474_v48, %v5699_v25  ;;  %v256_v27 = vmax.f32 %v239_v12, 0.0  ;;  %v8373_v46 = vrot.slane %v807_v19, %v7803_v28 }
 0x13b   :  { %v810_v42 = vmax.f32 %v458_v21, %v5697_v52  ;;  %v813_v13 = vmax.f32 %v473_v45, %v5700_v8  ;;  %v491_v9 = vcombine.high %v483_v40, %v483_v40  ;;  %v8376_v47 = vrot.slane %v808_v34, %v7803_v28  ;;  %v9991_v8 = vld [vmem:[#allocation24_spill] sm:$0xff] }
 0x13c   :  { %v814_v39 = vmax.f32 %v475_v4, %v5701_v2  ;;  %v8379_v24 = vrot.slane %v811_v41, %v7803_v28  ;;  %v492_v20 = vcombine.high %v490_v59, %v490_v59  ;;  %6706 = vmatpush3.bf16.msra.mxu1 %v9987_v53  ;;  %v8383_v35 = vrot.slane %v809_v7, %v7803_v28 }
 0x13d   :  { %v5702_v5 = vrot.slane %v483_v40, 9  ;;  %v5703_v29 = vrot.slane %v491_v9, 9  ;;  %v5704_v3 = vrot.slane %v490_v59, 9  ;;  %6708 = vmatprep.subr.bf16.mxu1 %v9988_v30  ;;  %v8387_v57 = vrot.slane %v812_v10, %v7803_v28 }
 0x13e   :  { %v5705_v23 = vrot.slane %v492_v20, 9  ;;  %v1746_v43 = vsel %vm1045_vm7, %v8257_v1, %v1745_v16  ;;  %v493_v49 = vcombine.high %v255_v22, %v255_v22  ;;  %v8392_v62 = vrot.slane %v810_v42, %v7803_v28 }
 0x13f   :  { %v8395_v51 = vrot.slane %v813_v13, %v7803_v28  ;;  %v815_v18 = vmax.f32 %v483_v40, %v5702_v5  ;;  %v1747_v12 = vsel %vm1047_vm8, %v8272_v32, %v1746_v43  ;;  %v8400_v15 = vrot.slane %v814_v39, %v7803_v28 }
 0x140   :  { %v1748_v17 = vsel %vm1049_vm9, %v8323_v55, %v1747_v12  ;;  %v500_v38 = vrot.slane %v255_v22, %v7770_v0  ;;  %v507_v16 = vrot.slane %v493_v49, %v7770_v0  ;;  %6710 = vmatpush3.bf16.msra.mxu1 %v9989_v60  ;;  %v816_v36 = vmax.f32 %v491_v9, %v5703_v29 }
 0x141   :  { %v817_v14 = vmax.f32 %v490_v59, %v5704_v3  ;;  %v818_v31 = vmax.f32 %v492_v20, %v5705_v23  ;;  %1925 = vmatprep.mubr.f32.mxu1 %v1748_v17  ;;  %6712 = vmatprep.subr.bf16.mxu1 %v9990_v50  ;;  %v8409_v40 = vrot.slane %v815_v18, %v7803_v28 }
 0x142   :  { %v508_v45 = vcombine.high %v500_v38, %v500_v38  ;;  %v509_v48 = vcombine.high %v507_v16, %v507_v16  ;;  %v5706_v61 = vrot.slane %v500_v38, 9  ;;  %v5708_v21 = vrot.slane %v507_v16, 9 }
 0x143   :  { %v510_v58 = vcombine.high %v256_v27, %v256_v27  ;;  %v517_v6 = vrot.slane %v256_v27, %v7770_v0  ;;  %v1804_v19 = vsel %vm1037_vm3, %v8232_v54, %v8224_v44  ;;  %v8419_v26 = vrot.slane %v816_v36, %v7803_v28 }
 0x144   :  { %v5707_v4 = vrot.slane %v508_v45, 9  ;;  %v5709_v59 = vrot.slane %v509_v48, 9  ;;  %v819_v25 = vmax.f32 %v500_v38, %v5706_v61  ;;  %6714 = vmatpush3.bf16.msra.mxu1 %v9991_v8  ;;  %v1805_v41 = vsel %vm1039_vm4, %v8248_v56, %v1804_v19 }
 0x145   :  { %v8422_v52 = vrot.slane %v817_v14, %v7803_v28  ;;  %v821_v34 = vmax.f32 %v507_v16, %v5708_v21  ;;  %v5710_v7 = vrot.slane %v517_v6, 9  ;;  %6748 = vmatprep.subr.bf16.mxu1 %v9992_v63  ;;  %v8426_v2 = vrot.slane %v818_v31, %v7803_v28 }
 0x146   :  { %v820_v10 = vmax.f32 %v508_v45, %v5707_v4  ;;  %v822_v22 = vmax.f32 %v509_v48, %v5709_v59  ;;  %v1806_v27 = vsel %vm1041_vm5, %v8257_v1, %v1805_v41  ;;  %v8431_v42 = vrot.slane %v819_v25, %v7803_v28 }
 0x147   :  { %v8434_v13 = vrot.slane %v821_v34, %v7803_v28  ;;  %v8437_v9 = vrot.slane %v510_v58, %v7770_v0  ;;  %v8439_v39 = vcombine.high %v517_v6, %v517_v6  ;;  %v823_v5 = vmax.f32 %v517_v6, %v5710_v7  ;;  %v9993_v34 = vld [vmem:[#allocation15_spill] sm:$0xff] }
 0x148   :  { %v8442_v20 = vrot.slane %v820_v10, %v7803_v28  ;;  %v8445_v53 = vrot.slane %v822_v22, %v7803_v28  ;;  %v1807_v29 = vsel %vm1043_vm6, %v8272_v32, %v1806_v27  ;;  %v1775_v30 = vsel %vm1041_vm5, %v8248_v56, %v8252_v11 }
 0x149   :  { %v1808_v3 = vsel %vm1045_vm7, %v8323_v55, %v1807_v29  ;;  %v1713_v23 = vsel %vm1041_vm5, %v8224_v44, %v8228_v33  ;;  %v1749_v43 = vsel %vm1037_vm3, %v8373_v46, %v8368_v37  ;;  %v8461_v49 = vrot.slane %v823_v5, %v7803_v28 }
 0x14a   :  { %v1809_v18 = vsel %vm1047_vm8, %v8368_v37, %v1808_v3  ;;  %v1776_v12 = vsel %vm1043_vm6, %v8257_v1, %v1775_v30  ;;  %v1714_v11 = vsel %vm1043_vm6, %v8232_v54, %v1713_v23  ;;  %v1750_v38 = vsel %vm1039_vm4, %v8376_v47, %v1749_v43 }
 0x14b   :  { %v1810_v17 = vsel %vm1049_vm9, %v8373_v46, %v1809_v18  ;;  %v1777_v44 = vsel %vm1045_vm7, %v8272_v32, %v1776_v12  ;;  %v1715_v33 = vsel %vm1045_vm7, %v8248_v56, %v1714_v11  ;;  %v1751_v36 = vsel %vm1041_vm5, %v8383_v35, %v1750_v38 }
 0x14c   :  { %2010 = vmatprep.mubr.f32.mxu0 %v1810_v17  ;;  %v1778_v16 = vsel %vm1047_vm8, %v8323_v55, %v1777_v44  ;;  %v1716_v60 = vsel %vm1047_vm8, %v8257_v1, %v1715_v33  ;;  %v1718_v14 = vsel %vm1037_vm3, %v8368_v37, %v8323_v55  ;;  %v1752_v45 = vsel %vm1043_vm6, %v8392_v62, %v1751_v36 }
 0x14d   :  { %v1779_v31 = vsel %vm1049_vm9, %v8368_v37, %v1778_v16  ;;  %v1717_v50 = vsel %vm1049_vm9, %v8272_v32, %v1716_v60  ;;  %v1719_v48 = vsel %vm1039_vm4, %v8373_v46, %v1718_v14  ;;  %v5711_v61 = vrot.slane %v8439_v39, 9 }
 0x14e   :  { %2011 = vmatmul.mubr.f32.vlgmr.msra.gmra.mrb[34].mxu0 %v1779_v31  ;;  %1926 = vmatmul.mubr.f32.vlgmr.msra.gmra.mrb[16].mxu1 %v1717_v50  ;;  %v1753_v21 = vsel %vm1045_vm7, %v8379_v24, %v1752_v45  ;;  %v1720_v58 = vsel %vm1041_vm5, %v8376_v47, %v1719_v48  ;;  %v1811_v6 = vsel %vm1037_vm3, %v8383_v35, %v8376_v47  ;;  %v5712_v16 = vrot.slane %v8437_v9, 9  ;;  %v9994_v31 = vld [vmem:[#allocation19_spill] sm:$0xff] }
 0x14f   :  { %6750 = vmatpush3.bf16.msra.mxu1 %v9992_v63  ;;  %v1754_v19 = vsel %vm1047_vm8, %v8387_v57, %v1753_v21  ;;  %v1721_v4 = vsel %vm1043_vm6, %v8383_v35, %v1720_v58  ;;  %v1812_v59 = vsel %vm1039_vm4, %v8392_v62, %v1811_v6  ;;  %v1780_v25 = vsel %vm1037_vm3, %v8376_v47, %v8373_v46 }
 0x150   :  { %v1755_v8 = vsel %vm1049_vm9, %v8395_v51, %v1754_v19  ;;  %v1722_v41 = vsel %vm1045_vm7, %v8392_v62, %v1721_v4  ;;  %6752 = vmatprep.subr.bf16.mxu1 %v9993_v34  ;;  %v1813_v7 = vsel %vm1041_vm5, %v8379_v24, %v1812_v59  ;;  %v1781_v63 = vsel %vm1039_vm4, %v8383_v35, %v1780_v25 }
 0x151   :  { %1930 = vmatprep.mubr.f32.mxu1 %v1755_v8  ;;  %v1723_v10 = vsel %vm1047_vm8, %v8379_v24, %v1722_v41  ;;  %v1814_v22 = vsel %vm1043_vm6, %v8387_v57, %v1813_v7  ;;  %v1782_v27 = vsel %vm1041_vm5, %v8392_v62, %v1781_v63  ;;  %v1756_v5 = vsel %vm1037_vm3, %v8409_v40, %v8400_v15 }
 0x152   :  { %v1724_v29 = vsel %vm1049_vm9, %v8387_v57, %v1723_v10  ;;  %v1815_v3 = vsel %vm1045_vm7, %v8395_v51, %v1814_v22  ;;  %v1783_v30 = vsel %vm1043_vm6, %v8379_v24, %v1782_v27  ;;  %v1757_v23 = vsel %vm1039_vm4, %v8419_v26, %v1756_v5 }
 0x153   :  { %1931 = vmatmul.mubr.f32.gmra.mrb[18].mxu1 %v1724_v29  ;;  %v1816_v43 = vsel %vm1047_vm8, %v8400_v15, %v1815_v3  ;;  %v1784_v18 = vsel %vm1045_vm7, %v8387_v57, %v1783_v30  ;;  %v1758_v12 = vsel %vm1041_vm5, %v8422_v52, %v1757_v23  ;;  %v1725_v11 = vsel %vm1037_vm3, %v8400_v15, %v8395_v51  ;;  %v9996_v30 = vld [vmem:[#allocation25_spill] sm:$0xff] }
 0x154   :  { %v1817_v17 = vsel %vm1049_vm9, %v8409_v40, %v1816_v43  ;;  %6754 = vmatpush3.bf16.msra.mxu1 %v9993_v34  ;;  %v1785_v44 = vsel %vm1047_vm8, %v8395_v51, %v1784_v18  ;;  %v1759_v33 = vsel %vm1043_vm6, %v8426_v2, %v1758_v12  ;;  %v1726_v38 = vsel %vm1039_vm4, %v8409_v40, %v1725_v11 }
 0x155   :  { %2015 = vmatprep.mubr.f32.mxu0 %v1817_v17  ;;  %v1786_v60 = vsel %vm1049_vm9, %v8400_v15, %v1785_v44  ;;  %v1760_v36 = vsel %vm1045_vm7, %v8431_v42, %v1759_v33  ;;  %v1727_v14 = vsel %vm1041_vm5, %v8419_v26, %v1726_v38  ;;  %6756 = vmatprep.subr.bf16.mxu1 %v9994_v31 }
 0x156   :  { %2016 = vmatmul.mubr.f32.gmra.mrb[36].mxu0 %v1786_v60  ;;  %v1761_v50 = vsel %vm1047_vm8, %v8442_v20, %v1760_v36  ;;  %v1728_v45 = vsel %vm1043_vm6, %v8422_v52, %v1727_v14  ;;  %v1763_v48 = vsel %vm1037_vm3, %v8461_v49, %v8445_v53  ;;  %v1732_v21 = vsel %vm1037_vm3, %v8445_v53, %v8434_v13  ;;  %v5741_v14 = vld [vmem:[%s9896_s3 + $0x48] sm:$0xff] }
 0x157   :  { %v1762_v58 = vsel %vm1049_vm9, %v8434_v13, %v1761_v50  ;;  %v1729_v6 = vsel %vm1045_vm7, %v8426_v2, %v1728_v45  ;;  %v1835_v19 = vsel %vm1037_vm3, %v8248_v56, %v8232_v54  ;;  %v1818_v4 = vsel %vm1037_vm3, %v8422_v52, %v8419_v26  ;;  %v9995_v54 = vld [vmem:[#allocation22_spill] sm:$0xff]  ;;  %v5752_v50 = vld [vmem:[%s9896_s3 + $0x80] sm:$0xff]  ;;  %v5753_v45 = vld [vmem:[%s9896_s3 + $0x88] sm:$0xff] }
 0x158   :  { %1935 = vmatprep.mubr.f32.mxu1 %v1762_v58  ;;  %v1730_v59 = vsel %vm1047_vm8, %v8431_v42, %v1729_v6  ;;  %6758 = vmatpush3.bf16.msra.mxu1 %v9994_v31  ;;  %v1836_v25 = vsel %vm1039_vm4, %v8257_v1, %v1835_v19  ;;  %v1819_v8 = vsel %vm1039_vm4, %v8426_v2, %v1818_v4  ;;  %v5743_v58 = vld [vmem:[%s9896_s3 + $0x58] sm:$0xff]  ;;  %v5754_v6 = vld [vmem:[%s9896_s3 + $0x90] sm:$0xff] }
 0x159   :  { %v1731_v41 = vsel %vm1049_vm9, %v8442_v20, %v1730_v59  ;;  %6760 = vmatprep.subr.bf16.mxu1 %v9995_v54  ;;  %v1837_v56 = vsel %vm1041_vm5, %v8272_v32, %v1836_v25  ;;  %v1820_v34 = vsel %vm1041_vm5, %v8431_v42, %v1819_v8  ;;  %v1787_v7 = vsel %vm1037_vm3, %v8419_v26, %v8409_v40  ;;  %v5755_v19 = vld [vmem:[%s9896_s3 + $0x98] sm:$0xff]  ;;  %v5744_v25 = vld [vmem:[%s9896_s3 + $0x60] sm:$0xff]  ;;  %v5745_v8 = vld [vmem:[%s9896_s3 + $0x68] sm:$0xff] }
 0x15a   :  { %1936 = vmatmul.mubr.f32.gmra.mrb[20].mxu1 %v1731_v41  ;;  %v1838_v1 = vsel %vm1043_vm6, %v8323_v55, %v1837_v56  ;;  %v1821_v63 = vsel %vm1043_vm6, %v8442_v20, %v1820_v34  ;;  %v1788_v10 = vsel %vm1039_vm4, %v8422_v52, %v1787_v7  ;;  %v824_v32 = vmax.f32 %v8439_v39, %v5711_v61  ;;  %v5756_v41 = vld [vmem:[%s9896_s3 + $0xa0] sm:$0xff]  ;;  %v5746_v7 = vld [vmem:[%s9896_s3 + $0x70] sm:$0xff] }
 0x15b   :  { %1940 = vmatprep.mubr.f32.mxu1 %v1763_v48  ;;  %v1839_v22 = vsel %vm1045_vm7, %v8368_v37, %v1838_v1  ;;  %v1822_v27 = vsel %vm1045_vm7, %v8434_v13, %v1821_v63  ;;  %v1789_v55 = vsel %vm1041_vm5, %v8426_v2, %v1788_v10  ;;  %v825_v5 = vmax.f32 %v8437_v9, %v5712_v16  ;;  %v5742_v48 = vld [vmem:[%s9896_s3 + $0x50] sm:$0xff]  ;;  %v5747_v1 = vld [vmem:[%s9896_s3 + $0x78] sm:$0xff] }
 0x15c   :  { %6762 = vmatpush3.bf16.msra.mxu1 %v9995_v54  ;;  %v1840_v29 = vsel %vm1047_vm8, %v8373_v46, %v1839_v22  ;;  %v1823_v39 = vsel %vm1047_vm8, %v8445_v53, %v1822_v27  ;;  %v1790_v61 = vsel %vm1043_vm6, %v8431_v42, %v1789_v55  ;;  %v1772_v37 = vrot.slane %v824_v32, %v7803_v28  ;;  %v5757_v54 = vld [vmem:[%s9896_s3 + $0xa8] sm:$0xff]  ;;  %v5758_v63 = vld [vmem:[%s9896_s3 + $0xb0] sm:$0xff]  ;;  %v5759_v10 = vld [vmem:[%s9896_s3 + $0xb8] sm:$0xff] }
 0x15d   :  { %v1841_v3 = vsel %vm1049_vm9, %v8376_v47, %v1840_v29  ;;  %6764 = vmatprep.subr.bf16.mxu1 %v9996_v30  ;;  %v1824_v23 = vsel %vm1049_vm9, %v8461_v49, %v1823_v39  ;;  %v1791_v43 = vsel %vm1045_vm7, %v8442_v20, %v1790_v61  ;;  %v1803_v46 = vrot.slane %v825_v5, %v7803_v28  ;;  %v2247_v27 = vld [vmem:[%s9896_s3] sm:$0xff]  ;;  %v2248_v55 = vld [vmem:[%s9896_s3 + $0x8] sm:$0xff] }
 0x15e   :  { %1941 = vmatmul.mubr.f32.gmra.mrb[22].mxu1 %v1732_v21  ;;  %2020 = vmatprep.mubr.f32.mxu0 %v1824_v23  ;;  %v1792_v18 = vsel %vm1047_vm8, %v8434_v13, %v1791_v43  ;;  %v1842_v12 = vsel %vm1037_vm3, %v8392_v62, %v8383_v35  ;;  %v1849_v44 = vsel %vm1037_vm3, %v8426_v2, %v8422_v52  ;;  %v9997_v62 = vld [vmem:[#allocation26_spill] sm:$0xff]  ;;  %v5772_v5 = vld [vmem:[%s9896_s3 + $0x100] sm:$0xff]  ;;  %v5773_v29 = vld [vmem:[%s9896_s3 + $0x108] sm:$0xff] }
 0x15f   :  { %6350 = vmatprep.mubr.f32.mxu1 %v1841_v3  ;;  %v1793_v47 = vsel %vm1049_vm9, %v8445_v53, %v1792_v18  ;;  %v1825_v11 = vsel %vm1037_vm3, %v1803_v46, %v1772_v37  ;;  %v1843_v17 = vsel %vm1039_vm4, %v8379_v24, %v1842_v12  ;;  %v1850_v35 = vsel %vm1039_vm4, %v8431_v42, %v1849_v44 }
 0x160   :  { %6766 = vmatpush3.bf16.msra.mxu1 %v9996_v30  ;;  %2021 = vmatmul.mubr.f32.gmra.mrb[38].mxu0 %v1793_v47  ;;  %v1844_v33 = vsel %vm1041_vm5, %v8387_v57, %v1843_v17  ;;  %v1794_v38 = vsel %vm1037_vm3, %v1772_v37, %v8461_v49  ;;  %v1851_v52 = vsel %vm1041_vm5, %v8442_v20, %v1850_v35  ;;  %v9998_v20 = vld [vmem:[#allocation27_spill] sm:$0xff] }
 0x161   :  { %6768 = vmatprep.subr.bf16.mxu1 %v9997_v62  ;;  %2025 = vmatprep.mubr.f32.mxu0 %v1825_v11  ;;  %v1845_v24 = vsel %vm1043_vm6, %v8395_v51, %v1844_v33  ;;  %v526_v2 = vcombine.high %v8437_v9, %v8437_v9  ;;  %v1852_v42 = vsel %vm1043_vm6, %v8434_v13, %v1851_v52 }
 0x162   :  { %v1846_v57 = vsel %vm1045_vm7, %v8400_v15, %v1845_v24  ;;  %v1853_v60 = vsel %vm1045_vm7, %v8445_v53, %v1852_v42  ;;  %v8697_v21 = vpack.c.bf16 %v5753_v45, %v5752_v50  ;;  %v8709_v4 = vpack.c.bf16 %v5743_v58, %v5742_v48 }
 0x163   :  { %v1847_v16 = vsel %vm1047_vm8, %v8409_v40, %v1846_v57  ;;  %v1854_v9 = vsel %vm1047_vm8, %v8461_v49, %v1853_v60  ;;  %v5713_v13 = vrot.slane %v526_v2, 9  ;;  %v9999_v40 = vld [vmem:[#allocation28_spill] sm:$0xff]  ;;  %v8711_v59 = vpack.c.bf16 %v5755_v19, %v5754_v6 }
 0x164   :  { %6770 = vmatpush3.bf16.msra.mxu1 %v9997_v62  ;;  %2026 = vmatmul.mubr.f32.gmra.mrb[40].mxu0 %v1794_v38  ;;  %v1848_v51 = vsel %vm1049_vm9, %v8419_v26, %v1847_v16  ;;  %v1855_v15 = vsel %vm1049_vm9, %v1772_v37, %v1854_v9  ;;  %v5740_v49 = vld [vmem:[%s9896_s3 + $0x40] sm:$0xff]  ;;  %v8729_v56 = vpack.c.bf16 %v5745_v8, %v5744_v25 }
 0x165   :  { %6772 = vmatprep.subr.bf16.mxu1 %v9998_v20  ;;  %v826_v36 = vmax.f32 %v526_v2, %v5713_v13  ;;  %v8686_v31 = vpack.c.bf16 %v5741_v14, %v5740_v49  ;;  %v8732_v34 = vpack.c.bf16 %v5757_v54, %v5756_v41  ;;  %v8749_v32 = vpack.c.bf16 %v5747_v1, %v5746_v7  ;;  %v8781_v62 = vld [vmem:[%s9901_s8 + $0x7] ss:$0 sm:$0xff] }
 0x166   :  { %v8752_v22 = vpack.c.bf16 %v5759_v10, %v5758_v63  ;;  %v8769_v39 = vpack.c.bf16 %v2248_v55, %v2247_v27  ;;  %v8772_v61 = vpack.c.bf16 %v5773_v29, %v5772_v5 }
 0x167   :  { %v1834_v53 = vrot.slane %v826_v36, %v7803_v28  ;;  %6780 = vmatprep.subr.bf16.mxu0 %v8686_v31 }
 0x168   :  { %6774 = vmatpush3.bf16.msra.mxu1 %v9998_v20  ;;  %6782 = vmatpush3.bf16.msra.mxu0 %v8686_v31 }
 0x169   :  { %6776 = vmatprep.subr.bf16.mxu1 %v9999_v40  ;;  %v1856_v26 = vsel %vm1037_vm3, %v1834_v53, %v1803_v46  ;;  %6784 = vmatprep.subr.bf16.mxu0 %v8709_v4 }
 0x16c   :  { %6778 = vmatpush3.bf16.msra.mxu1 %v9999_v40  ;;  %6786 = vmatpush3.bf16.msra.mxu0 %v8709_v4 }
 0x16d   :  { %6812 = vmatprep.subr.bf16.mxu1 %v8697_v21  ;;  %6788 = vmatprep.subr.bf16.mxu0 %v8729_v56 }
 0x16f   :  { %6351 = vmatmul.mubr.f32.vlgmr.msra.gmra.mrb[24].mxu1 %v1848_v51 }
 0x170   :  { %6353 = vmatprep.mubr.f32.mxu1 %v1855_v15  ;;  %6814 = vmatpush3.bf16.msra.mxu1 %v8697_v21 }
 0x171   :  { %6816 = vmatprep.subr.bf16.mxu1 %v8711_v59  ;;  %6790 = vmatpush3.bf16.msra.mxu0 %v8729_v56 }
 0x172   :  { %6792 = vmatprep.subr.bf16.mxu0 %v8749_v32 }
 0x173   :  { %6354 = vmatmul.mubr.f32.gmra.mrb[26].mxu1 %v1856_v26 }
 0x174   :  { %6818 = vmatpush3.bf16.msra.mxu1 %v8711_v59 }
 0x175   :  { %6820 = vmatprep.subr.bf16.mxu1 %v8732_v34  ;;  %6794 = vmatpush3.bf16.msra.mxu0 %v8749_v32 }
 0x176   :  { %6796 = vmatprep.subr.bf16.mxu0 %v8769_v39 }
 0x178   :  { %6822 = vmatpush3.bf16.msra.mxu1 %v8732_v34 }
 0x179   :  { %6824 = vmatprep.subr.bf16.mxu1 %v8752_v22 }
 0x17c   :  { %6826 = vmatpush3.bf16.msra.mxu1 %v8752_v22 }
 0x17d   :  { %6844 = vmatprep.subr.bf16.mxu1 %v8772_v61 }
 0x1d9   :  { %v5927_v37 = vpop.f32.mrb[0].mxu1 }
 0x1da   :  { %v5928_v3 = vpop.f32.mrb[1].mxu1 }
 0x1db   :  { %v5929_v30 = vadd.f32 %v5928_v3, %v5927_v37 }
 0x1dd   :  { %v1262_v52 = vadd.f32 %v5929_v30, %v8781_v62 }
 0x1e2   :  { %v5930_v23 = vpop.f32.mrb[2].mxu1 }
 0x1e3   :  { %v5931_v43 = vpop.f32.mrb[3].mxu1 }
 0x1e4   :  { %v5932_v46 = vadd.f32 %v5931_v43, %v5930_v23 }
 0x1e6   :  { %v1267_v9 = vadd.f32 %v5932_v46, %v8781_v62 }
 0x1e8   :  { %v6314_v18 = vpop.f32.mrb[30].mxu0 }
 0x1e9   :  { %v1431_v12 = vpop.f32.mrb[31].mxu0 }
 0x1ea   :  { %v5933_v47 = vpop.f32.mrb[4].mxu1 }
 0x1eb   :  { %v5934_v11 = vpop.f32.mrb[5].mxu1 }
 0x1ec   :  { %v5935_v17 = vadd.f32 %v5934_v11, %v5933_v47 }
 0x1ee   :  { %v5936_v44 = vpop.f32.mrb[6].mxu1  ;;  %v1272_v25 = vadd.f32 %v5935_v17, %v8781_v62 }
 0x1ef   :  { %v5937_v33 = vpop.f32.mrb[7].mxu1 }
 0x1f0   :  { %v5938_v35 = vadd.f32 %v5937_v33, %v5936_v44 }
 0x1f2   :  { %v1277_v10 = vadd.f32 %v5938_v35, %v8781_v62 }
 0x1fa   :  { %v5971_v38 = vpop.f32.mrb[8].mxu1 }
 0x1fb   :  { %v5972_v24 = vpop.f32.mrb[9].mxu1 }
 0x1fc   :  { %v5973_v2 = vadd.f32 %v5972_v24, %v5971_v38 }
 0x1fe   :  { %v1347_v57 = vadd.f32 %v5973_v2, %v1262_v52 }
 0x200   :  { %v1432_v42 = vadd.f32 %v1431_v12, %v1347_v57 }
 0x202   :  { %v1450_v16 = vmax.f32 %v1432_v42, 0.0  ;;  %v5974_v60 = vpop.f32.mrb[10].mxu1 }
 0x203   :  { %v5975_v51 = vpop.f32.mrb[11].mxu1 }
 0x204   :  { %v1458_v20 = vcombine.high %v1450_v16, %v1450_v16  ;;  %v1465_v15 = vrot.slane %v1450_v16, %v7770_v0  ;;  %v5976_v13 = vadd.f32 %v5975_v51, %v5974_v60 }
 0x205   :  { %v6317_v40 = vpop.f32.mrb[32].mxu0 }
 0x206   :  { %v1472_v36 = vrot.slane %v1458_v20, %v7770_v0  ;;  %v1473_v53 = vcombine.high %v1465_v15, %v1465_v15  ;;  %v5714_v26 = vrot.slane %v1465_v15, 9  ;;  %v1352_v49 = vadd.f32 %v5976_v13, %v1267_v9  ;;  %v5977_v14 = vpop.f32.mrb[12].mxu1  ;;  %v1441_v50 = vpop.f32.mrb[33].mxu0 }
 0x207   :  { %v5978_v45 = vpop.f32.mrb[13].mxu1 }
 0x208   :  { %v1474_v48 = vcombine.high %v1472_v36, %v1472_v36  ;;  %v5715_v58 = vrot.slane %v1473_v53, 9  ;;  %v5716_v6 = vrot.slane %v1472_v36, 9  ;;  %v1568_v19 = vmax.f32 %v1465_v15, %v5714_v26 }
 0x209   :  { %v1437_v8 = vadd.f32 %v6314_v18, %v1352_v49  ;;  %v5979_v41 = vadd.f32 %v5978_v45, %v5977_v14  ;;  %v2250_v45 = vld [vmem:[%s9896_s3 + $0x18] sm:$0xff] }
 0x20a   :  { %v5717_v54 = vrot.slane %v1474_v48, 9  ;;  %v1569_v7 = vmax.f32 %v1473_v53, %v5715_v58  ;;  %v1570_v1 = vmax.f32 %v1472_v36, %v5716_v6  ;;  %v5980_v63 = vpop.f32.mrb[14].mxu1  ;;  %v2399_v27 = vrot.slane %v1568_v19, %v7803_v28 }
 0x20b   :  { %v1451_v55 = vmax.f32 %v1437_v8, 0.0  ;;  %v1357_v5 = vadd.f32 %v5979_v41, %v1272_v25  ;;  %v5981_v29 = vpop.f32.mrb[15].mxu1 }
 0x20c   :  { %v1571_v37 = vmax.f32 %v1474_v48, %v5717_v54  ;;  %v2276_v3 = vrot.slane %v1569_v7, %v7803_v28  ;;  %v2280_v30 = vrot.slane %v1570_v1, %v7803_v28  ;;  %v5982_v23 = vadd.f32 %v5981_v29, %v5980_v63  ;;  %v5774_v7 = vld [vmem:[%s9896_s3 + $0x110] sm:$0xff]  ;;  %v5775_v1 = vld [vmem:[%s9896_s3 + $0x118] sm:$0xff] }
 0x20d   :  { %v1475_v43 = vcombine.high %v1451_v55, %v1451_v55  ;;  %v1482_v46 = vrot.slane %v1451_v55, %v7770_v0  ;;  %v1442_v18 = vadd.f32 %v1441_v50, %v1357_v5  ;;  %v2249_v50 = vld [vmem:[%s9896_s3 + $0x10] sm:$0xff] }
 0x20e   :  { %v8794_v12 = vrot.slane %v1571_v37, %v7803_v28  ;;  %v1362_v47 = vadd.f32 %v5982_v23, %v1277_v10  ;;  %v2309_v11 = vsel %vm1037_vm3, %v2280_v30, %v2276_v3  ;;  %v2400_v17 = vsel %vm1037_vm3, %v2276_v3, %v2399_v27 }
 0x20f   :  { %v1489_v44 = vrot.slane %v1475_v43, %v7770_v0  ;;  %v1490_v33 = vcombine.high %v1482_v46, %v1482_v46  ;;  %v5718_v35 = vrot.slane %v1482_v46, 9  ;;  %v1452_v38 = vmax.f32 %v1442_v18, 0.0 }
 0x210   :  { %v8799_v24 = vadd.f32 %v6317_v40, %v1362_v47  ;;  %v2401_v52 = vsel %vm1039_vm4, %v2280_v30, %v2400_v17  ;;  %v2310_v9 = vsel %vm1039_vm4, %v8794_v12, %v2309_v11  ;;  %v2499_v20 = vsel %vm1037_vm3, %v8794_v12, %v2280_v30 }
 0x211   :  { %v1491_v2 = vcombine.high %v1489_v44, %v1489_v44  ;;  %v5719_v57 = vrot.slane %v1490_v33, 9  ;;  %v5720_v42 = vrot.slane %v1489_v44, 9  ;;  %v1572_v16 = vmax.f32 %v1482_v46, %v5718_v35 }
 0x212   :  { %v1492_v60 = vcombine.high %v1452_v38, %v1452_v38  ;;  %v1499_v51 = vrot.slane %v1452_v38, %v7770_v0  ;;  %v2402_v14 = vsel %vm1041_vm5, %v8794_v12, %v2401_v52  ;;  %v8829_v55 = vpack.c.bf16 %v2250_v45, %v2249_v50 }
 0x213   :  { %v5721_v15 = vrot.slane %v1491_v2, 9  ;;  %v1573_v13 = vmax.f32 %v1490_v33, %v5719_v57  ;;  %v1574_v40 = vmax.f32 %v1489_v44, %v5720_v42  ;;  %v2288_v36 = vrot.slane %v1572_v16, %v7803_v28  ;;  %v2251_v42 = vld [vmem:[%s9896_s3 + $0x20] sm:$0xff]  ;;  %v2252_v16 = vld [vmem:[%s9896_s3 + $0x28] sm:$0xff] }
 0x214   :  { %v1506_v53 = vrot.slane %v1492_v60, %v7770_v0  ;;  %v1507_v26 = vcombine.high %v1499_v51, %v1499_v51  ;;  %v5722_v49 = vrot.slane %v1499_v51, 9  ;;  %v8837_v46 = vpack.c.bf16 %v5775_v1, %v5774_v7 }
 0x215   :  { %v1575_v48 = vmax.f32 %v1491_v2, %v5721_v15  ;;  %v2292_v58 = vrot.slane %v1573_v13, %v7803_v28  ;;  %v2296_v6 = vrot.slane %v1574_v40, %v7803_v28  ;;  %v2311_v19 = vsel %vm1041_vm5, %v2288_v36, %v2310_v9  ;;  %v5776_v40 = vld [vmem:[%s9896_s3 + $0x120] sm:$0xff] }
 0x216   :  { %v1508_v25 = vcombine.high %v1506_v53, %v1506_v53  ;;  %v5723_v8 = vrot.slane %v1507_v26, 9  ;;  %v5724_v41 = vrot.slane %v1506_v53, 9  ;;  %v1576_v54 = vmax.f32 %v1499_v51, %v5722_v49  ;;  %v2253_v49 = vld [vmem:[%s9896_s3 + $0x30] sm:$0xff] }
 0x217   :  { %v2300_v63 = vrot.slane %v1575_v48, %v7803_v28  ;;  %v2312_v10 = vsel %vm1043_vm6, %v2292_v58, %v2311_v19  ;;  %v2500_v27 = vsel %vm1039_vm4, %v2288_v36, %v2499_v20  ;;  %v2403_v43 = vsel %vm1043_vm6, %v2288_v36, %v2402_v14  ;;  %v2254_v14 = vld [vmem:[%s9896_s3 + $0x38] sm:$0xff] }
 0x218   :  { %v5725_v5 = vrot.slane %v1508_v25, 9  ;;  %v1577_v29 = vmax.f32 %v1507_v26, %v5723_v8  ;;  %v1578_v37 = vmax.f32 %v1506_v53, %v5724_v41  ;;  %v8832_v3 = vrot.slane %v1576_v54, %v7803_v28  ;;  %v5777_v53 = vld [vmem:[%s9896_s3 + $0x128] sm:$0xff] }
 0x219   :  { %v2313_v30 = vsel %vm1045_vm7, %v2296_v6, %v2312_v10  ;;  %v2501_v23 = vsel %vm1041_vm5, %v2292_v58, %v2500_v27  ;;  %v1453_v47 = vmax.f32 %v8799_v24, 0.0  ;;  %v2404_v38 = vsel %vm1045_vm7, %v2292_v58, %v2403_v43  ;;  %v5778_v10 = vld [vmem:[%s9896_s3 + $0x130] sm:$0xff]  ;;  %v5779_v27 = vld [vmem:[%s9896_s3 + $0x138] sm:$0xff]  ;;  %v5763_v43 = vld [vmem:[%s9896_s3 + $0xc8] sm:$0xff] }
 0x21a   :  { %v2308_v18 = vrot.slane %v1577_v29, %v7803_v28  ;;  %v2314_v11 = vsel %vm1047_vm8, %v2300_v63, %v2313_v30  ;;  %v2502_v17 = vsel %vm1043_vm6, %v2296_v6, %v2501_v23  ;;  %v2498_v44 = vrot.slane %v1578_v37, %v7803_v28  ;;  %v5762_v23 = vld [vmem:[%s9896_s3 + $0xc0] sm:$0xff] }
 0x21b   :  { %v2315_v33 = vsel %vm1049_vm9, %v8832_v3, %v2314_v11  ;;  %v2503_v35 = vsel %vm1045_vm7, %v2300_v63, %v2502_v17  ;;  %v2405_v24 = vsel %vm1047_vm8, %v2296_v6, %v2404_v38  ;;  %v1579_v2 = vmax.f32 %v1508_v25, %v5725_v5 }
 0x21c   :  { %6372 = vmatprep.mubr.msk.f32.mxu0 %vm2316_vm10, %v2315_v33  ;;  %v2504_v52 = vsel %vm1047_vm8, %v8832_v3, %v2503_v35  ;;  %v2699_v57 = vsel %vm1037_vm3, %v2292_v58, %v2288_v36  ;;  %v2406_v51 = vsel %vm1049_vm9, %v2300_v63, %v2405_v24  ;;  %v2599_v20 = vsel %vm1037_vm3, %v2288_v36, %v8794_v12  ;;  %v5765_v24 = vld [vmem:[%s9896_s3 + $0xd8] sm:$0xff] }
 0x21d   :  { %6373 = vmatmul.mubr.msk.f32.vlgmr.msra.gmra.mrb[42].mxu0 %vm2316_vm10, %v2308_v18  ;;  %v2505_v60 = vsel %vm1049_vm9, %v2308_v18, %v2504_v52  ;;  %v2700_v9 = vsel %vm1039_vm4, %v2296_v6, %v2699_v57  ;;  %v8868_v15 = vrot.slane %v1579_v2, %v7803_v28  ;;  %v2600_v26 = vsel %vm1039_vm4, %v2292_v58, %v2599_v20  ;;  %v5764_v52 = vld [vmem:[%s9896_s3 + $0xd0] sm:$0xff]  ;;  %v5767_v20 = vld [vmem:[%s9896_s3 + $0xe8] sm:$0xff] }
 0x21e   :  { %6798 = vmatpush3.bf16.msra.mxu0 %v8769_v39  ;;  %6410 = vmatprep.mubr.msk.f32.mxu1 %vm2316_vm10, %v2505_v60  ;;  %v2701_v13 = vsel %vm1041_vm5, %v2300_v63, %v2700_v9  ;;  %v8882_v36 = vpack.c.bf16 %v2252_v16, %v2251_v42  ;;  %v2601_v50 = vsel %vm1041_vm5, %v2296_v6, %v2600_v26  ;;  %v5766_v9 = vld [vmem:[%s9896_s3 + $0xe0] sm:$0xff] }
 0x21f   :  { %6391 = vmatprep.mubr.msk.f32.mxu0 %vm2316_vm10, %v2406_v51  ;;  %6411 = vmatmul.mubr.msk.f32.vlgmr.msra.gmra.mrb[28].mxu1 %vm2316_vm10, %v2498_v44  ;;  %v2702_v12 = vsel %vm1043_vm6, %v8832_v3, %v2701_v13  ;;  %v2602_v48 = vsel %vm1043_vm6, %v2300_v63, %v2601_v50  ;;  %v1515_v58 = vrot.slane %v1453_v47, %v7770_v0 }
 0x220   :  { %6846 = vmatpush3.bf16.msra.mxu1 %v8772_v61  ;;  %v2703_v45 = vsel %vm1045_vm7, %v2308_v18, %v2702_v12  ;;  %6800 = vmatprep.subr.bf16.mxu0 %v8829_v55  ;;  %v8898_v41 = vpack.c.bf16 %v5777_v53, %v5776_v40  ;;  %v2603_v6 = vsel %vm1045_vm7, %v8832_v3, %v2602_v48 }
 0x221   :  { %v6079_v19 = vpop.f32.mrb[34].mxu0  ;;  %v2704_v25 = vsel %vm1047_vm8, %v2498_v44, %v2703_v45  ;;  %v6035_v8 = vpop.f32.mrb[16].mxu1  ;;  %6848 = vmatprep.subr.bf16.mxu1 %v8837_v46  ;;  %v8905_v63 = vpack.c.bf16 %v2254_v14, %v2253_v49  ;;  %v2604_v5 = vsel %vm1047_vm8, %v2308_v18, %v2603_v6  ;;  %v5726_v47 = vrot.slane %v1515_v58, 9  ;;  %v5769_v14 = vld [vmem:[%s9896_s3 + $0xf8] sm:$0xff] }
 0x222   :  { %v6080_v54 = vpop.f32.mrb[35].mxu0  ;;  %v2705_v7 = vsel %vm1049_vm9, %v8868_v15, %v2704_v25  ;;  %v6036_v1 = vpop.f32.mrb[17].mxu1  ;;  %6802 = vmatpush3.bf16.msra.mxu0 %v8829_v55  ;;  %v2605_v30 = vsel %vm1049_vm9, %v2498_v44, %v2604_v5  ;;  %v8926_v11 = vpack.c.bf16 %v5779_v27, %v5778_v10  ;;  %v8930_v33 = vpack.c.bf16 %v5763_v43, %v5762_v23 }
 0x223   :  { %v6081_v29 = vadd.f32 %v6080_v54, %v6079_v19  ;;  %6448 = vmatprep.mubr.msk.f32.mxu1 %vm2316_vm10, %v2705_v7  ;;  %v6037_v37 = vadd.f32 %v6036_v1, %v6035_v8  ;;  %6804 = vmatprep.subr.bf16.mxu0 %v8882_v36  ;;  %v1580_v2 = vmax.f32 %v1515_v58, %v5726_v47 }
 0x224   :  { %6850 = vmatpush3.bf16.msra.mxu1 %v8837_v46  ;;  %v8945_v51 = vpack.c.bf16 %v5765_v24, %v5764_v52  ;;  %v8962_v49 = vpack.c.bf16 %v5767_v20, %v5766_v9 }
 0x225   :  { %v1928_v18 = vadd.f32 %v6037_v37, %v8781_v62  ;;  %6852 = vmatprep.subr.bf16.mxu1 %v8898_v41  ;;  %v2698_v13 = vrot.slane %v1580_v2, %v7803_v28 }
 0x226   :  { %v6038_v17 = vpop.f32.mrb[18].mxu1  ;;  %6806 = vmatpush3.bf16.msra.mxu0 %v8882_v36 }
 0x227   :  { %v6039_v44 = vpop.f32.mrb[19].mxu1  ;;  %6808 = vmatprep.subr.bf16.mxu0 %v8905_v63  ;;  %v8932_v35 = vadd.f32 %v6081_v29, %v1928_v18 }
 0x228   :  { %v6040_v38 = vadd.f32 %v6039_v44, %v6038_v17  ;;  %6854 = vmatpush3.bf16.msra.mxu1 %v8898_v41 }
 0x229   :  { %v6082_v57 = vpop.f32.mrb[36].mxu0  ;;  %6856 = vmatprep.subr.bf16.mxu1 %v8926_v11 }
 0x22a   :  { %v1933_v42 = vadd.f32 %v6040_v38, %v8781_v62  ;;  %v6083_v16 = vpop.f32.mrb[37].mxu0  ;;  %6810 = vmatpush3.bf16.msra.mxu0 %v8905_v63 }
 0x22b   :  { %v6084_v60 = vadd.f32 %v6083_v16, %v6082_v57  ;;  %6828 = vmatprep.subr.bf16.mxu0 %v8930_v33 }
 0x22c   :  { %6858 = vmatpush3.bf16.msra.mxu1 %v8926_v11 }
 0x22d   :  { %6392 = vmatmul.mubr.msk.f32.vlgmr.msra.gmra.mrb[44].mxu0 %vm2316_vm10, %v8832_v3  ;;  %v6041_v40 = vpop.f32.mrb[20].mxu1  ;;  %v2018_v53 = vadd.f32 %v6084_v60, %v1933_v42  ;;  %6876 = vmatprep.subr.bf16.mxu1 %v8769_v39  ;;  %v5768_v3 = vld [vmem:[%s9896_s3 + $0xf0] sm:$0xff] }
 0x22e   :  { %6830 = vmatpush3.bf16.msra.mxu0 %v8930_v33  ;;  %6429 = vmatprep.mubr.msk.f32.mxu0 %vm2316_vm10, %v2605_v30  ;;  %v6042_v26 = vpop.f32.mrb[21].mxu1  ;;  %v8975_v25 = vpack.c.bf16 %v5769_v14, %v5768_v3 }
 0x22f   :  { %6449 = vmatmul.mubr.msk.f32.vlgmr.msra.gmra.mrb[30].mxu1 %vm2316_vm10, %v2698_v13  ;;  %6832 = vmatprep.subr.bf16.mxu0 %v8945_v51  ;;  %v6043_v12 = vadd.f32 %v6042_v26, %v6041_v40 }
 0x230   :  { %6878 = vmatpush3.bf16.msra.mxu1 %v8769_v39 }
 0x231   :  { %v6044_v50 = vpop.f32.mrb[22].mxu1  ;;  %6880 = vmatprep.subr.bf16.mxu1 %v8829_v55  ;;  %v1938_v48 = vadd.f32 %v6043_v12, %v8781_v62 }
 0x232   :  { %6834 = vmatpush3.bf16.msra.mxu0 %v8945_v51  ;;  %v6045_v45 = vpop.f32.mrb[23].mxu1 }
 0x233   :  { %6836 = vmatprep.subr.bf16.mxu0 %v8962_v49  ;;  %v6085_v58 = vpop.f32.mrb[38].mxu0  ;;  %v6046_v19 = vadd.f32 %v6045_v45, %v6044_v50 }
 0x234   :  { %v6086_v8 = vpop.f32.mrb[39].mxu0  ;;  %6882 = vmatpush3.bf16.msra.mxu1 %v8829_v55 }
 0x235   :  { %v6087_v6 = vadd.f32 %v6086_v8, %v6085_v58  ;;  %6884 = vmatprep.subr.bf16.mxu1 %v8882_v36  ;;  %v1943_v39 = vadd.f32 %v6046_v19, %v8781_v62 }
 0x236   :  { %6838 = vmatpush3.bf16.msra.mxu0 %v8962_v49 }
 0x237   :  { %v6088_v54 = vpop.f32.mrb[40].mxu0  ;;  %6840 = vmatprep.subr.bf16.mxu0 %v8975_v25  ;;  %v2023_v7 = vadd.f32 %v6087_v6, %v1938_v48 }
 0x238   :  { %v6089_v1 = vpop.f32.mrb[41].mxu0  ;;  %6886 = vmatpush3.bf16.msra.mxu1 %v8882_v36 }
 0x239   :  { %v6090_v10 = vadd.f32 %v6089_v1, %v6088_v54  ;;  %6888 = vmatprep.subr.bf16.mxu1 %v8905_v63 }
 0x23a   :  { %6842 = vmatpush3.bf16.msra.mxu0 %v8975_v25 }
 0x23b   :  { %v2028_v55 = vadd.f32 %v6090_v10, %v1943_v39  ;;  %6860 = vmatprep.subr.bf16.mxu0 %v8686_v31 }
 0x23c   :  { %6890 = vmatpush3.bf16.msra.mxu1 %v8905_v63 }
 0x23d   :  { %6430 = vmatmul.mubr.msk.f32.vlgmr.msra.gmra.mrb[46].mxu0 %vm2316_vm10, %v8868_v15  ;;  %6908 = vmatprep.subr.bf16.mxu1 %v8930_v33 }
 0x23e   :  { %6862 = vmatpush3.bf16.msra.mxu0 %v8686_v31 }
 0x23f   :  { %6864 = vmatprep.subr.bf16.mxu0 %v8709_v4 }
 0x242   :  { %v6352_v62 = vpop.f32.mrb[24].mxu1  ;;  %6866 = vmatpush3.bf16.msra.mxu0 %v8709_v4 }
 0x243   :  { %v2103_v36 = vadd.f32 %v6352_v62, %v2018_v53  ;;  %v2097_v27 = vpop.f32.mrb[25].mxu1  ;;  %6868 = vmatprep.subr.bf16.mxu0 %v8729_v56 }
 0x244   :  { %v2098_v5 = vadd.f32 %v2097_v27, %v8932_v35 }
 0x245   :  { %v2117_v29 = vmax.f32 %v2103_v36, 0.0 }
 0x246   :  { %v2116_v63 = vmax.f32 %v2098_v5, 0.0  ;;  %v6355_v37 = vpop.f32.mrb[26].mxu1  ;;  %6870 = vmatpush3.bf16.msra.mxu0 %v8729_v56 }
 0x247   :  { %v2141_v15 = vcombine.high %v2117_v29, %v2117_v29  ;;  %v2148_v30 = vrot.slane %v2117_v29, %v7770_v0  ;;  %v8997_v31 = vadd.f32 %v6355_v37, %v2028_v55  ;;  %v2107_v23 = vpop.f32.mrb[27].mxu1  ;;  %6872 = vmatprep.subr.bf16.mxu0 %v8749_v32 }
 0x248   :  { %v2124_v4 = vcombine.high %v2116_v63, %v2116_v63  ;;  %v2131_v43 = vrot.slane %v2116_v63, %v7770_v0  ;;  %v2108_v47 = vadd.f32 %v2107_v23, %v2023_v7 }
 0x249   :  { %v2155_v18 = vrot.slane %v2141_v15, %v7770_v0  ;;  %v2156_v17 = vcombine.high %v2148_v30, %v2148_v30  ;;  %v5731_v44 = vrot.slane %v2148_v30, 9 }
 0x24a   :  { %v2138_v35 = vrot.slane %v2124_v4, %v7770_v0  ;;  %v2139_v38 = vcombine.high %v2131_v43, %v2131_v43  ;;  %v5727_v56 = vrot.slane %v2131_v43, 9  ;;  %6874 = vmatpush3.bf16.msra.mxu0 %v8749_v32  ;;  %v2118_v57 = vmax.f32 %v2108_v47, 0.0 }
 0x24b   :  { %v2157_v52 = vcombine.high %v2155_v18, %v2155_v18  ;;  %v5732_v24 = vrot.slane %v2156_v17, 9  ;;  %v5733_v2 = vrot.slane %v2155_v18, 9  ;;  %6892 = vmatprep.subr.bf16.mxu0 %v8697_v21  ;;  %v2238_v13 = vmax.f32 %v2148_v30, %v5731_v44 }
 0x24c   :  { %v2140_v42 = vcombine.high %v2138_v35, %v2138_v35  ;;  %v5728_v16 = vrot.slane %v2139_v38, 9  ;;  %v5729_v60 = vrot.slane %v2138_v35, 9  ;;  %v2234_v9 = vmax.f32 %v2131_v43, %v5727_v56 }
 0x24d   :  { %v5734_v20 = vrot.slane %v2157_v52, 9  ;;  %v2239_v40 = vmax.f32 %v2156_v17, %v5732_v24  ;;  %v2240_v53 = vmax.f32 %v2155_v18, %v5733_v2  ;;  %v2158_v19 = vcombine.high %v2118_v57, %v2118_v57 }
 0x24e   :  { %v5730_v26 = vrot.slane %v2140_v42, 9  ;;  %v2235_v12 = vmax.f32 %v2139_v38, %v5728_v16  ;;  %v2236_v3 = vmax.f32 %v2138_v35, %v5729_v60  ;;  %v2960_v50 = vrot.slane %v2234_v9, %v7803_v28 }
 0x24f   :  { %v2241_v14 = vmax.f32 %v2157_v52, %v5734_v20  ;;  %v2854_v32 = vrot.slane %v2239_v40, %v7803_v28  ;;  %v2850_v8 = vrot.slane %v2238_v13, %v7803_v28  ;;  %v2858_v6 = vrot.slane %v2240_v53, %v7803_v28 }
 0x250   :  { %v2237_v45 = vmax.f32 %v2140_v42, %v5730_v26  ;;  %v2838_v48 = vrot.slane %v2235_v12, %v7803_v28  ;;  %v2842_v58 = vrot.slane %v2236_v3, %v7803_v28  ;;  %v2165_v39 = vrot.slane %v2118_v57, %v7770_v0 }
 0x251   :  { %v2862_v54 = vrot.slane %v2241_v14, %v7803_v28  ;;  %v2172_v10 = vrot.slane %v2158_v19, %v7770_v0  ;;  %v3233_v37 = vsel %vm1037_vm3, %v2854_v32, %v2850_v8 }
 0x252   :  { %v2846_v7 = vrot.slane %v2237_v45, %v7803_v28  ;;  %v2961_v1 = vsel %vm1037_vm3, %v2838_v48, %v2960_v50  ;;  %v2871_v55 = vsel %vm1037_vm3, %v2842_v58, %v2838_v48  ;;  %v2173_v62 = vcombine.high %v2165_v39, %v2165_v39 }
 0x253   :  { %v5735_v36 = vrot.slane %v2165_v39, 9  ;;  %v2962_v27 = vsel %vm1039_vm4, %v2842_v58, %v2961_v1  ;;  %v2174_v5 = vcombine.high %v2172_v10, %v2172_v10  ;;  %v5737_v29 = vrot.slane %v2172_v10, 9 }
 0x254   :  { %v2963_v63 = vsel %vm1041_vm5, %v2846_v7, %v2962_v27  ;;  %v3051_v15 = vsel %vm1037_vm3, %v2846_v7, %v2842_v58  ;;  %v5736_v30 = vrot.slane %v2173_v62, 9  ;;  %v2872_v17 = vsel %vm1039_vm4, %v2846_v7, %v2871_v55 }
 0x255   :  { %v2242_v23 = vmax.f32 %v2165_v39, %v5735_v36  ;;  %v2964_v4 = vsel %vm1043_vm6, %v2850_v8, %v2963_v63  ;;  %v5738_v43 = vrot.slane %v2174_v5, 9  ;;  %v2244_v47 = vmax.f32 %v2172_v10, %v5737_v29  ;;  %v2785_v63 = vld [vmem:[%s9901_s8 + $0x10] ss:$0 sm:$0xff] }
 0x256   :  { %v2965_v18 = vsel %vm1045_vm7, %v2854_v32, %v2964_v4  ;;  %v2243_v44 = vmax.f32 %v2173_v62, %v5736_v30  ;;  %v2873_v56 = vsel %vm1041_vm5, %v2850_v8, %v2872_v17  ;;  %v3142_v60 = vsel %vm1037_vm3, %v2850_v8, %v2846_v7 }
 0x257   :  { %v2866_v35 = vrot.slane %v2242_v23, %v7803_v28  ;;  %v2966_v38 = vsel %vm1047_vm8, %v2858_v6, %v2965_v18  ;;  %v2245_v52 = vmax.f32 %v2174_v5, %v5738_v43  ;;  %v2874_v2 = vsel %vm1043_vm6, %v2854_v32, %v2873_v56 }
 0x258   :  { %v2967_v24 = vsel %vm1049_vm9, %v2862_v54, %v2966_v38  ;;  %v3050_v57 = vrot.slane %v2244_v47, %v7803_v28  ;;  %v2870_v42 = vrot.slane %v2243_v44, %v7803_v28  ;;  %v2875_v16 = vsel %vm1045_vm7, %v2858_v6, %v2874_v2 }
 0x259   :  { %6486 = vmatprep.mubr.msk.f32.mxu1 %vm2316_vm10, %v2967_v24  ;;  %v3052_v9 = vsel %vm1039_vm4, %v2850_v8, %v3051_v15  ;;  %v2876_v20 = vsel %vm1047_vm8, %v2862_v54, %v2875_v16  ;;  %v3143_v13 = vsel %vm1039_vm4, %v2854_v32, %v3142_v60  ;;  %v3141_v53 = vrot.slane %v2245_v52, %v7803_v28 }
 0x25a   :  { %6487 = vmatmul.mubr.msk.f32.vlgmr.msra.gmra.mrb[32].mxu1 %vm2316_vm10, %v2866_v35  ;;  %v3053_v40 = vsel %vm1041_vm5, %v2854_v32, %v3052_v9  ;;  %v2877_v26 = vsel %vm1049_vm9, %v2866_v35, %v2876_v20  ;;  %v3144_v12 = vsel %vm1041_vm5, %v2858_v6, %v3143_v13  ;;  %v3234_v14 = vsel %vm1039_vm4, %v2858_v6, %v3233_v37 }
 0x25b   :  { %6910 = vmatpush3.bf16.msra.mxu1 %v8930_v33  ;;  %v3054_v3 = vsel %vm1043_vm6, %v2858_v6, %v3053_v40  ;;  %6467 = vmatprep.mubr.msk.f32.mxu0 %vm2316_vm10, %v2877_v26  ;;  %v3145_v50 = vsel %vm1043_vm6, %v2862_v54, %v3144_v12  ;;  %v3235_v32 = vsel %vm1041_vm5, %v2862_v54, %v3234_v14 }
 0x25c   :  { %v3055_v45 = vsel %vm1045_vm7, %v2862_v54, %v3054_v3  ;;  %6912 = vmatprep.subr.bf16.mxu1 %v8945_v51  ;;  %6468 = vmatmul.mubr.msk.f32.vlgmr.msra.gmra.mrb[48].mxu0 %vm2316_vm10, %v2870_v42  ;;  %v3146_v33 = vsel %vm1045_vm7, %v2866_v35, %v3145_v50  ;;  %v3236_v58 = vsel %vm1043_vm6, %v2866_v35, %v3235_v32 }
 0x25d   :  { %v3056_v48 = vsel %vm1047_vm8, %v2866_v35, %v3055_v45  ;;  %6894 = vmatpush3.bf16.msra.mxu0 %v8697_v21  ;;  %v3147_v19 = vsel %vm1047_vm8, %v2870_v42, %v3146_v33  ;;  %v3237_v6 = vsel %vm1045_vm7, %v2870_v42, %v3236_v58  ;;  %v3958_v58 = vld [vmem:[%s9898_s5 + $0x8] sm:$0xff] }
 0x25e   :  { %v3057_v8 = vsel %vm1049_vm9, %v2870_v42, %v3056_v48  ;;  %v3148_v39 = vsel %vm1049_vm9, %v3050_v57, %v3147_v19  ;;  %6896 = vmatprep.subr.bf16.mxu0 %v8711_v59  ;;  %v3238_v54 = vsel %vm1047_vm8, %v3050_v57, %v3237_v6  ;;  %v3960_v19 = vld [vmem:[%s9898_s5 + $0x38] sm:$0xff] }
 0x25f   :  { %6505 = vmatprep.mubr.msk.f32.mxu0 %vm2316_vm10, %v3057_v8  ;;  %6524 = vmatprep.mubr.msk.f32.mxu1 %vm2316_vm10, %v3148_v39  ;;  %v3239_v21 = vsel %vm1049_vm9, %v3141_v53, %v3238_v54  ;;  %v6939_v6 = vpack.c.bf16 %v3960_v19, %v3958_v58  ;;  %v3957_v39 = vld [vmem:[%s9898_s5] sm:$0xff]  ;;  %v3959_v54 = vld [vmem:[%s9898_s5 + $0x30] sm:$0xff] }
 0x260   :  { %6914 = vmatpush3.bf16.msra.mxu1 %v8945_v51  ;;  %v2119_v51 = vmax.f32 %v8997_v31, 0.0  ;;  %v9208_v58 = vld [vmem:[%s9897_s4] sm:$0xff] }
 0x261   :  { %6916 = vmatprep.subr.bf16.mxu1 %v8962_v49  ;;  %6898 = vmatpush3.bf16.msra.mxu0 %v8711_v59  ;;  %v10000_v59 = vmov 0.0   ;;  %v9218_v19 = vld [vmem:[%s9897_s4 + $0x40] sm:$0xff] }
 0x262   :  { %6900 = vmatprep.subr.bf16.mxu0 %v8732_v34 }
 0x264   :  { %6918 = vmatpush3.bf16.msra.mxu1 %v8962_v49 }
 0x265   :  { %6920 = vmatprep.subr.bf16.mxu1 %v8975_v25  ;;  %6902 = vmatpush3.bf16.msra.mxu0 %v8732_v34  ;;  %v2181_v34 = vrot.slane %v2119_v51, %v7770_v0 }
 0x266   :  { %6904 = vmatprep.subr.bf16.mxu0 %v8752_v22 }
 0x268   :  { %6922 = vmatpush3.bf16.msra.mxu1 %v8975_v25  ;;  %v7349_v25 = vmov 0  }
 0x269   :  { %6906 = vmatpush3.bf16.msra.mxu0 %v8752_v22  ;;  %v5739_v22 = vrot.slane %v2181_v34, 9  ;;  %7174 = vset.pattern.permute.xlu1 %v7349_v25 }
 0x26a   :  { %6924 = vmatprep.subr.bf16.mxu0 %v8772_v61  ;;  %6940 = vmatprep.subr.bf16.mxu1 %v6939_v6 }
 0x26b   :  { %6525 = vmatmul.mubr.msk.f32.vlgmr.msra.gmra.mrb[34].mxu1 %vm2316_vm10, %v3141_v53  ;;  %v2246_v49 = vmax.f32 %v2181_v34, %v5739_v22  ;;  %v9119_v34 = vpack.c.bf16 %v3959_v54, %v3957_v39  ;;  %v3964_v22 = vld [vmem:[%s9898_s5 + $0x98] sm:$0xff] }
 0x26c   :  { %4077 = vmatprep.mubr.f32.mxu1 %v10000_v59  ;;  %6506 = vmatmul.mubr.msk.f32.vlgmr.msra.gmra.mrb[50].mxu0 %vm2316_vm10, %v3050_v57 }
 0x26d   :  { %6926 = vmatpush3.bf16.msra.mxu0 %v8772_v61  ;;  %6543 = vmatprep.mubr.msk.f32.mxu0 %vm2316_vm10, %v3239_v21  ;;  %v3232_v61 = vrot.slane %v2246_v49, %v7803_v28  ;;  %v3962_v21 = vld [vmem:[%s9898_s5 + $0x68] sm:$0xff] }
 0x26e   :  { %6928 = vmatprep.subr.bf16.mxu0 %v8837_v46  ;;  %6942 = vmatpush1.bf16.msra.mxu1 %v9119_v34 }
 0x271   :  { %6930 = vmatpush3.bf16.msra.mxu0 %v8837_v46 }
 0x272   :  { %6932 = vmatprep.subr.bf16.mxu0 %v8898_v41 }
 0x275   :  { %6934 = vmatpush3.bf16.msra.mxu0 %v8898_v41 }
 0x276   :  { %6936 = vmatprep.subr.bf16.mxu0 %v8926_v11 }
 0x279   :  { %6938 = vmatpush3.bf16.msra.mxu0 %v8926_v11 }
 0x27a   :  { %6956 = vmatprep.subr.bf16.mxu0 %v6939_v6 }
 0x27c   :  { %6544 = vmatmul.mubr.msk.f32.vlgmr.msra.gmra.mrb[52].mxu0 %vm2316_vm10, %v3232_v61  ;;  %v9124_v61 = vpack.c.bf16 %v3964_v22, %v3962_v21 }
 0x27d   :  { %4256 = vmatprep.mubr.f32.mxu0 %v10000_v59  ;;  %6958 = vmatpush1.bf16.msra.mxu0 %v9119_v34 }
 0x27e   :  { %6944 = vmatprep.subr.bf16.mxu1 %v9124_v61  ;;  %6960 = vmatprep.subr.bf16.mxu0 %v9124_v61 }
 0x2f0   :  { %v6374_v46 = vpop.f32.mrb[42].mxu0 }
 0x2f1   :  { %v2387_v31 = vpop.f32.mrb[43].mxu0 }
 0x2f2   :  { %v6412_v7 = vpop.f32.mrb[28].mxu1 }
 0x2f3   :  { %v2576_v1 = vpop.f32.mrb[29].mxu1  ;;  %v3963_v7 = vld [vmem:[%s9898_s5 + $0x90] sm:$0xff] }
 0x300   :  { %v6393_v10 = vpop.f32.mrb[44].mxu0 }
 0x301   :  { %v2477_v41 = vpop.f32.mrb[45].mxu0  ;;  %v3966_v10 = vld [vmem:[%s9898_s5 + $0xc8] sm:$0xff] }
 0x302   :  { %v2478_v55 = vadd.f32 %v2477_v41, %v2387_v31  ;;  %v6450_v62 = vpop.f32.mrb[30].mxu1  ;;  %v3961_v31 = vld [vmem:[%s9898_s5 + $0x60] sm:$0xff]  ;;  %v3968_v41 = vld [vmem:[%s9898_s5 + $0xf8] sm:$0xff] }
 0x303   :  { %v2776_v36 = vpop.f32.mrb[31].mxu1 }
 0x304   :  { %v2584_v27 = vadd.f32 %v2576_v1, %v2478_v55  ;;  %v9136_v1 = vpack.c.bf16 %v3963_v7, %v3961_v31  ;;  %v3965_v55 = vld [vmem:[%s9898_s5 + $0xc0] sm:$0xff]  ;;  %v9237_v31 = vld [vmem:[%s9897_s4 + $0x88] sm:$0xff] }
 0x306   :  { %6946 = vmatpush1.bf16.msra.mxu1 %v9136_v1  ;;  %6962 = vmatpush1.bf16.msra.mxu0 %v9136_v1 }
 0x310   :  { %v6431_v11 = vpop.f32.mrb[46].mxu0 }
 0x311   :  { %v2676_v5 = vpop.f32.mrb[47].mxu0 }
 0x312   :  { %v2684_v29 = vadd.f32 %v2676_v5, %v2584_v27  ;;  %v3967_v27 = vld [vmem:[%s9898_s5 + $0xf0] sm:$0xff] }
 0x313   :  { %v9153_v11 = vpack.c.bf16 %v3967_v27, %v3965_v55  ;;  %v9244_v27 = vld [vmem:[%s9897_s4 + $0xc0] sm:$0xff] }
 0x314   :  { %v2784_v37 = vadd.f32 %v2776_v36, %v2684_v29  ;;  %v9147_v36 = vpack.c.bf16 %v3968_v41, %v3966_v10 }
 0x316   :  { %v2786_v15 = vadd.f32 %v2785_v63, %v2784_v37  ;;  %6948 = vmatprep.subr.bf16.mxu1 %v9147_v36  ;;  %6964 = vmatprep.subr.bf16.mxu0 %v9147_v36 }
 0x317   :  { %6950 = vmatpush1.bf16.msra.mxu1 %v9153_v11  ;;  %6966 = vmatpush1.bf16.msra.mxu0 %v9153_v11 }
 0x318   :  { %v2787_v30 = vmax.f32 %v2786_v15, 0.0 }
 0x31a   :  { %v2789_v23 = vcombine.high %v2787_v30, %v2787_v30  ;;  %v2796_v4 = vrot.slane %v2787_v30, %v7770_v0  ;;  %v3970_v30 = vld [vmem:[%s9898_s5 + $0x128] sm:$0xff] }
 0x31c   :  { %v2803_v43 = vrot.slane %v2789_v23, %v7770_v0  ;;  %v2804_v47 = vcombine.high %v2796_v4, %v2796_v4  ;;  %v5782_v18 = vrot.slane %v2796_v4, 9  ;;  %v3972_v23 = vld [vmem:[%s9898_s5 + $0x158] sm:$0xff] }
 0x31e   :  { %v2805_v17 = vcombine.high %v2803_v43, %v2803_v43  ;;  %v5783_v44 = vrot.slane %v2804_v47, 9  ;;  %v5784_v35 = vrot.slane %v2803_v43, 9  ;;  %v2822_v38 = vmax.f32 %v2796_v4, %v5782_v18  ;;  %v3969_v4 = vld [vmem:[%s9898_s5 + $0x120] sm:$0xff] }
 0x320   :  { %v5785_v56 = vrot.slane %v2805_v17, 9  ;;  %v2823_v52 = vmax.f32 %v2804_v47, %v5783_v44  ;;  %v2824_v24 = vmax.f32 %v2803_v43, %v5784_v35  ;;  %v3367_v57 = vrot.slane %v2822_v38, %v7803_v28 }
 0x321   :  { %v9170_v43 = vpack.c.bf16 %v3972_v23, %v3970_v30 }
 0x322   :  { %v2825_v2 = vmax.f32 %v2805_v17, %v5785_v56  ;;  %v3371_v42 = vrot.slane %v2823_v52, %v7803_v28  ;;  %v3375_v16 = vrot.slane %v2824_v24, %v7803_v28 }
 0x323   :  { %6952 = vmatprep.subr.bf16.mxu1 %v9170_v43  ;;  %6968 = vmatprep.subr.bf16.mxu0 %v9170_v43 }
 0x324   :  { %v3379_v60 = vrot.slane %v2825_v2, %v7803_v28  ;;  %v3380_v9 = vsel %vm1037_vm3, %v3371_v42, %v3367_v57 }
 0x325   :  { %v3381_v20 = vsel %vm1039_vm4, %v3375_v16, %v3380_v9 }
 0x326   :  { %v3382_v13 = vsel %vm1041_vm5, %v3379_v60, %v3381_v20 }
 0x327   :  { %3384 = vxpose.xlu0.b32.start.end [1/1] (short) (narrow) %v3382_v13, 32 }
 0x32d   :  { %v6488_v40 = vpop.f32.mrb[32].mxu1 }
 0x32e   :  { %v3038_v53 = vpop.f32.mrb[33].mxu1 }
 0x32f   :  { %v6469_v26 = vpop.f32.mrb[48].mxu0 }
 0x330   :  { %v2948_v12 = vpop.f32.mrb[49].mxu0 }
 0x331   :  { %v3039_v3 = vadd.f32 %v3038_v53, %v2948_v12  ;;  %v7350_v53 = vmov 1   ;;  %v7351_v12 = vmov 2  }
 0x33e   :  { %v6526_v14 = vpop.f32.mrb[34].mxu1 }
 0x33f   :  { %v3219_v50 = vpop.f32.mrb[35].mxu1  ;;  %v6507_v45 = vpop.f32.mrb[50].mxu0 }
 0x340   :  { %v3128_v32 = vpop.f32.mrb[51].mxu0 }
 0x341   :  { %v3136_v33 = vadd.f32 %v3128_v32, %v3039_v3  ;;  %v7352_v3 = vmov 3  }
 0x343   :  { %v3227_v48 = vadd.f32 %v3219_v50, %v3136_v33 }
 0x34f   :  { %v6545_v8 = vpop.f32.mrb[52].mxu0 }
 0x350   :  { %v3310_v51 = vpop.f32.mrb[53].mxu0  ;;  %v9223_v8 = vld [vmem:[%s9897_s4 + $0x48] sm:$0xff] }
 0x351   :  { %v3318_v49 = vadd.f32 %v3310_v51, %v3227_v48 }
 0x353   :  { %v3319_v46 = vadd.f32 %v3318_v49, %v2785_v63 }
 0x355   :  { %v3320_v62 = vmax.f32 %v3319_v46, 0.0  ;;  %v9232_v46 = vld [vmem:[%s9897_s4 + $0x80] sm:$0xff] }
 0x357   :  { %v3322_v5 = vcombine.high %v3320_v62, %v3320_v62  ;;  %v3329_v29 = vrot.slane %v3320_v62, %v7770_v0 }
 0x359   :  { %v3336_v63 = vrot.slane %v3322_v5, %v7770_v0  ;;  %v3337_v37 = vcombine.high %v3329_v29, %v3329_v29  ;;  %v5796_v15 = vrot.slane %v3329_v29, 9  ;;  %v3971_v0 = vld [vmem:[%s9898_s5 + $0x150] sm:$0xff]  ;;  %v9249_v5 = vld [vmem:[%s9897_s4 + $0xc8] sm:$0xff] }
 0x35a   :  { %v9177_v35 = vpack.c.bf16 %v3971_v0, %v3969_v4 }
 0x35b   :  { %v5797_v47 = vrot.slane %v3337_v37, 9  ;;  %v3355_v18 = vmax.f32 %v3329_v29, %v5796_v15  ;;  %v3338_v17 = vcombine.high %v3336_v63, %v3336_v63  ;;  %v5798_v44 = vrot.slane %v3336_v63, 9 }
 0x35c   :  { %6954 = vmatpush1.bf16.msra.mxu1 %v9177_v35  ;;  %6970 = vmatpush1.bf16.msra.mxu0 %v9177_v35 }
 0x35d   :  { %v5799_v38 = vrot.slane %v3338_v17, 9  ;;  %v3356_v56 = vmax.f32 %v3337_v37, %v5797_v47  ;;  %v3357_v52 = vmax.f32 %v3336_v63, %v5798_v44  ;;  %v3672_v24 = vrot.slane %v3355_v18, %v7803_v28  ;;  %6972 = vmatprep.subr.bf16.mxu1 %v6939_v6  ;;  %6988 = vmatprep.subr.bf16.mxu0 %v6939_v6 }
 0x35f   :  { %v3358_v2 = vmax.f32 %v3338_v17, %v5799_v38  ;;  %v3676_v57 = vrot.slane %v3356_v56, %v7803_v28  ;;  %v3680_v42 = vrot.slane %v3357_v52, %v7803_v28  ;;  %4078 = vmatmul.mubr.f32.vlgmr.msra.gmra.mrb[36].mxu1 %v10000_v59  ;;  %v9262_v56 = vld [vmem:[%s9897_s4 + $0x10] sm:$0xff]  ;;  %v9267_v52 = vld [vmem:[%s9897_s4 + $0x18] sm:$0xff] }
 0x360   :  { %6974 = vmatpush1.bf16.msra.mxu1 %v9119_v34  ;;  %4435 = vmatprep.mubr.f32.mxu1 %v10000_v59 }
 0x361   :  { %v3684_v16 = vrot.slane %v3358_v2, %v7803_v28  ;;  %v3685_v60 = vsel %vm1037_vm3, %v3676_v57, %v3672_v24  ;;  %6976 = vmatprep.subr.bf16.mxu1 %v9124_v61  ;;  %v10001_v24 = vld [vmem:[#allocation29_spill] sm:$0xff] }
 0x362   :  { %v3686_v9 = vsel %vm1039_vm4, %v3680_v42, %v3685_v60  ;;  %v9942_v2 = vsub.s32 1, %v10001_v24  ;;  %v9273_v57 = vld [vmem:[%s9897_s4 + $0x50] sm:$0xff]  ;;  %v9278_v42 = vld [vmem:[%s9897_s4 + $0x58] sm:$0xff] }
 0x363   :  { %v3687_v20 = vsel %vm1041_vm5, %v3684_v16, %v3686_v9  ;;  %v3359_v16 = vld [vmem:[%s9901_s8] ss:$8 sm:$0x3] }
 0x364   :  { %3689 = vxpose.xlu0.b32.start.end [1/1] (short) (narrow) %v3687_v20, 32  ;;  %6978 = vmatpush1.bf16.msra.mxu1 %v9136_v1 }
 0x365   :  { %6980 = vmatprep.subr.bf16.mxu1 %v9147_v36 }
 0x368   :  { %6982 = vmatpush1.bf16.msra.mxu1 %v9153_v11 }
 0x369   :  { %6984 = vmatprep.subr.bf16.mxu1 %v9170_v43 }
 0x36c   :  { %6986 = vmatpush1.bf16.msra.mxu1 %v9177_v35 }
 0x38d   :  { %7182 = vset.pattern.permute.xlu0 %v7349_v25 }
 0x3a7   :  { %v3400_v13 = vpop.trf.xlu0 }
 0x3a8   :  { %3426 = vperm.xlu1 %7174, %v3400_v13  }
 0x3ab   :  { %v3401_v40 = vpop.trf.xlu0 }
 0x3ac   :  { %7175 = vset.pattern.permute.xlu1 %v7350_v53 }
 0x3ad   :  { %3462 = vperm.xlu1 %7175, %v3400_v13  }
 0x3af   :  { %v3402_v26 = vpop.trf.xlu0 }
 0x3b0   :  { %3436 = vperm.xlu0 %7182, %v3402_v26  }
 0x3b1   :  { %7176 = vset.pattern.permute.xlu1 %v7351_v12 }
 0x3b2   :  { %3503 = vperm.xlu1 %7176, %v3400_v13  }
 0x3b3   :  { %v3403_v14 = vpop.trf.xlu0 }
 0x3b4   :  { %7185 = vset.pattern.permute.xlu0 %v7352_v3 }
 0x3b5   :  { %3552 = vperm.xlu0 %7185, %v3402_v26  }
 0x3b6   :  { %7177 = vset.pattern.permute.xlu1 %v7352_v3 }
 0x3b7   :  { %3544 = vperm.xlu1 %7177, %v3400_v13  }
 0x3b9   :  { %7188 = vset.pattern.permute.xlu0 %v7351_v12 }
 0x3ba   :  { %3515 = vperm.xlu0 %7188, %v3403_v14  }
 0x3bb   :  { %7178 = vset.pattern.permute.xlu1 %v7349_v25 }
 0x3bc   :  { %3431 = vperm.xlu1 %7178, %v3401_v40  }
 0x3c0   :  { %7179 = vset.pattern.permute.xlu1 %v7350_v53 }
 0x3c1   :  { %3466 = vperm.xlu1 %7179, %v3401_v40  }
 0x3c5   :  { %7180 = vset.pattern.permute.xlu1 %v7351_v12 }
 0x3c6   :  { %3507 = vperm.xlu1 %7180, %v3401_v40  }
 0x3ca   :  { %7181 = vset.pattern.permute.xlu1 %v7352_v3 }
 0x3cb   :  { %3548 = vperm.xlu1 %7181, %v3401_v40  }
 0x3cf   :  { %7183 = vset.pattern.permute.xlu1 %v7350_v53 }
 0x3d0   :  { %3470 = vperm.xlu1 %7183, %v3402_v26  }
 0x3d4   :  { %7184 = vset.pattern.permute.xlu1 %v7351_v12 }
 0x3d5   :  { %3511 = vperm.xlu1 %7184, %v3402_v26  }
 0x3d9   :  { %7186 = vset.pattern.permute.xlu1 %v7349_v25 }
 0x3da   :  { %3441 = vperm.xlu1 %7186, %v3403_v14  }
 0x3de   :  { %7187 = vset.pattern.permute.xlu1 %v7350_v53 }
 0x3df   :  { %3474 = vperm.xlu1 %7187, %v3403_v14  }
 0x3e3   :  { %7189 = vset.pattern.permute.xlu1 %v7349_v25 }
 0x3e4   :  { %v3705_v50 = vpop.trf.xlu0 }
 0x3e5   :  { %3806 = vperm.xlu0 %7188, %v3705_v50   ;;  %3731 = vperm.xlu1 %7189, %v3705_v50  }
 0x3e8   :  { %v3706_v45 = vpop.trf.xlu0 }
 0x3e9   :  { %7190 = vset.pattern.permute.xlu1 %v7350_v53  ;;  %7199 = vset.pattern.permute.xlu0 %v7352_v3 }
 0x3ea   :  { %3766 = vperm.xlu1 %7190, %v3705_v50  }
 0x3ec   :  { %v3707_v32 = vpop.trf.xlu0 }
 0x3ed   :  { %3854 = vperm.xlu0 %7199, %v3707_v32  }
 0x3ee   :  { %7191 = vset.pattern.permute.xlu1 %v7352_v3 }
 0x3ef   :  { %3846 = vperm.xlu1 %7191, %v3705_v50   ;;  %v9292_v50 = vrot.slane %v3359_v16, %v9942_v2 }
 0x3f0   :  { %v3708_v33 = vpop.trf.xlu0 }
 0x3f1   :  { %7200 = vset.pattern.permute.xlu0 %v7349_v25 }
 0x3f2   :  { %3746 = vperm.xlu0 %7200, %v3708_v33  }
 0x3f3   :  { %7192 = vset.pattern.permute.xlu1 %v7349_v25 }
 0x3f4   :  { %3736 = vperm.xlu1 %7192, %v3706_v45  }
 0x3f6   :  { %7204 = vset.pattern.permute.xlu0 %v7352_v3 }
 0x3f7   :  { %3858 = vperm.xlu0 %7204, %v3708_v33  }
 0x3f8   :  { %7193 = vset.pattern.permute.xlu1 %v7350_v53 }
 0x3f9   :  { %3770 = vperm.xlu1 %7193, %v3706_v45  }
 0x3fd   :  { %7194 = vset.pattern.permute.xlu1 %v7351_v12 }
 0x3fe   :  { %3810 = vperm.xlu1 %7194, %v3706_v45  }
 0x402   :  { %7195 = vset.pattern.permute.xlu1 %v7352_v3 }
 0x403   :  { %3850 = vperm.xlu1 %7195, %v3706_v45  }
 0x407   :  { %7196 = vset.pattern.permute.xlu1 %v7349_v25  ;;  %v9213_v25 = vld [vmem:[%s9897_s4 + $0x8] sm:$0xff] }
 0x408   :  { %3741 = vperm.xlu1 %7196, %v3707_v32  }
 0x40c   :  { %7197 = vset.pattern.permute.xlu1 %v7350_v53 }
 0x40d   :  { %3774 = vperm.xlu1 %7197, %v3707_v32  }
 0x411   :  { %7198 = vset.pattern.permute.xlu1 %v7351_v12 }
 0x412   :  { %3814 = vperm.xlu1 %7198, %v3707_v32  }
 0x416   :  { %7201 = vset.pattern.permute.xlu1 %v7350_v53 }
 0x417   :  { %3778 = vperm.xlu1 %7201, %v3708_v33  }
 0x41b   :  { %7202 = vset.pattern.permute.xlu1 %v7351_v12 }
 0x41c   :  { %3818 = vperm.xlu1 %7202, %v3708_v33  }
 0x420   :  { %7203 = vset.pattern.permute.xlu1 %v7352_v3 }
 0x421   :  { %3556 = vperm.xlu1 %7203, %v3403_v14   ;;  %v9288_v14 = vrot.slane %v3359_v16, %v7803_v28 }
 0x427   :  { %v3427_v48 = vpop.permute.xlu1 %3426 }
 0x428   :  { %v3444_v39 = vmul.f32 %v3427_v48, %v9208_v58  ;;  %v3445_v54 = vmul.f32 %v3427_v48, %v9213_v25 }
 0x42c   :  { %v3463_v6 = vpop.permute.xlu1 %3462 }
 0x42d   :  { %v3477_v21 = vmul.f32 %v9218_v19, %v3463_v6  ;;  %v3478_v51 = vmul.f32 %v9223_v8, %v3463_v6  ;;  %v9297_v6 = vld [vmem:[%s9897_s4 + $0x90] sm:$0xff] }
 0x42f   :  { %v3485_v22 = vadd.f32 %v3477_v21, %v3444_v39  ;;  %v3486_v49 = vadd.f32 %v3478_v51, %v3445_v54  ;;  %v9302_v39 = vld [vmem:[%s9897_s4 + $0x98] sm:$0xff] }
 0x431   :  { %v3504_v7 = vpop.permute.xlu1 %3503 }
 0x432   :  { %v3518_v10 = vmul.f32 %v9232_v46, %v3504_v7  ;;  %v3519_v41 = vmul.f32 %v9237_v31, %v3504_v7  ;;  %v9253_v23 = vpop.f32.mrb[36].mxu1 }
 0x433   :  { %v9255_v18 = vpop.f32.mrb[37].mxu1 }
 0x434   :  { %v3526_v55 = vadd.f32 %v3518_v10, %v3485_v22  ;;  %v3527_v62 = vadd.f32 %v3519_v41, %v3486_v49 }
 0x436   :  { %v3545_v29 = vpop.permute.xlu1 %3544 }
 0x437   :  { %v3559_v63 = vmul.f32 %v9244_v27, %v3545_v29  ;;  %v3560_v37 = vmul.f32 %v9249_v5, %v3545_v29  ;;  %v9316_v29 = vld [vmem:[%s9897_s4 + $0xd8] sm:$0xff] }
 0x439   :  { %v3567_v15 = vadd.f32 %v3559_v63, %v3526_v55  ;;  %v3568_v30 = vadd.f32 %v3560_v37, %v3527_v62  ;;  %v9311_v62 = vld [vmem:[%s9897_s4 + $0xd0] sm:$0xff] }
 0x43b   :  { %v3575_v4 = vrot.slane %v3567_v15, 4  ;;  %v3581_v0 = vrot.slane %v3568_v30, 4  ;;  %v3432_v47 = vpop.permute.xlu1 %3431 }
 0x43c   :  { %v3446_v20 = vmul.f32 %v3432_v47, %v9262_v56  ;;  %v3447_v13 = vmul.f32 %v3432_v47, %v9267_v52 }
 0x43d   :  { %v3576_v44 = vadd.f32 %v3575_v4, %v3567_v15  ;;  %v3582_v38 = vadd.f32 %v3581_v0, %v3568_v30 }
 0x43f   :  { %v3577_v60 = vrot.slane %v3576_v44, 2  ;;  %v3583_v9 = vrot.slane %v3582_v38, 2 }
 0x440   :  { %v3467_v40 = vpop.permute.xlu1 %3466 }
 0x441   :  { %v3578_v53 = vadd.f32 %v3577_v60, %v3576_v44  ;;  %v3584_v26 = vadd.f32 %v3583_v9, %v3582_v38  ;;  %v3479_v12 = vmul.f32 %v9273_v57, %v3467_v40  ;;  %v3480_v3 = vmul.f32 %v9278_v42, %v3467_v40 }
 0x443   :  { %v3579_v45 = vrot.slane %v3578_v53, 1  ;;  %v3585_v32 = vrot.slane %v3584_v26, 1  ;;  %v3487_v33 = vadd.f32 %v3479_v12, %v3446_v20  ;;  %v3488_v48 = vadd.f32 %v3480_v3, %v3447_v13 }
 0x445   :  { %v3580_v54 = vadd.f32 %v3579_v45, %v3578_v53  ;;  %v3586_v21 = vadd.f32 %v3585_v32, %v3584_v26  ;;  %v3508_v51 = vpop.permute.xlu1 %3507 }
 0x446   :  { %v3520_v22 = vmul.f32 %v9297_v6, %v3508_v51  ;;  %v3521_v49 = vmul.f32 %v9302_v39, %v3508_v51 }
 0x447   :  { %v3634_v7 = vadd.f32 %v9288_v14, %v3580_v54  ;;  %v3635_v10 = vadd.f32 %v9292_v50, %v3586_v21 }
 0x448   :  { %v3528_v41 = vadd.f32 %v3520_v22, %v3487_v33  ;;  %v3529_v55 = vadd.f32 %v3521_v49, %v3488_v48 }
 0x449   :  { %v3650_v63 = vcombine.low %v3634_v7, %v3635_v10 }
 0x44a   :  { %v3549_v37 = vpop.permute.xlu1 %3548 }
 0x44b   :  { %v3561_v15 = vmul.f32 %v9311_v62, %v3549_v37  ;;  %v3562_v30 = vmul.f32 %v9316_v29, %v3549_v37 }
 0x44d   :  { %v3569_v4 = vadd.f32 %v3561_v15, %v3528_v41  ;;  %v3570_v0 = vadd.f32 %v3562_v30, %v3529_v55  ;;  %v3437_v55 = vpop.permute.xlu0 %3436  ;;  %v9333_v15 = vld [vmem:[%s9897_s4 + $0x20] sm:$0xff] }
 0x44e   :  { %v9338_v30 = vld [vmem:[%s9897_s4 + $0x60] sm:$0xff] }
 0x44f   :  { %v3587_v47 = vrot.slane %v3569_v4, 4  ;;  %v3593_v44 = vrot.slane %v3570_v0, 4  ;;  %v3471_v38 = vpop.permute.xlu1 %3470 }
 0x451   :  { %v3588_v16 = vadd.f32 %v3587_v47, %v3569_v4  ;;  %v3594_v60 = vadd.f32 %v3593_v44, %v3570_v0  ;;  %v9348_v4 = vld [vmem:[%s9897_s4 + $0x68] sm:$0xff]  ;;  %v3553_v0 = vpop.permute.xlu0 %3552  ;;  %v9353_v47 = vld [vmem:[%s9897_s4 + $0xa0] sm:$0xff]  ;;  %v3448_v44 = vmul.f32 %v3437_v55, %v9333_v15 }
 0x453   :  { %v3589_v9 = vrot.slane %v3588_v16, 2  ;;  %v3595_v20 = vrot.slane %v3594_v60, 2 }
 0x454   :  { %v3512_v13 = vpop.permute.xlu1 %3511 }
 0x455   :  { %v3590_v40 = vadd.f32 %v3589_v9, %v3588_v16  ;;  %v3596_v53 = vadd.f32 %v3595_v20, %v3594_v60  ;;  %v3481_v16 = vmul.f32 %v9338_v30, %v3471_v38  ;;  %v9360_v9 = vld [vmem:[%s9897_s4 + $0xa8] sm:$0xff] }
 0x457   :  { %v3591_v26 = vrot.slane %v3590_v40, 1  ;;  %v3597_v12 = vrot.slane %v3596_v53, 1 }
 0x459   :  { %v3592_v3 = vadd.f32 %v3591_v26, %v3590_v40  ;;  %v3598_v45 = vadd.f32 %v3597_v12, %v3596_v53  ;;  %v9320_v32 = vpop.permute.xlu1 %3441  ;;  %v3482_v40 = vmul.f32 %v9348_v4, %v3471_v38  ;;  %v3522_v53 = vmul.f32 %v9353_v47, %v3512_v13  ;;  %v9365_v26 = vpop.permute.xlu0 %3515 }
 0x45a   :  { %v3489_v12 = vadd.f32 %v3481_v16, %v3448_v44 }
 0x45b   :  { %v3636_v33 = vadd.f32 %v9288_v14, %v3592_v3  ;;  %v3637_v48 = vadd.f32 %v9292_v50, %v3598_v45  ;;  %v3523_v3 = vmul.f32 %v9360_v9, %v3512_v13 }
 0x45d   :  { %v3651_v54 = vcombine.low %v3636_v33, %v3637_v48  ;;  %v9373_v48 = vld [vmem:[%s9897_s4 + $0xe0] sm:$0xff] }
 0x45e   :  { %v9324_v51 = vpop.permute.xlu1 %3474 }
 0x45f   :  { %v3654_v21 = vrot.slane %v3651_v54, 7 }
 0x461   :  { %v3655_v22 = vsel %vm1037_vm3, %v3654_v21, %v3650_v63  ;;  %v9343_v63 = vld [vmem:[%s9897_s4 + $0x28] sm:$0xff] }
 0x462   :  { %v9328_v49 = vsel %vm1045_vm7, %v3654_v21, %v3655_v22  ;;  %v3449_v20 = vmul.f32 %v3437_v55, %v9343_v63  ;;  %v3530_v55 = vadd.f32 %v3522_v53, %v3489_v12 }
 0x464   :  { %v3732_v7 = vpop.permute.xlu1 %3731  ;;  %v3490_v22 = vadd.f32 %v3482_v40, %v3449_v20 }
 0x465   :  { %v3749_v44 = vmul.f32 %v3732_v7, %v9208_v58  ;;  %v3750_v13 = vmul.f32 %v3732_v7, %v9213_v25 }
 0x466   :  { %v3531_v20 = vadd.f32 %v3523_v3, %v3490_v22 }
 0x469   :  { %v3767_v10 = vpop.permute.xlu1 %3766 }
 0x46a   :  { %v3781_v45 = vmul.f32 %v9218_v19, %v3767_v10  ;;  %v3782_v33 = vmul.f32 %v9223_v8, %v3767_v10  ;;  %v9382_v19 = vld [vmem:[%s9897_s4 + $0xe8] sm:$0xff]  ;;  %v3807_v8 = vpop.permute.xlu0 %3806 }
 0x46b   :  { %v3564_v53 = vmul.f32 %v9382_v19, %v3553_v0  ;;  %v3821_v2 = vmul.f32 %v9232_v46, %v3807_v8 }
 0x46c   :  { %v3789_v58 = vadd.f32 %v3781_v45, %v3749_v44  ;;  %v3790_v40 = vadd.f32 %v3782_v33, %v3750_v13 }
 0x46e   :  { %v3847_v41 = vpop.permute.xlu1 %3846  ;;  %v3829_v3 = vadd.f32 %v3821_v2, %v3789_v58 }
 0x46f   :  { %v3861_v33 = vmul.f32 %v9244_v27, %v3847_v41 }
 0x471   :  { %v3869_v13 = vadd.f32 %v3861_v33, %v3829_v3 }
 0x473   :  { %v3737_v37 = vpop.permute.xlu1 %3736 }
 0x474   :  { %v3751_v10 = vmul.f32 %v3737_v37, %v9262_v56  ;;  %v3752_v16 = vmul.f32 %v3737_v37, %v9267_v52  ;;  %v3822_v56 = vmul.f32 %v9237_v31, %v3807_v8 }
 0x476   :  { %v3830_v45 = vadd.f32 %v3822_v56, %v3790_v40  ;;  %v5807_v56 = vld [vmem:[%s9897_s4 + $0x78] sm:$0xff] }
 0x478   :  { %v3771_v60 = vpop.permute.xlu1 %3770 }
 0x479   :  { %v3783_v54 = vmul.f32 %v9273_v57, %v3771_v60  ;;  %v3784_v38 = vmul.f32 %v9278_v42, %v3771_v60  ;;  %v3563_v60 = vmul.f32 %v9373_v48, %v3553_v0 }
 0x47b   :  { %v3791_v25 = vadd.f32 %v3783_v54, %v3751_v10  ;;  %v3792_v7 = vadd.f32 %v3784_v38, %v3752_v16  ;;  %v3571_v12 = vadd.f32 %v3563_v60, %v3530_v55  ;;  %v3862_v54 = vmul.f32 %v9249_v5, %v3847_v41  ;;  %v3422_v5 = vld [vmem:[%s9897_s4 + $0x30] sm:$0xff] }
 0x47c   :  { %v3877_v41 = vrot.slane %v3869_v13, 4 }
 0x47d   :  { %v3811_v21 = vpop.permute.xlu1 %3810  ;;  %v3599_v22 = vrot.slane %v3571_v12, 4  ;;  %v3870_v8 = vadd.f32 %v3862_v54, %v3830_v45 }
 0x47e   :  { %v3823_v57 = vmul.f32 %v9297_v6, %v3811_v21  ;;  %v3824_v42 = vmul.f32 %v9302_v39, %v3811_v21  ;;  %v3572_v21 = vadd.f32 %v3564_v53, %v3531_v20  ;;  %v3450_v53 = vmul.f32 %v9320_v32, %v3422_v5 }
 0x47f   :  { %v3600_v10 = vadd.f32 %v3599_v22, %v3571_v12 }
 0x480   :  { %v3831_v52 = vadd.f32 %v3823_v57, %v3791_v25  ;;  %v3832_v37 = vadd.f32 %v3824_v42, %v3792_v7  ;;  %v3605_v44 = vrot.slane %v3572_v21, 4  ;;  %v3883_v57 = vrot.slane %v3870_v8, 4  ;;  %v5806_v42 = vld [vmem:[%s9897_s4 + $0x70] sm:$0xff] }
 0x481   :  { %v3601_v58 = vrot.slane %v3600_v10, 2 }
 0x482   :  { %v3851_v17 = vpop.permute.xlu1 %3850  ;;  %v3606_v2 = vadd.f32 %v3605_v44, %v3572_v21  ;;  %v3884_v21 = vadd.f32 %v3883_v57, %v3870_v8  ;;  %v5815_v8 = vld [vmem:[%s9897_s4 + $0xb8] sm:$0xff] }
 0x483   :  { %v3863_v6 = vmul.f32 %v9311_v62, %v3851_v17  ;;  %v3864_v39 = vmul.f32 %v9316_v29, %v3851_v17  ;;  %v9399_v17 = vld [vmem:[%s9897_s4 + $0xb0] sm:$0xff]  ;;  %v3423_v29 = vld [vmem:[%s9897_s4 + $0x38] sm:$0xff] }
 0x484   :  { %v3524_v40 = vmul.f32 %v9399_v17, %v9365_v26  ;;  %v3451_v12 = vmul.f32 %v9320_v32, %v3423_v29 }
 0x485   :  { %v3871_v0 = vadd.f32 %v3863_v6, %v3831_v52  ;;  %v3872_v38 = vadd.f32 %v3864_v39, %v3832_v37  ;;  %v3855_v37 = vpop.permute.xlu0 %3854  ;;  %v3483_v6 = vmul.f32 %v5806_v42, %v9324_v51  ;;  %v3878_v39 = vadd.f32 %v3877_v41, %v3869_v13 }
 0x487   :  { %v3889_v46 = vrot.slane %v3871_v0, 4  ;;  %v3895_v55 = vrot.slane %v3872_v38, 4  ;;  %v3742_v31 = vpop.permute.xlu1 %3741 }
 0x488   :  { %v3753_v52 = vmul.f32 %v3742_v31, %v9333_v15 }
 0x489   :  { %v3890_v62 = vadd.f32 %v3889_v46, %v3871_v0  ;;  %v3896_v16 = vadd.f32 %v3895_v55, %v3872_v38  ;;  %v3602_v0 = vadd.f32 %v3601_v58, %v3600_v10  ;;  %v3484_v38 = vmul.f32 %v5807_v56, %v9324_v51  ;;  %v3747_v44 = vpop.permute.xlu0 %3746 }
 0x48a   :  { %v3866_v46 = vmul.f32 %v9382_v19, %v3855_v37  ;;  %v3755_v51 = vmul.f32 %v3747_v44, %v3422_v5  ;;  %v5846_v5 = vld [vmem:[%s9897_s4 + $0xf0] sm:$0xff] }
 0x48b   :  { %v3891_v25 = vrot.slane %v3890_v62, 2  ;;  %v3897_v7 = vrot.slane %v3896_v16, 2 }
 0x48c   :  { %v3775_v27 = vpop.permute.xlu1 %3774 }
 0x48d   :  { %v3785_v60 = vmul.f32 %v9338_v30, %v3775_v27  ;;  %v3786_v20 = vmul.f32 %v9348_v4, %v3775_v27  ;;  %v3754_v30 = vmul.f32 %v3742_v31, %v9343_v63  ;;  %v3607_v4 = vrot.slane %v3606_v2, 2 }
 0x48e   :  { %v3892_v22 = vadd.f32 %v3891_v25, %v3890_v62  ;;  %v3898_v15 = vadd.f32 %v3897_v7, %v3896_v16  ;;  %v3865_v63 = vmul.f32 %v9373_v48, %v3855_v37  ;;  %v3879_v27 = vrot.slane %v3878_v39, 2 }
 0x48f   :  { %v3793_v45 = vadd.f32 %v3785_v60, %v3753_v52  ;;  %v3794_v33 = vadd.f32 %v3786_v20, %v3754_v30  ;;  %v3608_v13 = vadd.f32 %v3607_v4, %v3606_v2  ;;  %v3756_v62 = vmul.f32 %v3747_v44, %v3423_v29  ;;  %v5847_v29 = vld [vmem:[%s9897_s4 + $0xf8] sm:$0xff]  ;;  %s7354_s4 = smov 64  }
 0x490   :  { %v3893_v57 = vrot.slane %v3892_v22, 1  ;;  %v3899_v48 = vrot.slane %v3898_v15, 1  ;;  %v3525_v20 = vmul.f32 %v5815_v8, %v9365_v26  ;;  %v3603_v25 = vrot.slane %v3602_v0, 1 }
 0x491   :  { %v3815_v3 = vpop.permute.xlu1 %3814  ;;  %v3492_v7 = vadd.f32 %v3484_v38, %v3451_v12  ;;  %v3880_v52 = vadd.f32 %v3879_v27, %v3878_v39 }
 0x492   :  { %v3825_v54 = vmul.f32 %v9353_v47, %v3815_v3  ;;  %v3826_v32 = vmul.f32 %v9360_v9, %v3815_v3  ;;  %v3491_v47 = vadd.f32 %v3483_v6, %v3450_v53  ;;  %v3885_v9 = vrot.slane %v3884_v21, 2 }
 0x493   :  { %v3609_v53 = vrot.slane %v3608_v13, 1  ;;  %v3894_v26 = vadd.f32 %v3893_v57, %v3892_v22  ;;  %v3900_v6 = vadd.f32 %v3899_v48, %v3898_v15  ;;  %v3533_v15 = vadd.f32 %v3525_v20, %v3492_v7 }
 0x494   :  { %v3833_v55 = vadd.f32 %v3825_v54, %v3793_v45  ;;  %v3834_v31 = vadd.f32 %v3826_v32, %v3794_v33  ;;  %v3886_v30 = vadd.f32 %v3885_v9, %v3884_v21  ;;  %v3881_v32 = vrot.slane %v3880_v52, 1 }
 0x495   :  { %v3604_v9 = vadd.f32 %v3603_v25, %v3602_v0  ;;  %v3928_v22 = vadd.f32 %v3900_v6, %v9292_v50 }
 0x496   :  { %v3873_v10 = vadd.f32 %v3865_v63, %v3833_v55  ;;  %v3874_v41 = vadd.f32 %v3866_v46, %v3834_v31  ;;  %v3779_v16 = vpop.permute.xlu1 %3778  ;;  %v3887_v38 = vrot.slane %v3886_v30, 1 }
 0x497   :  { %v3787_v60 = vmul.f32 %v5806_v42, %v3779_v16  ;;  %v3788_v19 = vmul.f32 %v5807_v56, %v3779_v16  ;;  %v3859_v42 = vpop.permute.xlu0 %3858  ;;  %v3532_v56 = vadd.f32 %v3524_v40, %v3491_v47  ;;  %v3927_v40 = vadd.f32 %v3894_v26, %v9288_v14 }
 0x498   :  { %v3901_v58 = vrot.slane %v3873_v10, 4  ;;  %v3907_v2 = vrot.slane %v3874_v41, 4  ;;  %v3867_v63 = vmul.f32 %v5846_v5, %v3859_v42  ;;  %v3868_v46 = vmul.f32 %v5847_v29, %v3859_v42 }
 0x499   :  { %v3795_v3 = vadd.f32 %v3787_v60, %v3755_v51  ;;  %v3796_v45 = vadd.f32 %v3788_v19, %v3756_v62  ;;  %v3888_v62 = vadd.f32 %v3887_v38, %v3886_v30  ;;  %v3942_v0 = vcombine.low %v3927_v40, %v3928_v22 }
 0x49a   :  { %v3902_v37 = vadd.f32 %v3901_v58, %v3873_v10  ;;  %v3908_v4 = vadd.f32 %v3907_v2, %v3874_v41  ;;  %v3610_v2 = vadd.f32 %v3609_v53, %v3608_v13  ;;  %v3638_v13 = vadd.f32 %v9288_v14, %v3604_v9 }
 0x49b   :  { %v3819_v12 = vpop.permute.xlu1 %3818 }
 0x49c   :  { %v3903_v39 = vrot.slane %v3902_v37, 2  ;;  %v3909_v21 = vrot.slane %v3908_v4, 2  ;;  %v3827_v33 = vmul.f32 %v9399_v17, %v3819_v12  ;;  %v3828_v54 = vmul.f32 %v5815_v8, %v3819_v12 }
 0x49d   :  { %v3882_v8 = vadd.f32 %v3881_v32, %v3880_v52  ;;  %v7353_v52 = vmov 1966171168   ;;  %v3639_v53 = vadd.f32 %v9292_v50, %v3610_v2 }
 0x49e   :  { %v3904_v55 = vadd.f32 %v3903_v39, %v3902_v37  ;;  %v3910_v31 = vadd.f32 %v3909_v21, %v3908_v4  ;;  %v3835_v44 = vadd.f32 %v3827_v33, %v3795_v3  ;;  %v3836_v27 = vadd.f32 %v3828_v54, %v3796_v45 }
 0x49f   :  { %v4088_v30 = vunpack.c.l.s4 %v7353_v52  ;;  %v3945_v39 = vrot.slane %v3942_v0, 7 }
 0x4a0   :  { %v3905_v47 = vrot.slane %v3904_v55, 1  ;;  %v3911_v10 = vrot.slane %v3910_v31, 1  ;;  %v3875_v41 = vadd.f32 %v3867_v63, %v3835_v44  ;;  %v3876_v51 = vadd.f32 %v3868_v46, %v3836_v27  ;;  %v3557_v17 = vpop.permute.xlu1 %3556 }
 0x4a1   :  { %v3565_v16 = vmul.f32 %v5846_v5, %v3557_v17  ;;  %v3566_v57 = vmul.f32 %v5847_v29, %v3557_v17  ;;  %v3925_v5 = vadd.f32 %v3882_v8, %v9288_v14  ;;  %v3926_v29 = vadd.f32 %v3888_v62, %v9292_v50 }
 0x4a2   :  { %v3906_v48 = vadd.f32 %v3905_v47, %v3904_v55  ;;  %v3912_v60 = vadd.f32 %v3911_v10, %v3910_v31  ;;  %v3913_v19 = vrot.slane %v3875_v41, 4  ;;  %v3919_v58 = vrot.slane %v3876_v51, 4 }
 0x4a3   :  { %v3573_v25 = vadd.f32 %v3565_v16, %v3532_v56  ;;  %v3574_v37 = vadd.f32 %v3566_v57, %v3533_v15  ;;  %v3941_v63 = vcombine.low %v3925_v5, %v3926_v29  ;;  %v4089_v31 = vunpack.c.0.s8 %v4088_v30 }
 0x4a4   :  { %v3929_v4 = vadd.f32 %v3906_v48, %v9288_v14  ;;  %v3930_v20 = vadd.f32 %v3912_v60, %v9292_v50  ;;  %v3914_v7 = vadd.f32 %v3913_v19, %v3875_v41  ;;  %v3920_v42 = vadd.f32 %v3919_v58, %v3876_v51 }
 0x4a5   :  { %v3611_v26 = vrot.slane %v3573_v25, 4  ;;  %v3617_v6 = vrot.slane %v3574_v37, 4  ;;  %v3652_v44 = vcombine.low %v3638_v13, %v3639_v53  ;;  %v3946_v22 = vsel %vm1037_vm3, %v3945_v39, %v3941_v63 }
 0x4a6   :  { %v3915_v3 = vrot.slane %v3914_v7, 2  ;;  %v3921_v45 = vrot.slane %v3920_v42, 2  ;;  %v3943_v21 = vcombine.low %v3929_v4, %v3930_v20  ;;  %v9450_v8 = vsub.s32 %v4089_v31, %v10001_v24 }
 0x4a7   :  { %v3612_v56 = vadd.f32 %v3611_v26, %v3573_v25  ;;  %v3618_v12 = vadd.f32 %v3617_v6, %v3574_v37  ;;  %v3657_v62 = vrot.slane %v3652_v44, 6  ;;  %v3947_v16 = vsel %vm1045_vm7, %v3945_v39, %v3946_v22 }
 0x4a8   :  { %v3916_v33 = vadd.f32 %v3915_v3, %v3914_v7  ;;  %v3922_v54 = vadd.f32 %v3921_v45, %v3920_v42  ;;  %v3948_v9 = vrot.slane %v3943_v21, 6  ;;  %v10002_v25 = vcombine.low %v9253_v23, %v9255_v18 }
 0x4a9   :  { %v3613_v32 = vrot.slane %v3612_v56, 2  ;;  %v3619_v38 = vrot.slane %v3618_v12, 2  ;;  %v3658_v4 = vsel %vm1039_vm4, %v3657_v62, %v9328_v49 }
 0x4aa   :  { %v3917_v46 = vrot.slane %v3916_v33, 1  ;;  %v3923_v55 = vrot.slane %v3922_v54, 1  ;;  %v3949_v60 = vsel %vm1039_vm4, %v3948_v9, %v3947_v16  ;;  %v4093_v37 = vrot.slane %v10002_v25, %v9450_v8 }
 0x4ab   :  { %v3614_v27 = vadd.f32 %v3613_v32, %v3612_v56  ;;  %v3620_v40 = vadd.f32 %v3619_v38, %v3618_v12  ;;  %v3950_v20 = vsel %vm1047_vm8, %v3948_v9, %v3949_v60 }
 0x4ac   :  { %v3918_v15 = vadd.f32 %v3917_v46, %v3916_v33  ;;  %v3924_v47 = vadd.f32 %v3923_v55, %v3922_v54  ;;  %v4101_v5 = vrot.slane %v4093_v37, %v9450_v8 }
 0x4ad   :  { %v3615_v10 = vrot.slane %v3614_v27, 1  ;;  %v3621_v41 = vrot.slane %v3620_v40, 1 }
 0x4ae   :  { %v3931_v51 = vadd.f32 %v3918_v15, %v9288_v14  ;;  %v3932_v17 = vadd.f32 %v3924_v47, %v9292_v50 }
 0x4af   :  { %v3616_v57 = vadd.f32 %v3615_v10, %v3614_v27  ;;  %v3622_v48 = vadd.f32 %v3621_v41, %v3620_v40 }
 0x4b0   :  { %v3944_v19 = vcombine.low %v3931_v51, %v3932_v17 }
 0x4b1   :  { %v3640_v58 = vadd.f32 %v9288_v14, %v3616_v57  ;;  %v3641_v2 = vadd.f32 %v9292_v50, %v3622_v48  ;;  %v3659_v14 = vsel %vm1047_vm8, %v3657_v62, %v3658_v4  ;;  %v4094_v50 = vcombine.high %v4093_v37, %v4093_v37 }
 0x4b2   :  { %v3951_v0 = vrot.slane %v3944_v19, 5 }
 0x4b3   :  { %v3653_v7 = vcombine.low %v3640_v58, %v3641_v2  ;;  %v4108_v18 = vrot.slane %v4094_v50, %v9450_v8 }
 0x4b4   :  { %v3952_v42 = vsel %vm1041_vm5, %v3951_v0, %v3950_v20 }
 0x4b5   :  { %v3953_v26 = vsel %vm1049_vm9, %v3951_v0, %v3952_v42  ;;  %v3660_v6 = vrot.slane %v3653_v7, 5 }
 0x4b6   :  { %3956 = vst [vmem:[#allocation2 + $0x8] sm:$0xff] %v3953_v26 }
 0x4b7   :  { %v3661_v52 = vsel %vm1041_vm5, %v3660_v6, %v3659_v14 }
 0x4b8   :  { %v3662_v23 = vsel %vm1049_vm9, %v3660_v6, %v3661_v52 }
 0x4b9   :  { %3664 = vst [vmem:[#allocation2] sm:$0xff] %v3662_v23 }
 0x4bd   :  { %v4009_v49 = vld [vmem:[#allocation2 + $0x8] ss:$4 sm:$0x3]  ;;  %v4172_v7 = vld [vmem:[#allocation2 + $0x9] ss:$4 sm:$0x3] }
 0x4be   :  { %v4112_v30 = vadd.f32 %v4108_v18, %v4009_v49 }
 0x4c0   :  { %4129 = vrot.lane.b32.xlu0 %v4112_v30, %s7354_s4  ;;  %v4007_v29 = vld [vmem:[#allocation2] ss:$4 sm:$0x3]  ;;  %v5850_v45 = vmul.f32 -1.442695, %v4112_v30 }
 0x4c1   :  { %v4111_v3 = vadd.f32 %v4101_v5, %v4007_v29  ;;  %v4170_v20 = vld [vmem:[#allocation2 + $0x1] ss:$4 sm:$0x3] }
 0x4c2   :  { %7205 = vpow2.f32 %v5850_v45 }
 0x4c3   :  { %4127 = vrot.lane.b32.xlu1 %v4111_v3, %s7354_s4  ;;  %v5849_v13 = vmul.f32 -1.442695, %v4111_v3 }
 0x4c5   :  { %7207 = vpow2.f32 %v5849_v13 }
 0x4cc   :  { %v7206_v53 = vpop.eup %7205 }
 0x4cd   :  { %v4120_v12 = vadd.f32 1.0, %v7206_v53 }
 0x4cf   :  { %v7208_v56 = vpop.eup %7207  ;;  %7209 = vrcp.f32 %v4120_v12 }
 0x4d0   :  { %v4119_v21 = vadd.f32 1.0, %v7208_v56 }
 0x4d9   :  { %v7210_v38 = vpop.eup %7209 }
 0x4da   :  { %v4138_v27 = vmul.f32 0.0, %v7210_v38  ;;  %v4156_v17 = vrot.slane %v7210_v38, 1 }
 0x532   :  { %v4130_v39 = vpop.permute.xlu0 %4129 }
 0x533   :  { %v4132_v33 = vrot.slane %v4130_v39, 1 }
 0x535   :  { %7211 = vtanh.f32 %v4132_v33  ;;  %v4128_v54 = vpop.permute.xlu1 %4127  ;;  %v3992_v33 = vld [vmem:[%s9898_s5 + $0x58] sm:$0xff] }
 0x536   :  { %v4131_v32 = vrot.slane %v4128_v54, 1  ;;  %7213 = vrcp.f32 %v4119_v21  ;;  %v3990_v21 = vld [vmem:[%s9898_s5 + $0x28] sm:$0xff] }
 0x537   :  { %v9513_v54 = vpack.c.bf16 %v3992_v33, %v3990_v21  ;;  %v3987_v21 = vld [vmem:[%s9898_s5 + $0x160] sm:$0xff] }
 0x538   :  { %7215 = vtanh.f32 %v4131_v32 }
 0x539   :  { %7004 = vmatprep.subr.bf16.mxu1 %v9513_v54 }
 0x53f   :  { %v7212_v63 = vpop.eup %7211 }
 0x540   :  { %v4140_v46 = vmul.f32 %v7212_v63, %v7210_v38  ;;  %v7214_v55 = vpop.eup %7213 }
 0x541   :  { %v4137_v9 = vmul.f32 0.0, %v7214_v55  ;;  %v4155_v62 = vrot.slane %v7214_v55, 1 }
 0x542   :  { %v7216_v31 = vpop.eup %7215  ;;  %4145 = vrot.lane.b32.xlu0 %v4140_v46, %s7354_s4 }
 0x543   :  { %v4139_v44 = vmul.f32 %v7216_v31, %v7214_v55 }
 0x545   :  { %4143 = vrot.lane.b32.xlu1 %v4139_v44, %s7354_s4 }
 0x5b4   :  { %v4146_v40 = vpop.permute.xlu0 %4145 }
 0x5b5   :  { %v9474_v22 = vadd.f32 %v4146_v40, %v4138_v27 }
 0x5b7   :  { %7217 = vtanh.f32 %v9474_v22  ;;  %v4144_v15 = vpop.permute.xlu1 %4143 }
 0x5b8   :  { %v4149_v47 = vadd.f32 %v4144_v15, %v4137_v9  ;;  %v3991_v9 = vld [vmem:[%s9898_s5 + $0x50] sm:$0xff]  ;;  %v3994_v15 = vld [vmem:[%s9898_s5 + $0x88] sm:$0xff] }
 0x5ba   :  { %7219 = vtanh.f32 %v4149_v47 }
 0x5c1   :  { %v7218_v10 = vpop.eup %7217 }
 0x5c2   :  { %4163 = vrot.lane.b32.xlu0 %v7218_v10, %s7354_s4 }
 0x5c4   :  { %v7220_v41 = vpop.eup %7219 }
 0x5c5   :  { %4161 = vrot.lane.b32.xlu1 %v7220_v41, %s7354_s4 }
 0x634   :  { %v4164_v51 = vpop.permute.xlu0 %4163 }
 0x635   :  { %v4168_v57 = vmul.f32 %v4164_v51, %v4156_v17 }
 0x637   :  { %v4162_v16 = vpop.permute.xlu1 %4161 }
 0x638   :  { %v4167_v48 = vmul.f32 %v4162_v16, %v4155_v62  ;;  %v3993_v62 = vld [vmem:[%s9898_s5 + $0x80] sm:$0xff]  ;;  %v3995_v16 = vld [vmem:[%s9898_s5 + $0xb0] sm:$0xff] }
 0x63a   :  { %v4175_v60 = vcombine.low %v4167_v48, %v4168_v57  ;;  %v3998_v57 = vld [vmem:[%s9898_s5 + $0xe8] sm:$0xff]  ;;  %v4000_v48 = vld [vmem:[%s9898_s5 + $0x118] sm:$0xff] }
 0x63c   :  { %v4182_v19 = vrot.slane %v4175_v60, %v9450_v8  ;;  %v9554_v60 = vpack.c.bf16 %v3995_v16, %v3993_v62 }
 0x63e   :  { %v9481_v58 = vrot.slane %v4182_v19, %v9450_v8  ;;  %v9558_v19 = vpack.c.bf16 %v4000_v48, %v3998_v57 }
 0x640   :  { %5851 = vmatmul.mubr.msk.f32.vlgmr.msra.gmra.mrb[54].mxu0 %vm2316_vm10, %v9481_v58 }
 0x641   :  { %6990 = vmatpush1.bf16.msra.mxu0 %v9119_v34  ;;  %4614 = vmatprep.mubr.f32.mxu0 %v10000_v59 }
 0x642   :  { %6992 = vmatprep.subr.bf16.mxu0 %v9124_v61 }
 0x645   :  { %6994 = vmatpush1.bf16.msra.mxu0 %v9136_v1 }
 0x646   :  { %6996 = vmatprep.subr.bf16.mxu0 %v9147_v36 }
 0x649   :  { %6998 = vmatpush1.bf16.msra.mxu0 %v9153_v11 }
 0x64a   :  { %7000 = vmatprep.subr.bf16.mxu0 %v9170_v43 }
 0x64d   :  { %7002 = vmatpush1.bf16.msra.mxu0 %v9177_v35 }
 0x64e   :  { %7036 = vmatprep.subr.bf16.mxu0 %v9513_v54 }
 0x713   :  { %v4258_v2 = vpop.f32.mrb[54].mxu0 }
 0x714   :  { %v4260_v0 = vpop.f32.mrb[55].mxu0 }
 0x715   :  { %v4265_v25 = vcombine.low %v4258_v2, %v4260_v0  ;;  %v3997_v2 = vld [vmem:[%s9898_s5 + $0xe0] sm:$0xff]  ;;  %v3999_v0 = vld [vmem:[%s9898_s5 + $0x110] sm:$0xff] }
 0x717   :  { %v4272_v37 = vrot.slane %v4265_v25, %v9450_v8  ;;  %v4002_v25 = vld [vmem:[%s9898_s5 + $0x148] sm:$0xff] }
 0x719   :  { %v4273_v34 = vcombine.high %v4272_v37, %v4272_v37  ;;  %v4280_v4 = vrot.slane %v4272_v37, %v9450_v8  ;;  %v4004_v37 = vld [vmem:[%s9898_s5 + $0x178] sm:$0xff] }
 0x71b   :  { %v4290_v61 = vadd.f32 %v4280_v4, %v4170_v20  ;;  %v4287_v1 = vrot.slane %v4273_v34, %v9450_v8  ;;  %v9573_v34 = vpack.c.bf16 %v3999_v0, %v3997_v2  ;;  %v9576_v4 = vpack.c.bf16 %v4004_v37, %v4002_v25  ;;  %v4001_v20 = vld [vmem:[%s9898_s5 + $0x140] sm:$0xff] }
 0x71d   :  { %4306 = vrot.lane.b32.xlu1 %v4290_v61, %s7354_s4  ;;  %v4291_v36 = vadd.f32 %v4287_v1, %v4172_v7  ;;  %v5852_v11 = vmul.f32 -1.442695, %v4290_v61  ;;  %v4003_v61 = vld [vmem:[%s9898_s5 + $0x170] sm:$0xff]  ;;  %v3974_v1 = vld [vmem:[%s9898_s5 + $0x18] sm:$0xff]  ;;  %v3976_v7 = vld [vmem:[%s9898_s5 + $0x48] sm:$0xff] }
 0x71f   :  { %4308 = vrot.lane.b32.xlu0 %v4291_v36, %s7354_s4  ;;  %v5853_v43 = vmul.f32 -1.442695, %v4291_v36  ;;  %7221 = vpow2.f32 %v5852_v11  ;;  %v9591_v36 = vpack.c.bf16 %v4003_v61, %v4001_v20  ;;  %v9594_v11 = vpack.c.bf16 %v3976_v7, %v3974_v1 }
 0x721   :  { %7223 = vpow2.f32 %v5853_v43  ;;  %v3973_v43 = vld [vmem:[%s9898_s5 + $0x10] sm:$0xff] }
 0x729   :  { %v7222_v35 = vpop.eup %7221 }
 0x72a   :  { %v4298_v26 = vadd.f32 1.0, %v7222_v35  ;;  %v3975_v35 = vld [vmem:[%s9898_s5 + $0x40] sm:$0xff] }
 0x72b   :  { %v7224_v42 = vpop.eup %7223 }
 0x72c   :  { %v4299_v6 = vadd.f32 1.0, %v7224_v42  ;;  %7225 = vrcp.f32 %v4298_v26  ;;  %v3978_v42 = vld [vmem:[%s9898_s5 + $0x78] sm:$0xff]  ;;  %v3980_v26 = vld [vmem:[%s9898_s5 + $0xa8] sm:$0xff] }
 0x736   :  { %v7226_v18 = vpop.eup %7225 }
 0x737   :  { %v4316_v45 = vmul.f32 %v7226_v18, %v4149_v47  ;;  %v4334_v46 = vrot.slane %v7226_v18, 1  ;;  %v3996_v47 = vld [vmem:[%s9898_s5 + $0xb8] sm:$0xff] }
 0x738   :  { %v9537_v17 = vpack.c.bf16 %v3996_v47, %v3994_v15  ;;  %v10003_v15 = vsub.s32 1, %v10001_v24 }
 0x78f   :  { %v4307_v14 = vpop.permute.xlu1 %4306 }
 0x790   :  { %v4310_v50 = vrot.slane %v4307_v14, 1  ;;  %v9612_v14 = vpack.c.bf16 %v3980_v26, %v3978_v42 }
 0x791   :  { %v4309_v52 = vpop.permute.xlu0 %4308 }
 0x792   :  { %7227 = vtanh.f32 %v4310_v50  ;;  %v4311_v23 = vrot.slane %v4309_v52, 1  ;;  %v3977_v50 = vld [vmem:[%s9898_s5 + $0x70] sm:$0xff]  ;;  %v3979_v52 = vld [vmem:[%s9898_s5 + $0xa0] sm:$0xff] }
 0x793   :  { %7229 = vrcp.f32 %v4299_v6  ;;  %v9609_v6 = vpack.c.bf16 %v3975_v35, %v3973_v43 }
 0x794   :  { %7231 = vtanh.f32 %v4311_v23  ;;  %v3982_v23 = vld [vmem:[%s9898_s5 + $0xd8] sm:$0xff] }
 0x79c   :  { %v7228_v49 = vpop.eup %7227 }
 0x79d   :  { %v7230_v30 = vpop.eup %7229  ;;  %v4318_v5 = vmul.f32 %v7228_v49, %v7226_v18  ;;  %v3984_v18 = vld [vmem:[%s9898_s5 + $0x108] sm:$0xff]  ;;  %v9628_v49 = vpack.c.bf16 %v3979_v52, %v3977_v50 }
 0x79e   :  { %v7232_v29 = vpop.eup %7231  ;;  %v4317_v56 = vmul.f32 %v7230_v30, %v9474_v22  ;;  %v4335_v55 = vrot.slane %v7230_v30, 1  ;;  %v3989_v22 = vld [vmem:[%s9898_s5 + $0x20] sm:$0xff] }
 0x79f   :  { %4322 = vrot.lane.b32.xlu1 %v4318_v5, %s7354_s4  ;;  %v4319_v3 = vmul.f32 %v7232_v29, %v7230_v30  ;;  %v9532_v41 = vpack.c.bf16 %v3991_v9, %v3989_v22  ;;  %v9632_v30 = vpack.c.bf16 %v3984_v18, %v3982_v23  ;;  %v3981_v5 = vld [vmem:[%s9898_s5 + $0xd0] sm:$0xff]  ;;  %v3983_v29 = vld [vmem:[%s9898_s5 + $0x100] sm:$0xff] }
 0x7a0   :  { %v5848_v9 = vld [vmem:[%s9901_s8 + $0x1] ss:$8 sm:$0x3] }
 0x7a1   :  { %4324 = vrot.lane.b32.xlu0 %v4319_v3, %s7354_s4  ;;  %v3986_v3 = vld [vmem:[%s9898_s5 + $0x138] sm:$0xff]  ;;  %v9685_v47 = vrot.slane %v5848_v9, %v10003_v15  ;;  %v9690_v20 = vrot.slane %v5848_v9, %v7803_v28 }
 0x811   :  { %v4323_v13 = vpop.permute.xlu1 %4322 }
 0x812   :  { %v9500_v53 = vadd.f32 %v4323_v13, %v4316_v45  ;;  %v3988_v45 = vld [vmem:[%s9898_s5 + $0x168] sm:$0xff]  ;;  %v9647_v13 = vpack.c.bf16 %v3983_v29, %v3981_v5 }
 0x813   :  { %v4325_v12 = vpop.permute.xlu0 %4324 }
 0x814   :  { %7233 = vtanh.f32 %v9500_v53  ;;  %v9504_v39 = vadd.f32 %v4325_v12, %v4317_v56  ;;  %v9650_v56 = vpack.c.bf16 %v3988_v45, %v3986_v3  ;;  %v3985_v12 = vld [vmem:[%s9898_s5 + $0x130] sm:$0xff] }
 0x815   :  { %v9659_v33 = vpack.c.bf16 %v3987_v21, %v3985_v12 }
 0x816   :  { %7235 = vtanh.f32 %v9504_v39 }
 0x81e   :  { %v7234_v32 = vpop.eup %7233 }
 0x81f   :  { %4340 = vrot.lane.b32.xlu1 %v7234_v32, %s7354_s4 }
 0x820   :  { %v7236_v38 = vpop.eup %7235 }
 0x821   :  { %4342 = vrot.lane.b32.xlu0 %v7236_v38, %s7354_s4 }
 0x891   :  { %v4341_v63 = vpop.permute.xlu1 %4340 }
 0x892   :  { %v4346_v44 = vmul.f32 %v4341_v63, %v4334_v46 }
 0x893   :  { %v4343_v31 = vpop.permute.xlu0 %4342 }
 0x894   :  { %v4347_v27 = vmul.f32 %v4343_v31, %v4335_v55  ;;  %v4349_v31 = vld [vmem:[#allocation2 + $0x2] ss:$4 sm:$0x3] }
 0x896   :  { %v4354_v40 = vcombine.low %v4346_v44, %v4347_v27 }
 0x898   :  { %v4361_v10 = vrot.slane %v4354_v40, %v9450_v8  ;;  %v4351_v40 = vld [vmem:[#allocation2 + $0xa] ss:$4 sm:$0x3] }
 0x89a   :  { %v9535_v51 = vrot.slane %v4361_v10, %v9450_v8 }
 0x89c   :  { %5854 = vmatmul.mubr.msk.f32.vlgmr.msra.gmra.mrb[38].mxu1 %vm2316_vm10, %v9535_v51 }
 0x89d   :  { %7006 = vmatpush1.bf16.msra.mxu1 %v9532_v41  ;;  %4770 = vmatprep.mubr.f32.mxu1 %v10000_v59 }
 0x89e   :  { %7008 = vmatprep.subr.bf16.mxu1 %v9537_v17 }
 0x8a1   :  { %7010 = vmatpush1.bf16.msra.mxu1 %v9554_v60 }
 0x8a2   :  { %7012 = vmatprep.subr.bf16.mxu1 %v9558_v19 }
 0x8a5   :  { %7014 = vmatpush1.bf16.msra.mxu1 %v9573_v34 }
 0x8a6   :  { %7016 = vmatprep.subr.bf16.mxu1 %v9576_v4 }
 0x8a9   :  { %7018 = vmatpush1.bf16.msra.mxu1 %v9591_v36 }
 0x8aa   :  { %7020 = vmatprep.subr.bf16.mxu1 %v9594_v11 }
 0x8ac   :  { %4771 = vmatmul.mubr.f32.vlgmr.msra.gmra.mrb[40].mxu1 %v10000_v59 }
 0x8ad   :  { %7022 = vmatpush1.bf16.msra.mxu1 %v9609_v6  ;;  %4841 = vmatprep.mubr.f32.mxu1 %v10000_v59 }
 0x8ae   :  { %7024 = vmatprep.subr.bf16.mxu1 %v9612_v14 }
 0x8b1   :  { %7026 = vmatpush1.bf16.msra.mxu1 %v9628_v49 }
 0x8b2   :  { %7028 = vmatprep.subr.bf16.mxu1 %v9632_v30 }
 0x8b5   :  { %7030 = vmatpush1.bf16.msra.mxu1 %v9647_v13 }
 0x8b6   :  { %7032 = vmatprep.subr.bf16.mxu1 %v9650_v56 }
 0x8b9   :  { %7034 = vmatpush1.bf16.msra.mxu1 %v9659_v33 }
 0x8ba   :  { %7068 = vmatprep.subr.bf16.mxu1 %v9513_v54 }
 0x8bc   :  { %5860 = vmatmul.mubr.msk.f32.vlgmr.msra.gmra.mrb[40].mxu1 %vm2316_vm10, %v9481_v58 }
 0x8bd   :  { %7070 = vmatpush1.bf16.msra.mxu1 %v9532_v41  ;;  %5135 = vmatprep.mubr.f32.mxu1 %v10000_v59 }
 0x8be   :  { %7072 = vmatprep.subr.bf16.mxu1 %v9537_v17 }
 0x8c1   :  { %7074 = vmatpush1.bf16.msra.mxu1 %v9554_v60 }
 0x8c2   :  { %7076 = vmatprep.subr.bf16.mxu1 %v9558_v19 }
 0x8c5   :  { %7078 = vmatpush1.bf16.msra.mxu1 %v9573_v34 }
 0x8c6   :  { %7080 = vmatprep.subr.bf16.mxu1 %v9576_v4 }
 0x8c9   :  { %7082 = vmatpush1.bf16.msra.mxu1 %v9591_v36 }
 0x8ca   :  { %7084 = vmatprep.subr.bf16.mxu1 %v9594_v11 }
 0x96f   :  { %v4437_v32 = vpop.f32.mrb[38].mxu1 }
 0x970   :  { %v4439_v58 = vpop.f32.mrb[39].mxu1 }
 0x971   :  { %v4444_v38 = vcombine.low %v4437_v32, %v4439_v58 }
 0x973   :  { %v4451_v63 = vrot.slane %v4444_v38, %v9450_v8 }
 0x975   :  { %v4452_v46 = vcombine.high %v4451_v63, %v4451_v63  ;;  %v4459_v55 = vrot.slane %v4451_v63, %v9450_v8 }
 0x977   :  { %v4469_v44 = vadd.f32 %v4459_v55, %v4349_v31  ;;  %v4466_v27 = vrot.slane %v4452_v46, %v9450_v8 }
 0x979   :  { %4485 = vrot.lane.b32.xlu1 %v4469_v44, %s7354_s4  ;;  %v4470_v22 = vadd.f32 %v4466_v27, %v4351_v40  ;;  %v5855_v48 = vmul.f32 -1.442695, %v4469_v44 }
 0x97b   :  { %4487 = vrot.lane.b32.xlu0 %v4470_v22, %s7354_s4  ;;  %v5856_v2 = vmul.f32 -1.442695, %v4470_v22 }
 0x98f   :  { %v4843_v10 = vpop.f32.mrb[40].mxu1 }
 0x990   :  { %v4845_v62 = vpop.f32.mrb[41].mxu1  ;;  %v4859_v7 = vadd.f32 %v9690_v20, %v4843_v10 }
 0x991   :  { %v4860_v16 = vadd.f32 %v9685_v47, %v4845_v62 }
 0x992   :  { %v5861_v42 = vmul.f32 -1.442695, %v4859_v7 }
 0x993   :  { %7237 = vtanh.f32 %v4860_v16  ;;  %v5862_v40 = vmul.f32 -1.442695, %v4860_v16 }
 0x994   :  { %7239 = vpow2.f32 %v5855_v48 }
 0x995   :  { %7241 = vpow2.f32 %v5856_v2 }
 0x99d   :  { %v7238_v57 = vpop.eup %7237 }
 0x99e   :  { %4876 = vrot.lane.b32.xlu1 %v7238_v57, %s7354_s4  ;;  %v7240_v0 = vpop.eup %7239 }
 0x99f   :  { %v7242_v25 = vpop.eup %7241  ;;  %v4477_v37 = vadd.f32 1.0, %v7240_v0 }
 0x9a0   :  { %v4478_v24 = vadd.f32 1.0, %v7242_v25 }
 0x9a1   :  { %7243 = vrcp.f32 %v4477_v37 }
 0x9ab   :  { %v7244_v26 = vpop.eup %7243 }
 0x9ac   :  { %v4495_v21 = vmul.f32 %v7244_v26, %v9500_v53  ;;  %v4513_v9 = vrot.slane %v7244_v26, 1 }
 0x9eb   :  { %v4486_v61 = vpop.permute.xlu1 %4485 }
 0x9ec   :  { %v4489_v1 = vrot.slane %v4486_v61, 1 }
 0x9ed   :  { %v4488_v43 = vpop.permute.xlu0 %4487 }
 0x9ee   :  { %7245 = vtanh.f32 %v4489_v1  ;;  %v4490_v35 = vrot.slane %v4488_v43, 1 }
 0x9ef   :  { %7247 = vrcp.f32 %v4478_v24 }
 0x9f0   :  { %7249 = vtanh.f32 %v4490_v35 }
 0x9f1   :  { %7251 = vpow2.f32 %v5861_v42 }
 0x9f8   :  { %v7246_v50 = vpop.eup %7245 }
 0x9f9   :  { %v7248_v52 = vpop.eup %7247  ;;  %v4497_v23 = vmul.f32 %v7246_v50, %v7244_v26  ;;  %v4528_v50 = vld [vmem:[#allocation2 + $0x3] ss:$4 sm:$0x3] }
 0x9fa   :  { %v7250_v18 = vpop.eup %7249  ;;  %v4496_v38 = vmul.f32 %v7248_v52, %v9504_v39  ;;  %v4514_v15 = vrot.slane %v7248_v52, 1 }
 0x9fb   :  { %4501 = vrot.lane.b32.xlu0 %v4497_v23, %s7354_s4  ;;  %v4498_v28 = vmul.f32 %v7250_v18, %v7248_v52  ;;  %v7252_v5 = vpop.eup %7251 }
 0x9fc   :  { %v4867_v29 = vadd.f32 1.0, %v7252_v5 }
 0x9fd   :  { %4503 = vrot.lane.b32.xlu1 %v4498_v28, %s7354_s4 }
 0x9fe   :  { %7253 = vrcp.f32 %v4867_v29 }
 0xa08   :  { %v7254_v3 = vpop.eup %7253 }
 0xa09   :  { %v4874_v44 = vmul.f32 0.0, %v7254_v3 }
 0xa10   :  { %v4877_v45 = vpop.permute.xlu1 %4876 }
 0xa11   :  { %v4879_v12 = vmul.f32 %v7254_v3, %v4877_v45  ;;  %v4530_v45 = vld [vmem:[#allocation2 + $0xb] ss:$4 sm:$0x3] }
 0xa13   :  { %4881 = vrot.lane.b32.xlu0 %v4879_v12, %s7354_s4 }
 0xa6d   :  { %v4502_v32 = vpop.permute.xlu0 %4501 }
 0xa6e   :  { %v9697_v58 = vadd.f32 %v4502_v32, %v4495_v21 }
 0xa6f   :  { %v4504_v63 = vpop.permute.xlu1 %4503 }
 0xa70   :  { %7255 = vtanh.f32 %v9697_v58  ;;  %v9701_v46 = vadd.f32 %v4504_v63, %v4496_v38 }
 0xa72   :  { %7257 = vtanh.f32 %v9701_v46 }
 0xa7a   :  { %v7256_v55 = vpop.eup %7255 }
 0xa7b   :  { %4519 = vrot.lane.b32.xlu1 %v7256_v55, %s7354_s4 }
 0xa7c   :  { %v7258_v31 = vpop.eup %7257 }
 0xa7d   :  { %4521 = vrot.lane.b32.xlu0 %v7258_v31, %s7354_s4 }
 0xa85   :  { %v4882_v53 = vpop.permute.xlu0 %4881 }
 0xa86   :  { %v9706_v27 = vadd.f32 %v4882_v53, %v4874_v44  ;;  %v10004_v44 = vmov 0.0|0.0  }
 0xa88   :  { %7259 = vtanh.f32 %v9706_v27 }
 0xa89   :  { %7261 = vpow2.f32 %v5862_v40 }
 0xa92   :  { %v7260_v39 = vpop.eup %7259 }
 0xa93   :  { %4887 = vrot.lane.b32.xlu1 %v7260_v39, %s7354_s4  ;;  %v7262_v2 = vpop.eup %7261 }
 0xa94   :  { %v4868_v37 = vadd.f32 1.0, %v7262_v2 }
 0xa96   :  { %7263 = vrcp.f32 %v4868_v37 }
 0xaa0   :  { %v7264_v16 = vpop.eup %7263 }
 0xaed   :  { %v4520_v22 = vpop.permute.xlu1 %4519 }
 0xaee   :  { %v4525_v62 = vmul.f32 %v4520_v22, %v4513_v9 }
 0xaef   :  { %v4522_v10 = vpop.permute.xlu0 %4521 }
 0xaf0   :  { %v4526_v57 = vmul.f32 %v4522_v10, %v4514_v15 }
 0xaf2   :  { %v4533_v48 = vcombine.low %v4525_v62, %v4526_v57 }
 0xaf4   :  { %v4540_v0 = vrot.slane %v4533_v48, %v9450_v8 }
 0xaf6   :  { %v9712_v25 = vrot.slane %v4540_v0, %v9450_v8 }
 0xaf8   :  { %5857 = vmatmul.mubr.msk.f32.vlgmr.msra.gmra.mrb[56].mxu0 %vm2316_vm10, %v9712_v25 }
 0xaf9   :  { %7038 = vmatpush1.bf16.msra.mxu0 %v9532_v41  ;;  %4958 = vmatprep.mubr.f32.mxu0 %v10000_v59 }
 0xafa   :  { %7040 = vmatprep.subr.bf16.mxu0 %v9537_v17 }
 0xafd   :  { %7042 = vmatpush1.bf16.msra.mxu0 %v9554_v60 }
 0xafe   :  { %7044 = vmatprep.subr.bf16.mxu0 %v9558_v19 }
 0xb01   :  { %7046 = vmatpush1.bf16.msra.mxu0 %v9573_v34 }
 0xb02   :  { %7048 = vmatprep.subr.bf16.mxu0 %v9576_v4 }
 0xb05   :  { %v4888_v24 = vpop.permute.xlu1 %4887  ;;  %7050 = vmatpush1.bf16.msra.mxu0 %v9591_v36 }
 0xb06   :  { %v4890_v61 = vmul.f32 %v7264_v16, %v4888_v24  ;;  %7052 = vmatprep.subr.bf16.mxu0 %v9594_v11 }
 0xb08   :  { %5863 = vmatmul.mubr.msk.f32.vlgmr.msra.gmra.mrb[58].mxu0 %vm2316_vm10, %v4890_v61 }
 0xb09   :  { %7054 = vmatpush1.bf16.msra.mxu0 %v9609_v6  ;;  %5029 = vmatprep.mubr.f32.mxu0 %v10000_v59 }
 0xb0a   :  { %7056 = vmatprep.subr.bf16.mxu0 %v9612_v14 }
 0xb0d   :  { %7058 = vmatpush1.bf16.msra.mxu0 %v9628_v49 }
 0xb0e   :  { %7060 = vmatprep.subr.bf16.mxu0 %v9632_v30 }
 0xb11   :  { %7062 = vmatpush1.bf16.msra.mxu0 %v9647_v13 }
 0xb12   :  { %7064 = vmatprep.subr.bf16.mxu0 %v9650_v56 }
 0xb15   :  { %7066 = vmatpush1.bf16.msra.mxu0 %v9659_v33 }
 0xb16   :  { %7100 = vmatprep.subr.bf16.mxu0 %v9513_v54 }
 0xb18   :  { %5864 = vmatmul.mubr.msk.f32.vlgmr.msra.gmra.mrb[58].mxu0 %vm2316_vm10, %v9535_v51 }
 0xb19   :  { %7102 = vmatpush1.bf16.msra.mxu0 %v9532_v41  ;;  %5312 = vmatprep.mubr.f32.mxu0 %v10000_v59 }
 0xb1a   :  { %7104 = vmatprep.subr.bf16.mxu0 %v9537_v17 }
 0xb1d   :  { %7106 = vmatpush1.bf16.msra.mxu0 %v9554_v60 }
 0xb1e   :  { %7108 = vmatprep.subr.bf16.mxu0 %v9558_v19 }
 0xb21   :  { %7110 = vmatpush1.bf16.msra.mxu0 %v9573_v34 }
 0xb22   :  { %7112 = vmatprep.subr.bf16.mxu0 %v9576_v4 }
 0xb25   :  { %7114 = vmatpush1.bf16.msra.mxu0 %v9591_v36 }
 0xb26   :  { %7116 = vmatprep.subr.bf16.mxu0 %v9594_v11 }
 0xbcb   :  { %v4616_v54 = vpop.f32.mrb[56].mxu0 }
 0xbcc   :  { %v4618_v51 = vpop.f32.mrb[57].mxu0 }
 0xbcd   :  { %v4623_v1 = vcombine.low %v4616_v54, %v4618_v51 }
 0xbcf   :  { %v4630_v36 = vrot.slane %v4623_v1, %v9450_v8 }
 0xbd1   :  { %v4638_v42 = vrot.slane %v4630_v36, %v9450_v8  ;;  %v4631_v5 = vcombine.high %v4630_v36, %v4630_v36 }
 0xbd3   :  { %v4648_v52 = vadd.f32 %v4638_v42, %v4528_v50  ;;  %v4645_v29 = vrot.slane %v4631_v5, %v9450_v8 }
 0xbd5   :  { %v4649_v12 = vadd.f32 %v4645_v29, %v4530_v45  ;;  %v5858_v53 = vmul.f32 -1.442695, %v4648_v52 }
 0xbd7   :  { %v5859_v37 = vmul.f32 -1.442695, %v4649_v12 }
 0xbeb   :  { %v5031_v41 = vpop.f32.mrb[58].mxu0 }
 0xbec   :  { %v5033_v7 = vpop.f32.mrb[59].mxu0  ;;  %v5036_v60 = vadd.f32 %v5031_v41, %v9690_v20 }
 0xbed   :  { %v5037_v43 = vadd.f32 %v5033_v7, %v9685_v47 }
 0xbee   :  { %v5865_v19 = vmul.f32 -1.442695, %v5036_v60 }
 0xbef   :  { %7265 = vtanh.f32 %v5037_v43  ;;  %v5866_v21 = vmul.f32 -1.442695, %v5037_v43 }
 0xbf0   :  { %7267 = vpow2.f32 %v5865_v19 }
 0xbf9   :  { %v7266_v17 = vpop.eup %7265 }
 0xbfa   :  { %5053 = vrot.lane.b32.xlu0 %v7266_v17, %s7354_s4  ;;  %v7268_v34 = vpop.eup %7267 }
 0xbfb   :  { %v5044_v4 = vadd.f32 1.0, %v7268_v34 }
 0xbfd   :  { %7269 = vrcp.f32 %v5044_v4 }
 0xc07   :  { %v7270_v11 = vpop.eup %7269 }
 0xc08   :  { %v5051_v23 = vmul.f32 %v7270_v11, %v9706_v27 }
 0xc6c   :  { %v5054_v35 = vpop.permute.xlu0 %5053 }
 0xc6d   :  { %v5056_v26 = vmul.f32 %v7270_v11, %v5054_v35 }
 0xc6f   :  { %5058 = vrot.lane.b32.xlu1 %v5056_v26, %s7354_s4 }
 0xc73   :  { %4664 = vrot.lane.b32.xlu1 %v4648_v52, %s7354_s4 }
 0xce1   :  { %v5059_v18 = vpop.permute.xlu1 %5058 }
 0xce2   :  { %v9754_v28 = vadd.f32 %v5059_v18, %v5051_v23 }
 0xce4   :  { %7271 = vtanh.f32 %v9754_v28 }
 0xce5   :  { %7273 = vpow2.f32 %v5866_v21  ;;  %v4665_v27 = vpop.permute.xlu1 %4664 }
 0xce6   :  { %v4668_v40 = vrot.slane %v4665_v27, 1 }
 0xcee   :  { %v7272_v3 = vpop.eup %7271 }
 0xcef   :  { %5064 = vrot.lane.b32.xlu0 %v7272_v3, %s7354_s4  ;;  %v7274_v32 = vpop.eup %7273 }
 0xcf0   :  { %v5045_v38 = vadd.f32 1.0, %v7274_v32 }
 0xcf2   :  { %7275 = vrcp.f32 %v5045_v38 }
 0xcf3   :  { %4666 = vrot.lane.b32.xlu0 %v4649_v12, %s7354_s4  ;;  %7277 = vpow2.f32 %v5858_v53 }
 0xcf4   :  { %7279 = vtanh.f32 %v4668_v40 }
 0xcfc   :  { %v7276_v63 = vpop.eup %7275 }
 0xcfd   :  { %v7278_v39 = vpop.eup %7277 }
 0xcfe   :  { %v4656_v15 = vadd.f32 1.0, %v7278_v39  ;;  %v7280_v62 = vpop.eup %7279 }
 0xd61   :  { %v5065_v55 = vpop.permute.xlu0 %5064 }
 0xd62   :  { %v5067_v31 = vmul.f32 %v7276_v63, %v5065_v55 }
 0xd64   :  { %5867 = vmatmul.mubr.msk.f32.vlgmr.msra.gmra.mrb[42].mxu1 %vm2316_vm10, %v5067_v31 }
 0xd65   :  { %7086 = vmatpush1.bf16.msra.mxu1 %v9609_v6  ;;  %5206 = vmatprep.mubr.f32.mxu1 %v10000_v59  ;;  %v4667_v24 = vpop.permute.xlu0 %4666 }
 0xd66   :  { %7088 = vmatprep.subr.bf16.mxu1 %v9612_v14  ;;  %v4669_v51 = vrot.slane %v4667_v24, 1  ;;  %v5528_v24 = vld [vmem:[%s9900_s7] sm:$0xff] }
 0xd69   :  { %7090 = vmatpush1.bf16.msra.mxu1 %v9628_v49 }
 0xd6a   :  { %7092 = vmatprep.subr.bf16.mxu1 %v9632_v30 }
 0xd6d   :  { %7094 = vmatpush1.bf16.msra.mxu1 %v9647_v13 }
 0xd6e   :  { %7096 = vmatprep.subr.bf16.mxu1 %v9650_v56 }
 0xd71   :  { %7098 = vmatpush1.bf16.msra.mxu1 %v9659_v33 }
 0xd72   :  { %7131 = vmatprep.subr.bf16.mxu1 %v10004_v44 }
 0xd74   :  { %5868 = vmatmul.mubr.msk.f32.vlgmr.msra.gmra.mrb[42].mxu1 %vm2316_vm10, %v9712_v25 }
 0xd75   :  { %6562 = vmatprep.mubr.msk.f32.mxu1 %vm7346_vm0, %v10000_v59 }
 0xe47   :  { %v5208_v22 = vpop.f32.mrb[42].mxu1 }
 0xe48   :  { %v5210_v9 = vpop.f32.mrb[43].mxu1  ;;  %v5213_v0 = vadd.f32 %v5208_v22, %v9690_v20 }
 0xe49   :  { %v5214_v10 = vadd.f32 %v5210_v9, %v9685_v47 }
 0xe4a   :  { %v5869_v25 = vmul.f32 -1.442695, %v5213_v0  ;;  %v5451_v0 = vld [vmem:[%s9899_s6 + $0x28] sm:$0xff] }
 0xe4b   :  { %7281 = vtanh.f32 %v5214_v10  ;;  %v5870_v5 = vmul.f32 -1.442695, %v5214_v10 }
 0xe4c   :  { %7283 = vrcp.f32 %v4656_v15  ;;  %v5449_v15 = vld [vmem:[%s9899_s6 + $0x18] sm:$0xff] }
 0xe4d   :  { %7285 = vpow2.f32 %v5869_v25  ;;  %v5452_v25 = vld [vmem:[%s9899_s6 + $0x30] sm:$0xff] }
 0xe4e   :  { %7287 = vpow2.f32 %v5859_v37 }
 0xe55   :  { %v7282_v57 = vpop.eup %7281 }
 0xe56   :  { %5230 = vrot.lane.b32.xlu1 %v7282_v57, %s7354_s4  ;;  %v7284_v48 = vpop.eup %7283 }
 0xe57   :  { %v4676_v2 = vmul.f32 %v7284_v48, %v7280_v62  ;;  %v7286_v16 = vpop.eup %7285  ;;  %v4674_v60 = vmul.f32 %v7284_v48, %v9697_v58  ;;  %v4692_v38 = vrot.slane %v7284_v48, 1 }
 0xe58   :  { %v5221_v61 = vadd.f32 1.0, %v7286_v16  ;;  %v7288_v54 = vpop.eup %7287  ;;  %v5453_v16 = vld [vmem:[%s9899_s6 + $0x38] sm:$0xff] }
 0xe59   :  { %v4657_v1 = vadd.f32 1.0, %v7288_v54  ;;  %v5530_v54 = vld [vmem:[%s9900_s7 + $0x10] sm:$0xff] }
 0xe5a   :  { %4680 = vrot.lane.b32.xlu1 %v4676_v2, %s7354_s4  ;;  %7289 = vrcp.f32 %v5221_v61  ;;  %v5450_v2 = vld [vmem:[%s9899_s6 + $0x20] sm:$0xff]  ;;  %v5529_v61 = vld [vmem:[%s9900_s7 + $0x8] sm:$0xff] }
 0xe5b   :  { %7291 = vtanh.f32 %v4669_v51  ;;  %v7138_v37 = vpack.c.bf16 %v5451_v0, %v5450_v2  ;;  %v7141_v51 = vpack.c.bf16 %v5453_v16, %v5452_v25 }
 0xe5c   :  { %7293 = vrcp.f32 %v4657_v1  ;;  %v7144_v1 = vpack.c.bf16 %v5529_v61, %v5528_v24 }
 0xe64   :  { %v7290_v41 = vpop.eup %7289 }
 0xe65   :  { %v7292_v17 = vpop.eup %7291  ;;  %v5228_v35 = vmul.f32 %v7290_v41, %v9754_v28 }
 0xe66   :  { %v7294_v19 = vpop.eup %7293 }
 0xe67   :  { %v4677_v36 = vmul.f32 %v7294_v19, %v7292_v17  ;;  %v4675_v50 = vmul.f32 %v7294_v19, %v9701_v46  ;;  %v4693_v46 = vrot.slane %v7294_v19, 1  ;;  %v5532_v17 = vld [vmem:[%s9900_s7 + $0x20] sm:$0xff] }
 0xec8   :  { %v5231_v7 = vpop.permute.xlu1 %5230 }
 0xec9   :  { %v5233_v43 = vmul.f32 %v7290_v41, %v5231_v7  ;;  %v5531_v41 = vld [vmem:[%s9900_s7 + $0x18] sm:$0xff] }
 0xeca   :  { %v7147_v7 = vpack.c.bf16 %v5531_v41, %v5530_v54 }
 0xecb   :  { %5235 = vrot.lane.b32.xlu0 %v5233_v43, %s7354_s4 }
 0xecc   :  { %v4681_v34 = vpop.permute.xlu1 %4680 }
 0xecd   :  { %v4686_v4 = vadd.f32 %v4681_v34, %v4674_v60  ;;  %v5533_v60 = vld [vmem:[%s9900_s7 + $0x28] sm:$0xff] }
 0xece   :  { %v7150_v19 = vpack.c.bf16 %v5533_v60, %v5532_v17 }
 0xecf   :  { %7295 = vtanh.f32 %v4686_v4  ;;  %4682 = vrot.lane.b32.xlu0 %v4677_v36, %s7354_s4 }
 0xed9   :  { %v7296_v11 = vpop.eup %7295 }
 0xeda   :  { %4698 = vrot.lane.b32.xlu0 %v7296_v11, %s7354_s4 }
 0xf3d   :  { %v5236_v42 = vpop.permute.xlu0 %5235 }
 0xf3e   :  { %v9783_v26 = vadd.f32 %v5236_v42, %v5228_v35  ;;  %v5441_v35 = vld [vmem:[%s9901_s8 + $0x2] ss:$0 sm:$0xff] }
 0xf40   :  { %7297 = vtanh.f32 %v9783_v26 }
 0xf41   :  { %v4683_v58 = vpop.permute.xlu0 %4682 }
 0xf42   :  { %v4687_v52 = vadd.f32 %v4683_v58, %v4675_v50  ;;  %v5443_v50 = vld [vmem:[%s9901_s8 + $0x3] ss:$0 sm:$0xff] }
 0xf44   :  { %7299 = vtanh.f32 %v4687_v52 }
 0xf45   :  { %7301 = vpow2.f32 %v5870_v5 }
 0xf4a   :  { %v7298_v23 = vpop.eup %7297 }
 0xf4b   :  { %5241 = vrot.lane.b32.xlu1 %v7298_v23, %s7354_s4 }
 0xf4c   :  { %v4699_v21 = vpop.permute.xlu0 %4698 }
 0xf4d   :  { %v4704_v55 = vmul.f32 %v4699_v21, %v4692_v38 }
 0xf4e   :  { %v7300_v18 = vpop.eup %7299 }
 0xf4f   :  { %4700 = vrot.lane.b32.xlu1 %v7300_v18, %s7354_s4  ;;  %v7302_v29 = vpop.eup %7301  ;;  %v5535_v18 = vld [vmem:[%s9900_s7 + $0x38] sm:$0xff] }
 0xf50   :  { %v5222_v28 = vadd.f32 1.0, %v7302_v29  ;;  %v5454_v29 = vld [vmem:[%s9901_s8 + $0x4] ss:$0 sm:$0xff] }
 0xf52   :  { %7303 = vrcp.f32 %v5222_v28 }
 0xf5c   :  { %v7304_v3 = vpop.eup %7303 }
 0xfbd   :  { %v5242_v45 = vpop.permute.xlu1 %5241 }
 0xfbe   :  { %v5244_v12 = vmul.f32 %v7304_v3, %v5242_v45 }
 0xfc0   :  { %5871 = vmatmul.mubr.msk.f32.vlgmr.msra.gmra.mrb[60].mxu0 %vm2316_vm10, %v5244_v12  ;;  %v5536_v12 = vld [vmem:[%s9901_s8 + $0x5] ss:$0 sm:$0xff] }
 0xfc1   :  { %7118 = vmatpush1.bf16.msra.mxu0 %v9609_v6  ;;  %v4701_v32 = vpop.permute.xlu1 %4700  ;;  %5402 = vmatprep.mubr.f32.mxu0 %v10000_v59 }
 0xfc2   :  { %v4705_v63 = vmul.f32 %v4701_v32, %v4693_v46  ;;  %7120 = vmatprep.subr.bf16.mxu0 %v9612_v14 }
 0xfc4   :  { %v5321_v31 = vcombine.low %v4704_v55, %v4705_v63 }
 0xfc5   :  { %7122 = vmatpush1.bf16.msra.mxu0 %v9628_v49 }
 0xfc6   :  { %7124 = vmatprep.subr.bf16.mxu0 %v9632_v30  ;;  %v5328_v53 = vrot.slane %v5321_v31, %v9450_v8 }
 0xfc8   :  { %v5335_v6 = vrot.slane %v5328_v53, %v9450_v8 }
 0xfc9   :  { %7126 = vmatpush1.bf16.msra.mxu0 %v9647_v13 }
 0xfca   :  { %7128 = vmatprep.subr.bf16.mxu0 %v9650_v56 }
 0xfcd   :  { %7130 = vmatpush1.bf16.msra.mxu0 %v9659_v33 }
 0xfce   :  { %7143 = vmatprep.subr.bf16.mxu0 %v10004_v44 }
 0xfd0   :  { %5872 = vmatmul.mubr.msk.f32.vlgmr.msra.gmra.mrb[60].mxu0 %vm2316_vm10, %v5335_v6 }
 0xfd1   :  { %6581 = vmatprep.mubr.msk.f32.mxu0 %vm7346_vm0, %v10000_v59  ;;  %v5446_v59 = vld [vmem:[%s9899_s6] sm:$0xff]  ;;  %7145 = vmatpush3.bf16.msra.mxu0 %v7144_v1 }
 0xfd2   :  { %7146 = vmatprep.subr.bf16.mxu0 %v10004_v44 }
 0xfd5   :  { %7148 = vmatpush3.bf16.msra.mxu0 %v7147_v7 }
 0xfd6   :  { %7149 = vmatprep.subr.bf16.mxu0 %v10004_v44 }
 0xfd9   :  { %7151 = vmatpush3.bf16.msra.mxu0 %v7150_v19 }
 0xfda   :  { %7152 = vmatprep.subr.bf16.mxu0 %v10004_v44 }
0x10a3   :  { %v5404_v14 = vpop.f32.mrb[60].mxu0 }
0x10a4   :  { %v5406_v49 = vpop.f32.mrb[61].mxu0  ;;  %v5409_v56 = vadd.f32 %v5404_v14, %v9690_v20  ;;  %v5448_v20 = vld [vmem:[%s9899_s6 + $0x10] sm:$0xff] }
0x10a5   :  { %v5410_v30 = vadd.f32 %v5406_v49, %v9685_v47  ;;  %v5447_v47 = vld [vmem:[%s9899_s6 + $0x8] sm:$0xff]  ;;  %v7135_v10 = vpack.c.bf16 %v5449_v15, %v5448_v20 }
0x10a6   :  { %v5873_v33 = vmul.f32 -1.442695, %v5409_v56  ;;  %v7132_v9 = vpack.c.bf16 %v5447_v47, %v5446_v59 }
0x10a7   :  { %7305 = vtanh.f32 %v5410_v30  ;;  %v5874_v34 = vmul.f32 -1.442695, %v5410_v30 }
0x10a8   :  { %7307 = vpow2.f32 %v5873_v33  ;;  %7133 = vmatpush3.bf16.msra.mxu1 %v7132_v9 }
0x10a9   :  { %7134 = vmatprep.subr.bf16.mxu1 %v10004_v44 }
0x10ac   :  { %7136 = vmatpush3.bf16.msra.mxu1 %v7135_v10 }
0x10ad   :  { %7137 = vmatprep.subr.bf16.mxu1 %v10004_v44 }
0x10b0   :  { %7139 = vmatpush3.bf16.msra.mxu1 %v7138_v37 }
0x10b1   :  { %v7306_v13 = vpop.eup %7305  ;;  %7140 = vmatprep.subr.bf16.mxu1 %v10004_v44  ;;  %v5534_v44 = vld [vmem:[%s9900_s7 + $0x30] sm:$0xff]  ;;  %s7355_s7 = smov [#allocation3]  }
0x10b2   :  { %5426 = vrot.lane.b32.xlu0 %v7306_v13, %s7354_s4  ;;  %v7308_v8 = vpop.eup %7307  ;;  %v7153_v5 = vpack.c.bf16 %v5535_v18, %v5534_v44  ;;  %s5630_s8 = sshll.u32 %s7355_s7, 4  ;;  %s5631_s8 = int_to_ptr.vmem [resolvable:$true] %s5630_s8 }
0x10b3   :  { %v5417_v27 = vadd.f32 1.0, %v7308_v8  ;;  %s7321_s12 = scalar_lea.vmem %s5631_s8, 32  ;;  %p7326_p1 = scmp.lt.s32.totalorder %s5631_s8, %s5631_s8 }
0x10b4   :  { %7142 = vmatpush3.bf16.msra.mxu1 %v7141_v51  ;;  %7154 = vmatpush3.bf16.msra.mxu0 %v7153_v5  ;;  %p7322_p0 = scmp.ne.s32.totalorder %s5631_s8, %s7321_s12  ;;  %p7327_p2 = scmp.lt.s32.totalorder %s7321_s12, %s7321_s12 }
0x10b5   :  { %7309 = vrcp.f32 %v5417_v27 }
0x10b6   :  { %p7328_p3 = por %p7327_p2, %p7326_p1 }
0x10b8   :  { %p7329_p4 = pnand %p7328_p3, %p7322_p0 }
0x10bf   :  { %v7310_v39 = vpop.eup %7309 }
0x10c0   :  { %v5424_v62 = vmul.f32 %v7310_v39, %v9783_v26 }
0x1124   :  { %v5427_v40 = vpop.permute.xlu0 %5426 }
0x1125   :  { %v5429_v22 = vmul.f32 %v7310_v39, %v5427_v40 }
0x1127   :  { %5431 = vrot.lane.b32.xlu1 %v5429_v22, %s7354_s4 }
0x1199   :  { %v5432_v57 = vpop.permute.xlu1 %5431 }
0x119a   :  { %v5434_v48 = vadd.f32 %v5432_v57, %v5424_v62 }
0x119c   :  { %7311 = vtanh.f32 %v5434_v48 }
0x119d   :  { %7313 = vpow2.f32 %v5874_v34 }
0x11a6   :  { %v7312_v43 = vpop.eup %7311 }
0x11a7   :  { %5437 = vrot.lane.b32.xlu0 %v7312_v43, %s7354_s4  ;;  %v7314_v4 = vpop.eup %7313 }
0x11a8   :  { %v5418_v36 = vadd.f32 1.0, %v7314_v4 }
0x11aa   :  { %7315 = vrcp.f32 %v5418_v36 }
0x11b4   :  { %v7316_v11 = vpop.eup %7315 }
0x1219   :  { %v5438_v42 = vpop.permute.xlu0 %5437 }
0x121a   :  { %v5440_v26 = vmul.f32 %v7316_v11, %v5438_v42 }
0x121c   :  { %v5442_v58 = vmul.f32 %v5441_v35, %v5440_v26 }
0x121e   :  { %v5444_v52 = vadd.f32 %v5443_v50, %v5442_v58 }
0x1220   :  { %v5445_v23 = vmax.f32 %v5444_v52, 0.0 }
0x1222   :  { %6563 = vmatmul.mubr.msk.f32.vlgmr.msra.gmra.mrb[44].mxu1 %vm2316_vm10, %v5445_v23 }
0x12f5   :  { %v5524_v28 = vpop.f32.mrb[44].mxu1 }
0x12f6   :  { %v5525_v3 = vadd.f32 %v5524_v28, %v5454_v29  ;;  %v6564_v45 = vpop.f32.mrb[45].mxu1 }
0x12f8   :  { %6582 = vmatmul.mubr.msk.f32.vlgmr.msra.gmra.mrb[62].mxu0 %vm2316_vm10, %v5525_v3 }
0x13cb   :  { %v5606_v46 = vpop.f32.mrb[62].mxu0 }
0x13cc   :  { %v5607_v21 = vadd.f32 %v5606_v46, %v5536_v12  ;;  %v6583_v32 = vpop.f32.mrb[63].mxu0 }
0x13ce   :  { %v5611_v38 = vsel %vm5610_vm11, %v5607_v21, -inf }
0x13cf   :  { %5612 = vmax.xlane.f32.xlu1 %v5611_v38 }
0x145c   :  { %v5613_v63 = vpop.xlane.xlu1 %5612 }
0x145d   :  { %v5614_v55 = vsub.f32 %v5607_v21, %v5613_v63 }
0x145f   :  { %v5615_v31 = vmul.f32 1.442695, %v5614_v55 }
0x1461   :  { %7317 = vpow2.f32 %v5615_v31 }
0x146b   :  { %v7318_v53 = vpop.eup %7317 }
0x146c   :  { %v5617_v6 = vsel %vm5610_vm11, %v7318_v53, 0.0 }
0x146d   :  { %5618 = vadd.xlane.f32.xlu0 %v5617_v6 }
0x14fa   :  { %v5619_v14 = vpop.xlane.xlu0 %5618 }
0x14fb   :  { %7319 = vlog2.f32 %v5619_v14 }
0x1505   :  { %v7320_v49 = vpop.eup %7319 }
0x1506   :  { %v5621_v30 = vmul.f32 0.6931472, %v7320_v49 }
0x1508   :  { %v5622_v13 = vsub.f32 %v5614_v55, %v5621_v30 }
0x150a   :  { %5623 = vst.msk [vmem:[#allocation3] sm:$0x3] %vm5610_vm11, %v5622_v13 }
0x150b   :  { %7332 = shalt.err (!%p7329_p4)
}
0x150c   :  { %s7333_s15 = scalar_lea.hbm %s9902_s9, 32 }
0x150d   :  { %p7334_p5 = scmp.ne.s32.totalorder %s9902_s9, %s7333_s15  ;;  %p7337_p6 = scmp.lt.u32.totalorder %s7333_s15, %s9902_s9 }
0x150f   :  { %p7339_p7 = pnand %p7337_p6, %p7334_p5 }
0x1511   :  { %7342 = shalt.err (!%p7339_p7)
}
0x1512   :  { %5633 = dma.vmem_to_hbm [thread:$0]  %s5631_s8, 32, %s9902_s9, [#allocation4]  }
0x1513   :  { %7343 = dma.done.wait [#allocation4], 32  }
0x1514   :  { %7344 = vsyncadd [#allocation4], 4294967264 }
0x1515   :  { %5637 = vsyncpa [#allocation4], 1 }

</bundles_post_ra>
